<compile_context>
chip_gen: v7x
topology: tpu7x:2x2x1
jax: 0.10.0
libtpu: 0.0.40
codegen_flags: <defaults>
</compile_context>

<pallas_src>
import jax
import jax.numpy as jnp
from jax import lax
from jax.experimental import pallas as pl
from jax.experimental.pallas import tpu as pltpu

_PAD = 2       # per-stage padding of the cascaded 5x5 pools
_LANES = 128   # TPU lane width


def _make_spp_kernel(H, W):
    """SPPF-cascade kernel body for a fixed spatial size (all slices static)."""

    def kernel(x_ref, p5_ref, p9_ref, p13_ref, pad_ref, rm_ref):
        # x_ref:   (1, H, W, Cb)     channels-last input tile (C on lanes)
        # p*_ref:  (1, H, W, Cb)     pooled outputs (x itself returned by wrapper)
        # pad_ref: (H+4, W+4, Cb)    -inf framed stage input (VMEM scratch)
        # rm_ref:  (H,   W+4, Cb)    H-reduced intermediate (VMEM scratch)
        dt = x_ref.dtype
        Cb = x_ref.shape[-1]
        Hp, Wp = H + 2 * _PAD, W + 2 * _PAD

        # -inf only on the 2-wide border strips; the interior is overwritten
        # by every cascade stage below (saves H*W*Cb redundant VMEM stores).
        pad_ref[0:_PAD, :, :] = jnp.full((_PAD, Wp, Cb), -jnp.inf, dt)
        pad_ref[H + _PAD:Hp, :, :] = jnp.full((_PAD, Wp, Cb), -jnp.inf, dt)
        pad_ref[:, 0:_PAD, :] = jnp.full((Hp, _PAD, Cb), -jnp.inf, dt)
        pad_ref[:, W + _PAD:Wp, :] = jnp.full((Hp, _PAD, Cb), -jnp.inf, dt)

        def pool5(src):
            # stage input into the -inf framed interior
            pad_ref[_PAD:_PAD + H, _PAD:_PAD + W, :] = src
            # stage 1: reduce along H first (leading-dim slices are pure
            # address offsets); single balanced max-tree, one rm_ref store.
            rm_ref[...] = jnp.maximum(
                jnp.maximum(
                    jnp.maximum(pad_ref[0:H, :, :], pad_ref[1:1 + H, :, :]),
                    jnp.maximum(pad_ref[2:2 + H, :, :], pad_ref[3:3 + H, :, :])),
                pad_ref[4:4 + H, :, :])
            # stage 2: sublane-shifted W-reduction on the smaller (H, W+4)
            # operand; balanced tree, no intermediate stores.
            return jnp.maximum(
                jnp.maximum(
                    jnp.maximum(rm_ref[:, 0:W, :], rm_ref[:, 1:1 + W, :]),
                    jnp.maximum(rm_ref[:, 2:2 + W, :], rm_ref[:, 3:3 + W, :])),
                rm_ref[:, 4:4 + W, :])

        # SPPF cascade: 5 -> 5∘5 == 9 -> 5∘5∘5 == 13.  Bit-identical to direct
        # 5/9/13 stride-1 max pools because the pad value is -inf.
        p5 = pool5(x_ref[0, :, :, :])
        p5_ref[0, :, :, :] = p5
        p9 = pool5(p5)
        p9_ref[0, :, :, :] = p9
        p13_ref[0, :, :, :] = pool5(p9)

    return kernel


def _vmem_bytes(H, W, Cb, dsize):
    blk = H * W * Cb * dsize
    return (2 * blk                                  # double-buffered input
            + 3 * 2 * blk                            # 3 double-buffered outputs
            + (H + 2 * _PAD) * (W + 2 * _PAD) * Cb * dsize   # pad scratch
            + H * (W + 2 * _PAD) * Cb * dsize)               # rm scratch


def _pick_cb(Cpad, N, H, W, dsize):
    """Largest 128-multiple channel tile that fits VMEM and keeps >=2 grid steps."""
    for cb in (512, 384, 256, 128):
        if Cpad % cb != 0:
            continue
        if _vmem_bytes(H, W, cb, dsize) > 20 * 1024 * 1024:
            continue
        if N * (Cpad // cb) < 2 and cb > 128:
            continue   # keep both v7x TensorCores busy when possible
        return cb
    # TODO(synk): add H-band tiling (6-row -inf halo for the full cascade) for
    # feature maps where even a 128-lane full-image tile exceeds the VMEM budget.
    return 128


def spp_nhwc_parts(x_nhwc):
    """Glue-free SPP: x (N,H,W,C) float -> (x, p5, p9, p13), each (N,H,W,C)."""
    N, H, W, C = x_nhwc.shape
    if not jnp.issubdtype(x_nhwc.dtype, jnp.floating):
        raise ValueError("SPP kernel uses -inf padding; requires a float dtype")
    dsize = jnp.dtype(x_nhwc.dtype).itemsize

    # pad C up to a lane multiple so every load/store is lane-dense
    Cpad = -(-C // _LANES) * _LANES
    xin = x_nhwc if Cpad == C else jnp.pad(
        x_nhwc, ((0, 0), (0, 0), (0, 0), (0, Cpad - C)))

    Cb = _pick_cb(Cpad, N, H, W, dsize)
    vlim = max(32 * 1024 * 1024, int(1.25 * _vmem_bytes(H, W, Cb, dsize)))

    part = jax.ShapeDtypeStruct((N, H, W, Cpad), x_nhwc.dtype)
    spec = pl.BlockSpec((1, H, W, Cb), lambda n, cb: (n, 0, 0, cb))

    p5, p9, p13 = pl.pallas_call(
        _make_spp_kernel(H, W),
        out_shape=(part, part, part),
        grid_spec=pltpu.PrefetchScalarGridSpec(
            num_scalar_prefetch=0,
            grid=(N, Cpad // Cb),
            in_specs=[spec],
            out_specs=[spec, spec, spec],
            scratch_shapes=[
                pltpu.VMEM((H + 2 * _PAD, W + 2 * _PAD, Cb), x_nhwc.dtype),
                pltpu.VMEM((H, W + 2 * _PAD, Cb), x_nhwc.dtype),
            ]),
        compiler_params=pltpu.CompilerParams(
            dimension_semantics=("parallel", "parallel"),
            vmem_limit_bytes=vlim),
    )(xin)

    if Cpad != C:
        p5, p9, p13 = p5[..., :C], p9[..., :C], p13[..., :C]
    return x_nhwc, p5, p9, p13


def spp(x):
    """PyTorch SPP.forward: x (N,C,H,W) -> cat([x, mp5, mp9, mp13], dim=1)."""
    N, C, H, W = x.shape
    # NCHW<->NHWC layout glue is only here because the PyTorch API is NCHW;
    # channels-last pipelines should call spp_nhwc_parts directly (no glue).
    x_nhwc = jnp.transpose(x, (0, 2, 3, 1))
    _, p5, p9, p13 = spp_nhwc_parts(x_nhwc)
    to_nchw = lambda t: jnp.transpose(t, (0, 3, 1, 2))
    return jnp.concatenate([x, to_nchw(p5), to_nchw(p9), to_nchw(p13)], axis=1)


def _reference_spp(x):
    """Pure-JAX reference via lax.reduce_window (matches F.max_pool2d)."""

    def mp(x, k, p):
        return lax.reduce_window(
            x, -jnp.inf, lax.max,
            window_dimensions=(1, 1, k, k),
            window_strides=(1, 1, 1, 1),
            padding=((0, 0), (0, 0), (p, p), (p, p)))

    return jnp.concatenate([x, mp(x, 5, 2), mp(x, 9, 4), mp(x, 13, 6)], axis=1)


if __name__ == "__main__":
    key = jax.random.PRNGKey(0)
    k1, k2 = jax.random.split(key)

    # small-C case (C padded to 128 lanes internally)
    x = jax.random.normal(k1, (2, 4, 16, 16), dtype=jnp.float32)
    out = jax.block_until_ready(jax.jit(spp)(x))
    ref = jax.block_until_ready(_reference_spp(x))
    assert out.shape == (2, 16, 16, 16), out.shape
    assert jnp.allclose(out, ref), "Pallas SPP mismatch vs reference (C=4)"

    # lane-aligned case (exercises the multi-block channel grid)
    x2 = jax.random.normal(k2, (1, 256, 16, 16), dtype=jnp.float32)
    out2 = jax.block_until_ready(jax.jit(spp)(x2))
    ref2 = jax.block_until_ready(_reference_spp(x2))
    assert out2.shape == (1, 1024, 16, 16), out2.shape
    assert jnp.allclose(out2, ref2), "Pallas SPP mismatch vs reference (C=256)"

    print("KERNEL_OK")
</pallas_src>

<mosaic_0001>
module attributes {stable_mosaic.version = 11 : i64} {
  func.func @kernel(%arg0: i32, %arg1: i32, %arg2: memref<1x16x16x128xf32, #tpu.memory_space<vmem>>, %arg3: memref<1x16x16x128xf32, #tpu.memory_space<vmem>>, %arg4: memref<1x16x16x128xf32, #tpu.memory_space<vmem>>, %arg5: memref<1x16x16x128xf32, #tpu.memory_space<vmem>>, %arg6: memref<20x20x128xf32, #tpu.memory_space<vmem>>, %arg7: memref<16x20x128xf32, #tpu.memory_space<vmem>>) attributes {dimension_semantics = [#tpu.dimension_semantics<parallel>, #tpu.dimension_semantics<parallel>], iteration_bounds = array<i64: 2, 1>, scalar_prefetch = 0 : i64, scratch_operands = 2 : i64, tpu.core_type = #tpu.core_type<tc>, window_params = [{transform_indices = @transform_0, window_bounds = array<i64: 1, 16, 16, 128>}, {transform_indices = @transform_1, window_bounds = array<i64: 1, 16, 16, 128>}, {transform_indices = @transform_2, window_bounds = array<i64: 1, 16, 16, 128>}, {transform_indices = @transform_3, window_bounds = array<i64: 1, 16, 16, 128>}]} {
    %cst = arith.constant 0xFF800000 : f32
    %0 = vector.broadcast %cst : f32 to vector<2x20x128xf32>
    %c0 = arith.constant 0 : index
    %c0_0 = arith.constant 0 : index
    %c0_1 = arith.constant 0 : index
    %1 = vector.load %arg6[%c0, %c0_0, %c0_1] : memref<20x20x128xf32, #tpu.memory_space<vmem>>, vector<2x20x128xf32>
    tpu.vector_store %arg6[%c0, %c0_0, %c0_1], %0 {strides = array<i32>} : memref<20x20x128xf32, #tpu.memory_space<vmem>>, vector<2x20x128xf32>,
    %cst_2 = arith.constant 0xFF800000 : f32
    %2 = vector.broadcast %cst_2 : f32 to vector<2x20x128xf32>
    %c18 = arith.constant 18 : index
    %c0_3 = arith.constant 0 : index
    %c0_4 = arith.constant 0 : index
    %3 = vector.load %arg6[%c18, %c0_3, %c0_4] : memref<20x20x128xf32, #tpu.memory_space<vmem>>, vector<2x20x128xf32>
    tpu.vector_store %arg6[%c18, %c0_3, %c0_4], %2 {strides = array<i32>} : memref<20x20x128xf32, #tpu.memory_space<vmem>>, vector<2x20x128xf32>,
    %cst_5 = arith.constant 0xFF800000 : f32
    %4 = vector.broadcast %cst_5 : f32 to vector<20x2x128xf32>
    %c0_6 = arith.constant 0 : index
    %c0_7 = arith.constant 0 : index
    %c0_8 = arith.constant 0 : index
    %5 = vector.load %arg6[%c0_6, %c0_7, %c0_8] : memref<20x20x128xf32, #tpu.memory_space<vmem>>, vector<20x2x128xf32>
    tpu.vector_store %arg6[%c0_6, %c0_7, %c0_8], %4 {strides = array<i32>} : memref<20x20x128xf32, #tpu.memory_space<vmem>>, vector<20x2x128xf32>,
    %cst_9 = arith.constant 0xFF800000 : f32
    %6 = vector.broadcast %cst_9 : f32 to vector<20x2x128xf32>
    %c0_10 = arith.constant 0 : index
    %c18_11 = arith.constant 18 : index
    %c0_12 = arith.constant 0 : index
    %7 = vector.load %arg6[%c0_10, %c18_11, %c0_12] : memref<20x20x128xf32, #tpu.memory_space<vmem>>, vector<20x2x128xf32>
    tpu.vector_store %arg6[%c0_10, %c18_11, %c0_12], %6 {strides = array<i32>} : memref<20x20x128xf32, #tpu.memory_space<vmem>>, vector<20x2x128xf32>,
    %c0_13 = arith.constant 0 : index
    %c0_14 = arith.constant 0 : index
    %c0_15 = arith.constant 0 : index
    %c0_16 = arith.constant 0 : index
    %8 = vector.load %arg2[%c0_13, %c0_14, %c0_15, %c0_16] : memref<1x16x16x128xf32, #tpu.memory_space<vmem>>, vector<1x16x16x128xf32>
    %9 = vector.shape_cast %8 : vector<1x16x16x128xf32> to vector<16x16x128xf32>
    %c2 = arith.constant 2 : index
    %c2_17 = arith.constant 2 : index
    %c0_18 = arith.constant 0 : index
    %10 = vector.load %arg6[%c2, %c2_17, %c0_18] : memref<20x20x128xf32, #tpu.memory_space<vmem>>, vector<16x16x128xf32>
    tpu.vector_store %arg6[%c2, %c2_17, %c0_18], %9 {strides = array<i32>} : memref<20x20x128xf32, #tpu.memory_space<vmem>>, vector<16x16x128xf32>,
    %c0_19 = arith.constant 0 : index
    %c0_20 = arith.constant 0 : index
    %c0_21 = arith.constant 0 : index
    %11 = vector.load %arg6[%c0_19, %c0_20, %c0_21] : memref<20x20x128xf32, #tpu.memory_space<vmem>>, vector<16x20x128xf32>
    %c1 = arith.constant 1 : index
    %c0_22 = arith.constant 0 : index
    %c0_23 = arith.constant 0 : index
    %12 = vector.load %arg6[%c1, %c0_22, %c0_23] : memref<20x20x128xf32, #tpu.memory_space<vmem>>, vector<16x20x128xf32>
    %13 = arith.maximumf %11, %12 : vector<16x20x128xf32>
    %c2_24 = arith.constant 2 : index
    %c0_25 = arith.constant 0 : index
    %c0_26 = arith.constant 0 : index
    %14 = vector.load %arg6[%c2_24, %c0_25, %c0_26] : memref<20x20x128xf32, #tpu.memory_space<vmem>>, vector<16x20x128xf32>
    %c3 = arith.constant 3 : index
    %c0_27 = arith.constant 0 : index
    %c0_28 = arith.constant 0 : index
    %15 = vector.load %arg6[%c3, %c0_27, %c0_28] : memref<20x20x128xf32, #tpu.memory_space<vmem>>, vector<16x20x128xf32>
    %16 = arith.maximumf %14, %15 : vector<16x20x128xf32>
    %17 = arith.maximumf %13, %16 : vector<16x20x128xf32>
    %c4 = arith.constant 4 : index
    %c0_29 = arith.constant 0 : index
    %c0_30 = arith.constant 0 : index
    %18 = vector.load %arg6[%c4, %c0_29, %c0_30] : memref<20x20x128xf32, #tpu.memory_space<vmem>>, vector<16x20x128xf32>
    %19 = arith.maximumf %17, %18 : vector<16x20x128xf32>
    %c0_31 = arith.constant 0 : index
    %c0_32 = arith.constant 0 : index
    %c0_33 = arith.constant 0 : index
    %20 = vector.load %arg7[%c0_31, %c0_32, %c0_33] : memref<16x20x128xf32, #tpu.memory_space<vmem>>, vector<16x20x128xf32>
    tpu.vector_store %arg7[%c0_31, %c0_32, %c0_33], %19 {strides = array<i32>} : memref<16x20x128xf32, #tpu.memory_space<vmem>>, vector<16x20x128xf32>,
    %c0_34 = arith.constant 0 : index
    %c0_35 = arith.constant 0 : index
    %c0_36 = arith.constant 0 : index
    %21 = vector.load %arg7[%c0_34, %c0_35, %c0_36] : memref<16x20x128xf32, #tpu.memory_space<vmem>>, vector<16x16x128xf32>
    %c0_37 = arith.constant 0 : index
    %c1_38 = arith.constant 1 : index
    %c0_39 = arith.constant 0 : index
    %22 = vector.load %arg7[%c0_37, %c1_38, %c0_39] : memref<16x20x128xf32, #tpu.memory_space<vmem>>, vector<16x16x128xf32>
    %23 = arith.maximumf %21, %22 : vector<16x16x128xf32>
    %c0_40 = arith.constant 0 : index
    %c2_41 = arith.constant 2 : index
    %c0_42 = arith.constant 0 : index
    %24 = vector.load %arg7[%c0_40, %c2_41, %c0_42] : memref<16x20x128xf32, #tpu.memory_space<vmem>>, vector<16x16x128xf32>
    %c0_43 = arith.constant 0 : index
    %c3_44 = arith.constant 3 : index
    %c0_45 = arith.constant 0 : index
    %25 = vector.load %arg7[%c0_43, %c3_44, %c0_45] : memref<16x20x128xf32, #tpu.memory_space<vmem>>, vector<16x16x128xf32>
    %26 = arith.maximumf %24, %25 : vector<16x16x128xf32>
    %27 = arith.maximumf %23, %26 : vector<16x16x128xf32>
    %c0_46 = arith.constant 0 : index
    %c4_47 = arith.constant 4 : index
    %c0_48 = arith.constant 0 : index
    %28 = vector.load %arg7[%c0_46, %c4_47, %c0_48] : memref<16x20x128xf32, #tpu.memory_space<vmem>>, vector<16x16x128xf32>
    %29 = arith.maximumf %27, %28 : vector<16x16x128xf32>
    %c0_49 = arith.constant 0 : index
    %c0_50 = arith.constant 0 : index
    %c0_51 = arith.constant 0 : index
    %c0_52 = arith.constant 0 : index
    %30 = vector.load %arg3[%c0_49, %c0_50, %c0_51, %c0_52] : memref<1x16x16x128xf32, #tpu.memory_space<vmem>>, vector<1x16x16x128xf32>
    %31 = vector.shape_cast %30 : vector<1x16x16x128xf32> to vector<16x16x128xf32>
    %32 = vector.shape_cast %29 : vector<16x16x128xf32> to vector<1x16x16x128xf32>
    tpu.vector_store %arg3[%c0_49, %c0_50, %c0_51, %c0_52], %32 {strides = array<i32>} : memref<1x16x16x128xf32, #tpu.memory_space<vmem>>, vector<1x16x16x128xf32>,
    %c2_53 = arith.constant 2 : index
    %c2_54 = arith.constant 2 : index
    %c0_55 = arith.constant 0 : index
    %33 = vector.load %arg6[%c2_53, %c2_54, %c0_55] : memref<20x20x128xf32, #tpu.memory_space<vmem>>, vector<16x16x128xf32>
    tpu.vector_store %arg6[%c2_53, %c2_54, %c0_55], %29 {strides = array<i32>} : memref<20x20x128xf32, #tpu.memory_space<vmem>>, vector<16x16x128xf32>,
    %c0_56 = arith.constant 0 : index
    %c0_57 = arith.constant 0 : index
    %c0_58 = arith.constant 0 : index
    %34 = vector.load %arg6[%c0_56, %c0_57, %c0_58] : memref<20x20x128xf32, #tpu.memory_space<vmem>>, vector<16x20x128xf32>
    %c1_59 = arith.constant 1 : index
    %c0_60 = arith.constant 0 : index
    %c0_61 = arith.constant 0 : index
    %35 = vector.load %arg6[%c1_59, %c0_60, %c0_61] : memref<20x20x128xf32, #tpu.memory_space<vmem>>, vector<16x20x128xf32>
    %36 = arith.maximumf %34, %35 : vector<16x20x128xf32>
    %c2_62 = arith.constant 2 : index
    %c0_63 = arith.constant 0 : index
    %c0_64 = arith.constant 0 : index
    %37 = vector.load %arg6[%c2_62, %c0_63, %c0_64] : memref<20x20x128xf32, #tpu.memory_space<vmem>>, vector<16x20x128xf32>
    %c3_65 = arith.constant 3 : index
    %c0_66 = arith.constant 0 : index
    %c0_67 = arith.constant 0 : index
    %38 = vector.load %arg6[%c3_65, %c0_66, %c0_67] : memref<20x20x128xf32, #tpu.memory_space<vmem>>, vector<16x20x128xf32>
    %39 = arith.maximumf %37, %38 : vector<16x20x128xf32>
    %40 = arith.maximumf %36, %39 : vector<16x20x128xf32>
    %c4_68 = arith.constant 4 : index
    %c0_69 = arith.constant 0 : index
    %c0_70 = arith.constant 0 : index
    %41 = vector.load %arg6[%c4_68, %c0_69, %c0_70] : memref<20x20x128xf32, #tpu.memory_space<vmem>>, vector<16x20x128xf32>
    %42 = arith.maximumf %40, %41 : vector<16x20x128xf32>
    %c0_71 = arith.constant 0 : index
    %c0_72 = arith.constant 0 : index
    %c0_73 = arith.constant 0 : index
    %43 = vector.load %arg7[%c0_71, %c0_72, %c0_73] : memref<16x20x128xf32, #tpu.memory_space<vmem>>, vector<16x20x128xf32>
    tpu.vector_store %arg7[%c0_71, %c0_72, %c0_73], %42 {strides = array<i32>} : memref<16x20x128xf32, #tpu.memory_space<vmem>>, vector<16x20x128xf32>,
    %c0_74 = arith.constant 0 : index
    %c0_75 = arith.constant 0 : index
    %c0_76 = arith.constant 0 : index
    %44 = vector.load %arg7[%c0_74, %c0_75, %c0_76] : memref<16x20x128xf32, #tpu.memory_space<vmem>>, vector<16x16x128xf32>
    %c0_77 = arith.constant 0 : index
    %c1_78 = arith.constant 1 : index
    %c0_79 = arith.constant 0 : index
    %45 = vector.load %arg7[%c0_77, %c1_78, %c0_79] : memref<16x20x128xf32, #tpu.memory_space<vmem>>, vector<16x16x128xf32>
    %46 = arith.maximumf %44, %45 : vector<16x16x128xf32>
    %c0_80 = arith.constant 0 : index
    %c2_81 = arith.constant 2 : index
    %c0_82 = arith.constant 0 : index
    %47 = vector.load %arg7[%c0_80, %c2_81, %c0_82] : memref<16x20x128xf32, #tpu.memory_space<vmem>>, vector<16x16x128xf32>
    %c0_83 = arith.constant 0 : index
    %c3_84 = arith.constant 3 : index
    %c0_85 = arith.constant 0 : index
    %48 = vector.load %arg7[%c0_83, %c3_84, %c0_85] : memref<16x20x128xf32, #tpu.memory_space<vmem>>, vector<16x16x128xf32>
    %49 = arith.maximumf %47, %48 : vector<16x16x128xf32>
    %50 = arith.maximumf %46, %49 : vector<16x16x128xf32>
    %c0_86 = arith.constant 0 : index
    %c4_87 = arith.constant 4 : index
    %c0_88 = arith.constant 0 : index
    %51 = vector.load %arg7[%c0_86, %c4_87, %c0_88] : memref<16x20x128xf32, #tpu.memory_space<vmem>>, vector<16x16x128xf32>
    %52 = arith.maximumf %50, %51 : vector<16x16x128xf32>
    %c0_89 = arith.constant 0 : index
    %c0_90 = arith.constant 0 : index
    %c0_91 = arith.constant 0 : index
    %c0_92 = arith.constant 0 : index
    %53 = vector.load %arg4[%c0_89, %c0_90, %c0_91, %c0_92] : memref<1x16x16x128xf32, #tpu.memory_space<vmem>>, vector<1x16x16x128xf32>
    %54 = vector.shape_cast %53 : vector<1x16x16x128xf32> to vector<16x16x128xf32>
    %55 = vector.shape_cast %52 : vector<16x16x128xf32> to vector<1x16x16x128xf32>
    tpu.vector_store %arg4[%c0_89, %c0_90, %c0_91, %c0_92], %55 {strides = array<i32>} : memref<1x16x16x128xf32, #tpu.memory_space<vmem>>, vector<1x16x16x128xf32>,
    %c2_93 = arith.constant 2 : index
    %c2_94 = arith.constant 2 : index
    %c0_95 = arith.constant 0 : index
    %56 = vector.load %arg6[%c2_93, %c2_94, %c0_95] : memref<20x20x128xf32, #tpu.memory_space<vmem>>, vector<16x16x128xf32>
    tpu.vector_store %arg6[%c2_93, %c2_94, %c0_95], %52 {strides = array<i32>} : memref<20x20x128xf32, #tpu.memory_space<vmem>>, vector<16x16x128xf32>,
    %c0_96 = arith.constant 0 : index
    %c0_97 = arith.constant 0 : index
    %c0_98 = arith.constant 0 : index
    %57 = vector.load %arg6[%c0_96, %c0_97, %c0_98] : memref<20x20x128xf32, #tpu.memory_space<vmem>>, vector<16x20x128xf32>
    %c1_99 = arith.constant 1 : index
    %c0_100 = arith.constant 0 : index
    %c0_101 = arith.constant 0 : index
    %58 = vector.load %arg6[%c1_99, %c0_100, %c0_101] : memref<20x20x128xf32, #tpu.memory_space<vmem>>, vector<16x20x128xf32>
    %59 = arith.maximumf %57, %58 : vector<16x20x128xf32>
    %c2_102 = arith.constant 2 : index
    %c0_103 = arith.constant 0 : index
    %c0_104 = arith.constant 0 : index
    %60 = vector.load %arg6[%c2_102, %c0_103, %c0_104] : memref<20x20x128xf32, #tpu.memory_space<vmem>>, vector<16x20x128xf32>
    %c3_105 = arith.constant 3 : index
    %c0_106 = arith.constant 0 : index
    %c0_107 = arith.constant 0 : index
    %61 = vector.load %arg6[%c3_105, %c0_106, %c0_107] : memref<20x20x128xf32, #tpu.memory_space<vmem>>, vector<16x20x128xf32>
    %62 = arith.maximumf %60, %61 : vector<16x20x128xf32>
    %63 = arith.maximumf %59, %62 : vector<16x20x128xf32>
    %c4_108 = arith.constant 4 : index
    %c0_109 = arith.constant 0 : index
    %c0_110 = arith.constant 0 : index
    %64 = vector.load %arg6[%c4_108, %c0_109, %c0_110] : memref<20x20x128xf32, #tpu.memory_space<vmem>>, vector<16x20x128xf32>
    %65 = arith.maximumf %63, %64 : vector<16x20x128xf32>
    %c0_111 = arith.constant 0 : index
    %c0_112 = arith.constant 0 : index
    %c0_113 = arith.constant 0 : index
    %66 = vector.load %arg7[%c0_111, %c0_112, %c0_113] : memref<16x20x128xf32, #tpu.memory_space<vmem>>, vector<16x20x128xf32>
    tpu.vector_store %arg7[%c0_111, %c0_112, %c0_113], %65 {strides = array<i32>} : memref<16x20x128xf32, #tpu.memory_space<vmem>>, vector<16x20x128xf32>,
    %c0_114 = arith.constant 0 : index
    %c0_115 = arith.constant 0 : index
    %c0_116 = arith.constant 0 : index
    %67 = vector.load %arg7[%c0_114, %c0_115, %c0_116] : memref<16x20x128xf32, #tpu.memory_space<vmem>>, vector<16x16x128xf32>
    %c0_117 = arith.constant 0 : index
    %c1_118 = arith.constant 1 : index
    %c0_119 = arith.constant 0 : index
    %68 = vector.load %arg7[%c0_117, %c1_118, %c0_119] : memref<16x20x128xf32, #tpu.memory_space<vmem>>, vector<16x16x128xf32>
    %69 = arith.maximumf %67, %68 : vector<16x16x128xf32>
    %c0_120 = arith.constant 0 : index
    %c2_121 = arith.constant 2 : index
    %c0_122 = arith.constant 0 : index
    %70 = vector.load %arg7[%c0_120, %c2_121, %c0_122] : memref<16x20x128xf32, #tpu.memory_space<vmem>>, vector<16x16x128xf32>
    %c0_123 = arith.constant 0 : index
    %c3_124 = arith.constant 3 : index
    %c0_125 = arith.constant 0 : index
    %71 = vector.load %arg7[%c0_123, %c3_124, %c0_125] : memref<16x20x128xf32, #tpu.memory_space<vmem>>, vector<16x16x128xf32>
    %72 = arith.maximumf %70, %71 : vector<16x16x128xf32>
    %73 = arith.maximumf %69, %72 : vector<16x16x128xf32>
    %c0_126 = arith.constant 0 : index
    %c4_127 = arith.constant 4 : index
    %c0_128 = arith.constant 0 : index
    %74 = vector.load %arg7[%c0_126, %c4_127, %c0_128] : memref<16x20x128xf32, #tpu.memory_space<vmem>>, vector<16x16x128xf32>
    %75 = arith.maximumf %73, %74 : vector<16x16x128xf32>
    %c0_129 = arith.constant 0 : index
    %c0_130 = arith.constant 0 : index
    %c0_131 = arith.constant 0 : index
    %c0_132 = arith.constant 0 : index
    %76 = vector.load %arg5[%c0_129, %c0_130, %c0_131, %c0_132] : memref<1x16x16x128xf32, #tpu.memory_space<vmem>>, vector<1x16x16x128xf32>
    %77 = vector.shape_cast %76 : vector<1x16x16x128xf32> to vector<16x16x128xf32>
    %78 = vector.shape_cast %75 : vector<16x16x128xf32> to vector<1x16x16x128xf32>
    tpu.vector_store %arg5[%c0_129, %c0_130, %c0_131, %c0_132], %78 {strides = array<i32>} : memref<1x16x16x128xf32, #tpu.memory_space<vmem>>, vector<1x16x16x128xf32>,
    return
  }
  func.func @transform_0(%arg0: i32, %arg1: i32) -> (i32, i32, i32, i32) {
    %c0_i32 = arith.constant 0 : i32
    %c0_i32_0 = arith.constant 0 : i32
    %c0_i32_1 = arith.constant 0 : i32
    return %arg0, %c0_i32, %c0_i32_0, %arg1 : i32, i32, i32, i32
  }
  func.func @transform_1(%arg0: i32, %arg1: i32) -> (i32, i32, i32, i32) {
    %c0_i32 = arith.constant 0 : i32
    %c0_i32_0 = arith.constant 0 : i32
    %c0_i32_1 = arith.constant 0 : i32
    return %arg0, %c0_i32, %c0_i32_0, %arg1 : i32, i32, i32, i32
  }
  func.func @transform_2(%arg0: i32, %arg1: i32) -> (i32, i32, i32, i32) {
    %c0_i32 = arith.constant 0 : i32
    %c0_i32_0 = arith.constant 0 : i32
    %c0_i32_1 = arith.constant 0 : i32
    return %arg0, %c0_i32, %c0_i32_0, %arg1 : i32, i32, i32, i32
  }
  func.func @transform_3(%arg0: i32, %arg1: i32) -> (i32, i32, i32, i32) {
    %c0_i32 = arith.constant 0 : i32
    %c0_i32_0 = arith.constant 0 : i32
    %c0_i32_1 = arith.constant 0 : i32
    return %arg0, %c0_i32, %c0_i32_0, %arg1 : i32, i32, i32, i32
  }
}

</mosaic_0001>

<bundles_post_ra>
// kernel: spp.1
= control target key start
LH: loop header
LB: loop body
LE: loop exit
PB: predicated region body
PF: predicated region fallthrough
CT: control target
= control target key end

     0   :  { %s3098_s12 = smov 0   ;;  %s3100_s13 = smov 0   ;;  %s4371_s0 = inlined_call_operand.vmem [shape: f32[2,16,16,128], index: 0, kind: input, shape index: {}]   ;;  %s4372_s1 = inlined_call_operand.vmem [shape: f32[2,16,16,128], index: 1, kind: output, shape index: {0}]   ;;  %s4373_s2 = inlined_call_operand.vmem [shape: f32[2,16,16,128], index: 2, kind: output, shape index: {1}]   ;;  %s4374_s3 = inlined_call_operand.vmem [shape: f32[2,16,16,128], index: 3, kind: output, shape index: {2}]  }
   0x1   :  { %s3102_s14 = smov 0  }
   0x2 LB: > { %s26_s15 = sadd.s32 1, %s3071_s13  ;;  %p3009_p0 = scmp.ge.s32.totalorder %s3075_s14, 1  ;;  %s3075_s14 = sphi %s3102_s14, %s14_s14   ;;  %s3071_s13 = sphi %s3100_s13, %s4626_s13   ;;  %s3067_s12 = sphi %s3098_s12, %s4625_s12  }
   0x3   : > { %p28_p1 = scmp.ge.s32.totalorder %s26_s15, 2  ;;  %p165_p2 = scmp.lt.s32.totalorder %s3075_s14, 3 }
   0x5   : > { %s4628_s15 = smov (%p28_p1, %s26_s15), 0  ;;  %p166_p3 = pnand %p3009_p0, %p165_p2 }
   0x7   : > { %169 = sbr.rel (%p166_p3) target bundleno = 376 (0x178), region = 24 }
   0xe   : > { %p211_p4 = scmp.lt.s32.totalorder %s3067_s12, 1  ;;  %v3077_v0 = vmov -inf  }
   0xf   : > { %243 = vst [vmem:[#allocation2] sm:$0xff] %v3077_v0  ;;  %244 = vst [vmem:[#allocation2 + $0x8] sm:$0xff] %v3077_v0 }
  0x10   : > { %245 = vst [vmem:[#allocation2 + $0x10] sm:$0xf] %v3077_v0  ;;  %246 = vst [vmem:[#allocation2 + $0x18] sm:$0xff] %v3077_v0  ;;  %s4630_s12 = smov (!%p211_p4, %s3067_s12), 1 }
  0x11   : > { %248 = vst [vmem:[#allocation2 + $0x28] sm:$0xf] %v3077_v0  ;;  %250 = vst [vmem:[#allocation2 + $0x1b0] sm:$0xff] %v3077_v0  ;;  %s3122_s16 = sshll.u32 %s4630_s12, 8 }
  0x12   : > { %252 = vst [vmem:[#allocation2 + $0x1c0] sm:$0xf] %v3077_v0  ;;  %253 = vst [vmem:[#allocation2 + $0x1c8] sm:$0xff] %v3077_v0  ;;  %s3128_s19 = scalar_lea.vmem %s4371_s0, %s3122_s16  ;;  %s3370_s22 = scalar_lea.vmem %s4372_s1, %s3122_s16 }
  0x13   : > { %255 = vst [vmem:[#allocation2 + $0x1d8] sm:$0xf] %v3077_v0  ;;  %258 = vst [vmem:[#allocation2 + $0x30] sm:$0x3] %v3077_v0  ;;  %v296_v1 = vld [vmem:[%s3128_s19] sm:$0xff]  ;;  %v297_v2 = vld [vmem:[%s3128_s19 + $0x8] sm:$0xff]  ;;  %s3559_s25 = scalar_lea.vmem %s4373_s2, %s3122_s16  ;;  %s4295_s28 = scalar_lea.vmem %s4374_s3, %s3122_s16 }
  0x14   : > { %259 = vst [vmem:[#allocation2 + $0x48] sm:$0x3] %v3077_v0  ;;  %260 = vst [vmem:[#allocation2 + $0x60] sm:$0x3] %v3077_v0  ;;  %v298_v3 = vld [vmem:[%s3128_s19 + $0x10] sm:$0xff]  ;;  %v299_v4 = vld [vmem:[%s3128_s19 + $0x18] sm:$0xff] }
  0x15   : > { %261 = vst [vmem:[#allocation2 + $0x78] sm:$0x3] %v3077_v0  ;;  %262 = vst [vmem:[#allocation2 + $0x90] sm:$0x3] %v3077_v0  ;;  %v300_v5 = vld [vmem:[%s3128_s19 + $0x20] sm:$0xff]  ;;  %v301_v6 = vld [vmem:[%s3128_s19 + $0x28] sm:$0xff] }
  0x16   : > { %263 = vst [vmem:[#allocation2 + $0xa8] sm:$0x3] %v3077_v0  ;;  %264 = vst [vmem:[#allocation2 + $0xc0] sm:$0x3] %v3077_v0  ;;  %v302_v7 = vld [vmem:[%s3128_s19 + $0x30] sm:$0xff]  ;;  %v303_v8 = vld [vmem:[%s3128_s19 + $0x38] sm:$0xff] }
  0x17   : > { %265 = vst [vmem:[#allocation2 + $0xd8] sm:$0x3] %v3077_v0  ;;  %266 = vst [vmem:[#allocation2 + $0xf0] sm:$0x3] %v3077_v0  ;;  %v304_v9 = vld [vmem:[%s3128_s19 + $0x40] sm:$0xff]  ;;  %v305_v10 = vld [vmem:[%s3128_s19 + $0x48] sm:$0xff] }
  0x18   : > { %267 = vst [vmem:[#allocation2 + $0x108] sm:$0x3] %v3077_v0  ;;  %268 = vst [vmem:[#allocation2 + $0x120] sm:$0x3] %v3077_v0  ;;  %v306_v11 = vld [vmem:[%s3128_s19 + $0x50] sm:$0xff]  ;;  %v307_v12 = vld [vmem:[%s3128_s19 + $0x58] sm:$0xff] }
  0x19   : > { %269 = vst [vmem:[#allocation2 + $0x138] sm:$0x3] %v3077_v0  ;;  %270 = vst [vmem:[#allocation2 + $0x150] sm:$0x3] %v3077_v0  ;;  %v308_v13 = vld [vmem:[%s3128_s19 + $0x60] sm:$0xff]  ;;  %v309_v14 = vld [vmem:[%s3128_s19 + $0x68] sm:$0xff] }
  0x1a   : > { %271 = vst [vmem:[#allocation2 + $0x168] sm:$0x3] %v3077_v0  ;;  %272 = vst [vmem:[#allocation2 + $0x180] sm:$0x3] %v3077_v0  ;;  %v310_v17 = vld [vmem:[%s3128_s19 + $0x70] sm:$0xff]  ;;  %v311_v18 = vld [vmem:[%s3128_s19 + $0x78] sm:$0xff] }
  0x1b   : > { %273 = vst [vmem:[#allocation2 + $0x198] sm:$0x3] %v3077_v0  ;;  %278 = vst [vmem:[#allocation2 + $0x42] sm:$0x3] %v3077_v0  ;;  %v312_v19 = vld [vmem:[%s3128_s19 + $0x80] sm:$0xff]  ;;  %v313_v20 = vld [vmem:[%s3128_s19 + $0x88] sm:$0xff] }
  0x1c   : > { %279 = vst [vmem:[#allocation2 + $0x5a] sm:$0x3] %v3077_v0  ;;  %280 = vst [vmem:[#allocation2 + $0x72] sm:$0x3] %v3077_v0  ;;  %v314_v21 = vld [vmem:[%s3128_s19 + $0x90] sm:$0xff]  ;;  %v315_v22 = vld [vmem:[%s3128_s19 + $0x98] sm:$0xff] }
  0x1d   : > { %281 = vst [vmem:[#allocation2 + $0x8a] sm:$0x3] %v3077_v0  ;;  %282 = vst [vmem:[#allocation2 + $0xa2] sm:$0x3] %v3077_v0  ;;  %v316_v23 = vld [vmem:[%s3128_s19 + $0xa0] sm:$0xff]  ;;  %v317_v24 = vld [vmem:[%s3128_s19 + $0xa8] sm:$0xff] }
  0x1e   : > { %283 = vst [vmem:[#allocation2 + $0xba] sm:$0x3] %v3077_v0  ;;  %284 = vst [vmem:[#allocation2 + $0xd2] sm:$0x3] %v3077_v0  ;;  %v318_v25 = vld [vmem:[%s3128_s19 + $0xb0] sm:$0xff]  ;;  %v319_v26 = vld [vmem:[%s3128_s19 + $0xb8] sm:$0xff] }
  0x1f   : > { %285 = vst [vmem:[#allocation2 + $0xea] sm:$0x3] %v3077_v0  ;;  %286 = vst [vmem:[#allocation2 + $0x102] sm:$0x3] %v3077_v0  ;;  %v320_v27 = vld [vmem:[%s3128_s19 + $0xc0] sm:$0xff]  ;;  %v321_v28 = vld [vmem:[%s3128_s19 + $0xc8] sm:$0xff] }
  0x20   : > { %287 = vst [vmem:[#allocation2 + $0x11a] sm:$0x3] %v3077_v0  ;;  %288 = vst [vmem:[#allocation2 + $0x132] sm:$0x3] %v3077_v0  ;;  %v322_v29 = vld [vmem:[%s3128_s19 + $0xd0] sm:$0xff]  ;;  %v323_v30 = vld [vmem:[%s3128_s19 + $0xd8] sm:$0xff] }
  0x21   : > { %289 = vst [vmem:[#allocation2 + $0x14a] sm:$0x3] %v3077_v0  ;;  %290 = vst [vmem:[#allocation2 + $0x162] sm:$0x3] %v3077_v0  ;;  %v324_v31 = vld [vmem:[%s3128_s19 + $0xe0] sm:$0xff]  ;;  %v325_v33 = vld [vmem:[%s3128_s19 + $0xe8] sm:$0xff] }
  0x22   : > { %291 = vst [vmem:[#allocation2 + $0x17a] sm:$0x3] %v3077_v0  ;;  %292 = vst [vmem:[#allocation2 + $0x192] sm:$0x3] %v3077_v0  ;;  %v326_v34 = vld [vmem:[%s3128_s19 + $0xf0] sm:$0xff]  ;;  %v327_v35 = vld [vmem:[%s3128_s19 + $0xf8] sm:$0xff] }
  0x23   : > { %293 = vst [vmem:[#allocation2 + $0x1aa] sm:$0x3] %v3077_v0  ;;  %256 = vst [vmem:[#allocation2] sm:$0x3] %v3077_v0 }
  0x24   : > { %257 = vst [vmem:[#allocation2 + $0x18] sm:$0x3] %v3077_v0  ;;  %274 = vst [vmem:[#allocation2 + $0x1b0] sm:$0x3] %v3077_v0 }
  0x25   : > { %275 = vst [vmem:[#allocation2 + $0x1c8] sm:$0x3] %v3077_v0  ;;  %276 = vst [vmem:[#allocation2 + $0x12] sm:$0x3] %v3077_v0 }
  0x26   : > { %277 = vst [vmem:[#allocation2 + $0x2a] sm:$0x3] %v3077_v0  ;;  %294 = vst [vmem:[#allocation2 + $0x1c2] sm:$0x3] %v3077_v0 }
  0x27   : > { %295 = vst [vmem:[#allocation2 + $0x1da] sm:$0x3] %v3077_v0  ;;  %329 = vst [vmem:[#allocation2 + $0x32] sm:$0xff] %v296_v1 }
  0x28   : > { %330 = vst [vmem:[#allocation2 + $0x3a] sm:$0xff] %v297_v2  ;;  %331 = vst [vmem:[#allocation2 + $0x4a] sm:$0xff] %v298_v3 }
  0x29   : > { %332 = vst [vmem:[#allocation2 + $0x52] sm:$0xff] %v299_v4  ;;  %333 = vst [vmem:[#allocation2 + $0x62] sm:$0xff] %v300_v5 }
  0x2a   : > { %334 = vst [vmem:[#allocation2 + $0x6a] sm:$0xff] %v301_v6  ;;  %335 = vst [vmem:[#allocation2 + $0x7a] sm:$0xff] %v302_v7  ;;  %v2028_v15 = vld [vmem:[#allocation2] sm:$0xff] }
  0x2b   : > { %336 = vst [vmem:[#allocation2 + $0x82] sm:$0xff] %v303_v8  ;;  %337 = vst [vmem:[#allocation2 + $0x92] sm:$0xff] %v304_v9  ;;  %v2031_v16 = vld [vmem:[#allocation2 + $0x18] sm:$0xff] }
  0x2c   : > { %338 = vst [vmem:[#allocation2 + $0x9a] sm:$0xff] %v305_v10  ;;  %339 = vst [vmem:[#allocation2 + $0xaa] sm:$0xff] %v306_v11  ;;  %v3159_v32 = vmax.f32 %v2028_v15, %v2031_v16  ;;  %v363_v46 = vld [vmem:[#allocation2 + $0x10] sm:$0xf] }
  0x2d   : > { %340 = vst [vmem:[#allocation2 + $0xb2] sm:$0xff] %v307_v12  ;;  %341 = vst [vmem:[#allocation2 + $0xc2] sm:$0xff] %v308_v13  ;;  %v412_v47 = vld [vmem:[#allocation2 + $0x28] sm:$0xf] }
  0x2e   : > { %342 = vst [vmem:[#allocation2 + $0xca] sm:$0xff] %v309_v14  ;;  %343 = vst [vmem:[#allocation2 + $0xda] sm:$0xff] %v310_v17  ;;  %v506_v36 = vld [vmem:[#allocation2 + $0x30] sm:$0xff]  ;;  %v460_v51 = vmax.f32 %v363_v46, %v412_v47  ;;  %v366_v58 = vld [vmem:[#allocation2 + $0x28] sm:$0xf] }
  0x2f   : > { %344 = vst [vmem:[#allocation2 + $0xe2] sm:$0xff] %v311_v18  ;;  %345 = vst [vmem:[#allocation2 + $0xf2] sm:$0xff] %v312_v19  ;;  %v555_v37 = vld [vmem:[#allocation2 + $0x48] sm:$0xff]  ;;  %v507_v40 = vld [vmem:[#allocation2 + $0x38] sm:$0xff]  ;;  %v461_v43 = vmax.f32 %v2031_v16, %v506_v36 }
  0x30   : > { %346 = vst [vmem:[#allocation2 + $0xfa] sm:$0xff] %v313_v20  ;;  %347 = vst [vmem:[#allocation2 + $0x10a] sm:$0xff] %v314_v21  ;;  %v700_v38 = vld [vmem:[#allocation2 + $0x60] sm:$0xff]  ;;  %v603_v39 = vmax.f32 %v506_v36, %v555_v37  ;;  %v556_v41 = vld [vmem:[#allocation2 + $0x50] sm:$0xff] }
  0x31   : > { %348 = vst [vmem:[#allocation2 + $0x112] sm:$0xff] %v315_v22  ;;  %349 = vst [vmem:[#allocation2 + $0x122] sm:$0xff] %v316_v23  ;;  %v701_v42 = vld [vmem:[#allocation2 + $0x68] sm:$0xff]  ;;  %v3164_v44 = vmax.f32 %v555_v37, %v700_v38  ;;  %v604_v45 = vmax.f32 %v507_v40, %v556_v41  ;;  %v508_v48 = vld [vmem:[#allocation2 + $0x40] sm:$0xf] }
  0x32   : > { %350 = vst [vmem:[#allocation2 + $0x12a] sm:$0xff] %v317_v24  ;;  %351 = vst [vmem:[#allocation2 + $0x13a] sm:$0xff] %v318_v25  ;;  %v3166_v49 = vmax.f32 %v556_v41, %v701_v42  ;;  %v651_v50 = vmax.f32 %v3159_v32, %v603_v39  ;;  %v557_v52 = vld [vmem:[#allocation2 + $0x58] sm:$0xf]  ;;  %v704_v57 = vld [vmem:[#allocation2 + $0x80] sm:$0xff] }
  0x33   : > { %352 = vst [vmem:[#allocation2 + $0x142] sm:$0xff] %v319_v26  ;;  %353 = vst [vmem:[#allocation2 + $0x152] sm:$0xff] %v320_v27  ;;  %v654_v53 = vmax.f32 %v461_v43, %v3164_v44  ;;  %v703_v54 = vld [vmem:[#allocation2 + $0x78] sm:$0xff]  ;;  %v605_v55 = vmax.f32 %v508_v48, %v557_v52  ;;  %v415_v59 = vld [vmem:[#allocation2 + $0x40] sm:$0xf]  ;;  %v3177_v3 = vmax.f32 %v701_v42, %v704_v57 }
  0x34   : > { %354 = vst [vmem:[#allocation2 + $0x15a] sm:$0xff] %v321_v28  ;;  %355 = vst [vmem:[#allocation2 + $0x16a] sm:$0xff] %v322_v29  ;;  %v655_v56 = vmax.f32 %v507_v40, %v3166_v49  ;;  %v3171_v60 = vmax.f32 %v700_v38, %v703_v54  ;;  %v3173_v61 = vmax.f32 %v651_v50, %v700_v38  ;;  %v702_v62 = vld [vmem:[#allocation2 + $0x70] sm:$0xf]  ;;  %v511_v1 = vld [vmem:[#allocation2 + $0x58] sm:$0xf] }
  0x35   : > { %356 = vst [vmem:[#allocation2 + $0x172] sm:$0xff] %v323_v30  ;;  %357 = vst [vmem:[#allocation2 + $0x182] sm:$0xff] %v324_v31  ;;  %v3175_v63 = vmax.f32 %v654_v53, %v703_v54  ;;  %v463_v0 = vmax.f32 %v366_v58, %v415_v59  ;;  %v560_v2 = vld [vmem:[#allocation2 + $0x70] sm:$0xf]  ;;  %v3179_v4 = vmax.f32 %v604_v45, %v701_v42  ;;  %v707_v9 = vld [vmem:[#allocation2 + $0x98] sm:$0xff] }
  0x36   : > { %358 = vst [vmem:[#allocation2 + $0x18a] sm:$0xff] %v325_v33  ;;  %359 = vst [vmem:[#allocation2 + $0x19a] sm:$0xff] %v326_v34  ;;  %v653_v5 = vmax.f32 %v460_v51, %v605_v55  ;;  %v3181_v6 = vmax.f32 %v655_v56, %v704_v57  ;;  %v608_v7 = vmax.f32 %v511_v1, %v560_v2  ;;  %v706_v8 = vld [vmem:[#allocation2 + $0x90] sm:$0xff]  ;;  %v369_v10 = vld [vmem:[#allocation2 + $0x40] sm:$0xf] }
  0x37   : > { %360 = vst [vmem:[#allocation2 + $0x1a2] sm:$0xff] %v327_v35  ;;  %796 = vst [vmem:[#allocation3] sm:$0xff] %v3173_v61  ;;  %v657_v11 = vmax.f32 %v603_v39, %v3171_v60  ;;  %v658_v12 = vmax.f32 %v604_v45, %v3177_v3  ;;  %v418_v13 = vld [vmem:[#allocation2 + $0x58] sm:$0xf]  ;;  %v514_v14 = vld [vmem:[#allocation2 + $0x70] sm:$0xf]  ;;  %v3187_v16 = vmax.f32 %v703_v54, %v706_v8 }
  0x38   : > { %799 = vst [vmem:[#allocation3 + $0x18] sm:$0xff] %v3175_v63  ;;  %v563_v15 = vld [vmem:[#allocation2 + $0x88] sm:$0xf]  ;;  %v3189_v17 = vmax.f32 %v704_v57, %v707_v9  ;;  %797 = vst [vmem:[#allocation3 + $0x8] sm:$0xff] %v3179_v4  ;;  %v750_v18 = vmax.f32 %v653_v5, %v702_v62  ;;  %v656_v19 = vmax.f32 %v463_v0, %v608_v7  ;;  %v710_v24 = vld [vmem:[#allocation2 + $0xb0] sm:$0xff] }
  0x39   : > { %800 = vst [vmem:[#allocation3 + $0x20] sm:$0xff] %v3181_v6  ;;  %v705_v20 = vld [vmem:[#allocation2 + $0x88] sm:$0xf]  ;;  %v466_v21 = vmax.f32 %v369_v10, %v418_v13  ;;  %v611_v22 = vmax.f32 %v514_v14, %v563_v15  ;;  %v3193_v25 = vmax.f32 %v657_v11, %v706_v8  ;;  %v3195_v26 = vmax.f32 %v658_v12, %v707_v9  ;;  %v372_v29 = vld [vmem:[#allocation2 + $0x58] sm:$0xf]  ;;  %v712_v39 = vld [vmem:[#allocation2 + $0xc0] sm:$0xff] }
  0x3a   : > { %v709_v23 = vld [vmem:[#allocation2 + $0xa8] sm:$0xff]  ;;  %v660_v27 = vmax.f32 %v3164_v44, %v3187_v16  ;;  %v661_v28 = vmax.f32 %v3166_v49, %v3189_v17  ;;  %v421_v30 = vld [vmem:[#allocation2 + $0x70] sm:$0xf]  ;;  %798 = vst [vmem:[#allocation3 + $0x10] sm:$0xf] %v750_v18  ;;  %v753_v33 = vmax.f32 %v656_v19, %v705_v20  ;;  %v3209_v43 = vmax.f32 %v707_v9, %v710_v24  ;;  %v715_v57 = vld [vmem:[#allocation2 + $0xd8] sm:$0xff] }
  0x3b   : > { %v517_v31 = vld [vmem:[#allocation2 + $0x88] sm:$0xf]  ;;  %v659_v34 = vmax.f32 %v466_v21, %v611_v22  ;;  %v708_v35 = vld [vmem:[#allocation2 + $0xa0] sm:$0xf]  ;;  %v469_v36 = vmax.f32 %v372_v29, %v421_v30  ;;  %v3201_v38 = vmax.f32 %v706_v8, %v709_v23  ;;  %802 = vst [vmem:[#allocation3 + $0x30] sm:$0xff] %v3193_v25  ;;  %803 = vst [vmem:[#allocation3 + $0x38] sm:$0xff] %v3195_v26 }
  0x3c   : > { %v566_v37 = vld [vmem:[#allocation2 + $0xa0] sm:$0xf]  ;;  %v3205_v40 = vmax.f32 %v660_v27, %v709_v23  ;;  %v3207_v41 = vmax.f32 %v661_v28, %v710_v24  ;;  %v713_v44 = vld [vmem:[#allocation2 + $0xc8] sm:$0xff]  ;;  %v375_v45 = vld [vmem:[#allocation2 + $0x70] sm:$0xf]  ;;  %v3213_v53 = vmax.f32 %v709_v23, %v712_v39  ;;  %v664_v55 = vmax.f32 %v3177_v3, %v3209_v43 }
  0x3d   : > { %v614_v42 = vmax.f32 %v517_v31, %v566_v37  ;;  %v424_v46 = vld [vmem:[#allocation2 + $0x88] sm:$0xf]  ;;  %801 = vst [vmem:[#allocation3 + $0x28] sm:$0xf] %v753_v33  ;;  %v756_v47 = vmax.f32 %v659_v34, %v708_v35  ;;  %v711_v48 = vld [vmem:[#allocation2 + $0xb8] sm:$0xf]  ;;  %v663_v49 = vmax.f32 %v3171_v60, %v3201_v38  ;;  %v3219_v58 = vmax.f32 %v710_v24, %v713_v44 }
  0x3e   : > { %v472_v50 = vmax.f32 %v375_v45, %v424_v46  ;;  %v520_v51 = vld [vmem:[#allocation2 + $0xa0] sm:$0xf]  ;;  %v569_v52 = vld [vmem:[#allocation2 + $0xb8] sm:$0xf]  ;;  %805 = vst [vmem:[#allocation3 + $0x48] sm:$0xff] %v3205_v40  ;;  %806 = vst [vmem:[#allocation3 + $0x50] sm:$0xff] %v3207_v41  ;;  %v666_v0 = vmax.f32 %v3187_v16, %v3213_v53  ;;  %v3225_v7 = vmax.f32 %v712_v39, %v715_v57 }
  0x3f   : > { %v662_v54 = vmax.f32 %v469_v36, %v614_v42  ;;  %v617_v56 = vmax.f32 %v520_v51, %v569_v52  ;;  %v716_v59 = vld [vmem:[#allocation2 + $0xe0] sm:$0xff]  ;;  %v378_v62 = vld [vmem:[#allocation2 + $0x88] sm:$0xf]  ;;  %804 = vst [vmem:[#allocation3 + $0x40] sm:$0xf] %v756_v47  ;;  %v3221_v60 = vmax.f32 %v663_v49, %v712_v39  ;;  %v3229_v9 = vmax.f32 %v664_v55, %v713_v44  ;;  %v718_v13 = vld [vmem:[#allocation2 + $0xf0] sm:$0xff] }
  0x40   : > { %v427_v1 = vld [vmem:[#allocation2 + $0xa0] sm:$0xf]  ;;  %v523_v2 = vld [vmem:[#allocation2 + $0xb8] sm:$0xf]  ;;  %v572_v5 = vld [vmem:[#allocation2 + $0xd0] sm:$0xf]  ;;  %v3227_v8 = vmax.f32 %v713_v44, %v716_v59  ;;  %v667_v12 = vmax.f32 %v3189_v17, %v3219_v58  ;;  %v3234_v15 = vmax.f32 %v666_v0, %v715_v57  ;;  %v669_v19 = vmax.f32 %v3201_v38, %v3225_v7 }
  0x41   : > { %v759_v3 = vmax.f32 %v662_v54, %v711_v48  ;;  %v665_v10 = vmax.f32 %v472_v50, %v617_v56  ;;  %v714_v11 = vld [vmem:[#allocation2 + $0xd0] sm:$0xf]  ;;  %v719_v14 = vld [vmem:[#allocation2 + $0xf8] sm:$0xff]  ;;  %808 = vst [vmem:[#allocation3 + $0x60] sm:$0xff] %v3221_v60  ;;  %v475_v16 = vmax.f32 %v378_v62, %v427_v1  ;;  %v620_v18 = vmax.f32 %v523_v2, %v572_v5  ;;  %v381_v20 = vld [vmem:[#allocation2 + $0xa0] sm:$0xf] }
  0x42   : > { %v430_v21 = vld [vmem:[#allocation2 + $0xb8] sm:$0xf]  ;;  %v526_v22 = vld [vmem:[#allocation2 + $0xd0] sm:$0xf]  ;;  %809 = vst [vmem:[#allocation3 + $0x68] sm:$0xff] %v3229_v9  ;;  %v3239_v24 = vmax.f32 %v667_v12, %v716_v59  ;;  %v670_v27 = vmax.f32 %v3209_v43, %v3227_v8  ;;  %v721_v30 = vld [vmem:[#allocation2 + $0x108] sm:$0xff]  ;;  %v3244_v33 = vmax.f32 %v669_v19, %v718_v13  ;;  %v3246_v35 = vmax.f32 %v715_v57, %v718_v13 }
  0x43   : > { %807 = vst [vmem:[#allocation3 + $0x58] sm:$0xf] %v759_v3  ;;  %v762_v23 = vmax.f32 %v665_v10, %v714_v11  ;;  %v717_v17 = vld [vmem:[#allocation2 + $0xe8] sm:$0xf]  ;;  %v478_v28 = vmax.f32 %v381_v20, %v430_v21  ;;  %811 = vst [vmem:[#allocation3 + $0x78] sm:$0xff] %v3234_v15  ;;  %v668_v31 = vmax.f32 %v475_v16, %v620_v18  ;;  %v722_v36 = vld [vmem:[#allocation2 + $0x110] sm:$0xff] }
  0x44   : > { %v575_v29 = vld [vmem:[#allocation2 + $0xe8] sm:$0xf]  ;;  %v384_v37 = vld [vmem:[#allocation2 + $0xb8] sm:$0xf]  ;;  %v433_v38 = vld [vmem:[#allocation2 + $0xd0] sm:$0xf]  ;;  %v3249_v39 = vmax.f32 %v670_v27, %v719_v14  ;;  %v3251_v43 = vmax.f32 %v716_v59, %v719_v14  ;;  %v3253_v47 = vmax.f32 %v718_v13, %v721_v30  ;;  %v672_v50 = vmax.f32 %v3213_v53, %v3246_v35 }
  0x45   : > { %v623_v34 = vmax.f32 %v526_v22, %v575_v29  ;;  %810 = vst [vmem:[#allocation3 + $0x70] sm:$0xf] %v762_v23  ;;  %812 = vst [vmem:[#allocation3 + $0x80] sm:$0xff] %v3239_v24  ;;  %v720_v42 = vld [vmem:[#allocation2 + $0x100] sm:$0xf]  ;;  %v481_v44 = vmax.f32 %v384_v37, %v433_v38  ;;  %v765_v48 = vmax.f32 %v668_v31, %v717_v17  ;;  %v725_v54 = vld [vmem:[#allocation2 + $0x128] sm:$0xff] }
  0x46   : > { %v529_v45 = vld [vmem:[#allocation2 + $0xe8] sm:$0xf]  ;;  %v578_v46 = vld [vmem:[#allocation2 + $0x100] sm:$0xf]  ;;  %814 = vst [vmem:[#allocation3 + $0x90] sm:$0xff] %v3244_v33  ;;  %815 = vst [vmem:[#allocation3 + $0x98] sm:$0xff] %v3249_v39  ;;  %v673_v56 = vmax.f32 %v3219_v58, %v3251_v43  ;;  %v675_v57 = vmax.f32 %v3225_v7, %v3253_v47  ;;  %v3263_v59 = vmax.f32 %v719_v14, %v722_v36 }
  0x47   : > { %v671_v49 = vmax.f32 %v478_v28, %v623_v34  ;;  %v626_v51 = vmax.f32 %v529_v45, %v578_v46  ;;  %v724_v52 = vld [vmem:[#allocation2 + $0x120] sm:$0xff]  ;;  %v387_v55 = vld [vmem:[#allocation2 + $0xd0] sm:$0xf]  ;;  %v436_v62 = vld [vmem:[#allocation2 + $0xe8] sm:$0xf]  ;;  %v3267_v5 = vmax.f32 %v672_v50, %v721_v30  ;;  %v3278_v17 = vmax.f32 %v722_v36, %v725_v54 }
  0x48   : > { %v532_v0 = vld [vmem:[#allocation2 + $0x100] sm:$0xf]  ;;  %v581_v1 = vld [vmem:[#allocation2 + $0x118] sm:$0xf]  ;;  %v3265_v2 = vmax.f32 %v721_v30, %v724_v52  ;;  %813 = vst [vmem:[#allocation3 + $0x88] sm:$0xf] %v765_v48  ;;  %v484_v11 = vmax.f32 %v387_v55, %v436_v62  ;;  %v3269_v58 = vmax.f32 %v673_v56, %v722_v36  ;;  %v3271_v16 = vmax.f32 %v675_v57, %v724_v52 }
  0x49   : > { %v768_v53 = vmax.f32 %v671_v49, %v720_v42  ;;  %v674_v3 = vmax.f32 %v481_v44, %v626_v51  ;;  %v723_v10 = vld [vmem:[#allocation2 + $0x118] sm:$0xf]  ;;  %v728_v13 = vld [vmem:[#allocation2 + $0x140] sm:$0xff]  ;;  %v676_v7 = vmax.f32 %v3227_v8, %v3263_v59  ;;  %v629_v14 = vmax.f32 %v532_v0, %v581_v1  ;;  %v390_v18 = vld [vmem:[#allocation2 + $0xe8] sm:$0xf]  ;;  %817 = vst [vmem:[#allocation3 + $0xa8] sm:$0xff] %v3267_v5 }
  0x4a   : > { %v727_v12 = vld [vmem:[#allocation2 + $0x138] sm:$0xff]  ;;  %v439_v19 = vld [vmem:[#allocation2 + $0x100] sm:$0xf]  ;;  %v726_v22 = vld [vmem:[#allocation2 + $0x130] sm:$0xf]  ;;  %v678_v23 = vmax.f32 %v3246_v35, %v3265_v2  ;;  %818 = vst [vmem:[#allocation3 + $0xb0] sm:$0xff] %v3269_v58  ;;  %v679_v36 = vmax.f32 %v3251_v43, %v3278_v17  ;;  %v3290_v45 = vmax.f32 %v725_v54, %v728_v13 }
  0x4b   : > { %v535_v20 = vld [vmem:[#allocation2 + $0x118] sm:$0xf]  ;;  %816 = vst [vmem:[#allocation3 + $0xa0] sm:$0xf] %v768_v53  ;;  %v771_v21 = vmax.f32 %v674_v3, %v723_v10  ;;  %v487_v27 = vmax.f32 %v390_v18, %v439_v19  ;;  %v584_v28 = vld [vmem:[#allocation2 + $0x130] sm:$0xf]  ;;  %v3282_v8 = vmax.f32 %v676_v7, %v725_v54  ;;  %v677_v30 = vmax.f32 %v484_v11, %v629_v14 }
  0x4c   : > { %v730_v29 = vld [vmem:[#allocation2 + $0x150] sm:$0xff]  ;;  %820 = vst [vmem:[#allocation3 + $0xc0] sm:$0xff] %v3271_v16  ;;  %v632_v31 = vmax.f32 %v535_v20, %v584_v28  ;;  %v3284_v34 = vmax.f32 %v724_v52, %v727_v12  ;;  %v731_v37 = vld [vmem:[#allocation2 + $0x158] sm:$0xff]  ;;  %v393_v38 = vld [vmem:[#allocation2 + $0x100] sm:$0xf]  ;;  %v3286_v35 = vmax.f32 %v678_v23, %v727_v12  ;;  %v3296_v43 = vmax.f32 %v679_v36, %v728_v13 }
  0x4d   : > { %v442_v42 = vld [vmem:[#allocation2 + $0x118] sm:$0xf]  ;;  %819 = vst [vmem:[#allocation3 + $0xb8] sm:$0xf] %v771_v21  ;;  %v729_v44 = vld [vmem:[#allocation2 + $0x148] sm:$0xf]  ;;  %v774_v50 = vmax.f32 %v677_v30, %v726_v22  ;;  %v682_v54 = vmax.f32 %v3263_v59, %v3290_v45  ;;  %v3300_v0 = vmax.f32 %v727_v12, %v730_v29  ;;  %v3302_v1 = vmax.f32 %v728_v13, %v731_v37 }
  0x4e   : > { %v490_v46 = vmax.f32 %v393_v38, %v442_v42  ;;  %v538_v48 = vld [vmem:[#allocation2 + $0x130] sm:$0xf]  ;;  %v587_v49 = vld [vmem:[#allocation2 + $0x148] sm:$0xf]  ;;  %821 = vst [vmem:[#allocation3 + $0xc8] sm:$0xff] %v3282_v8  ;;  %v680_v51 = vmax.f32 %v487_v27, %v632_v31  ;;  %v681_v52 = vmax.f32 %v3253_v47, %v3284_v34  ;;  %823 = vst [vmem:[#allocation3 + $0xd8] sm:$0xff] %v3286_v35 }
  0x4f   : > { %v635_v55 = vmax.f32 %v538_v48, %v587_v49  ;;  %v733_v56 = vld [vmem:[#allocation2 + $0x168] sm:$0xff]  ;;  %v734_v57 = vld [vmem:[#allocation2 + $0x170] sm:$0xff]  ;;  %v396_v62 = vld [vmem:[#allocation2 + $0x118] sm:$0xf]  ;;  %822 = vst [vmem:[#allocation3 + $0xd0] sm:$0xf] %v774_v50  ;;  %v3311_v59 = vmax.f32 %v682_v54, %v731_v37  ;;  %v684_v12 = vmax.f32 %v3265_v2, %v3300_v0  ;;  %v685_v13 = vmax.f32 %v3278_v17, %v3302_v1 }
  0x50   : > { %v445_v53 = vld [vmem:[#allocation2 + $0x130] sm:$0xf]  ;;  %v541_v3 = vld [vmem:[#allocation2 + $0x148] sm:$0xf]  ;;  %v590_v10 = vld [vmem:[#allocation2 + $0x160] sm:$0xf]  ;;  %v777_v47 = vmax.f32 %v680_v51, %v729_v44  ;;  %v3304_v11 = vmax.f32 %v681_v52, %v730_v29  ;;  %v639_v31 = vmax.f32 %v730_v29, %v733_v56  ;;  %v640_v38 = vmax.f32 %v731_v37, %v734_v57 }
  0x51   : > { %v683_v7 = vmax.f32 %v490_v46, %v635_v55  ;;  %v732_v14 = vld [vmem:[#allocation2 + $0x160] sm:$0xf]  ;;  %v493_v18 = vmax.f32 %v396_v62, %v445_v53  ;;  %v3308_v20 = vld [vmem:[#allocation2 + $0x188] sm:$0xff]  ;;  %824 = vst [vmem:[#allocation3 + $0xe0] sm:$0xff] %v3296_v43  ;;  %v638_v21 = vmax.f32 %v541_v3, %v590_v10  ;;  %v399_v22 = vld [vmem:[#allocation2 + $0x130] sm:$0xf]  ;;  %v3319_v44 = vmax.f32 %v684_v12, %v733_v56 }
  0x52   : > { %v3306_v19 = vld [vmem:[#allocation2 + $0x180] sm:$0xff]  ;;  %v448_v23 = vld [vmem:[#allocation2 + $0x148] sm:$0xf]  ;;  %825 = vst [vmem:[#allocation3 + $0xe8] sm:$0xf] %v777_v47  ;;  %826 = vst [vmem:[#allocation3 + $0xf0] sm:$0xff] %v3304_v11  ;;  %v3321_v2 = vmax.f32 %v685_v13, %v734_v57  ;;  %v687_v51 = vmax.f32 %v3284_v34, %v639_v31  ;;  %v688_v29 = vmax.f32 %v3290_v45, %v640_v38 }
  0x53   : > { %v544_v27 = vld [vmem:[#allocation2 + $0x160] sm:$0xf]  ;;  %v780_v28 = vmax.f32 %v683_v7, %v732_v14  ;;  %v735_v30 = vld [vmem:[#allocation2 + $0x178] sm:$0xf]  ;;  %v496_v42 = vmax.f32 %v399_v22, %v448_v23  ;;  %827 = vst [vmem:[#allocation3 + $0xf8] sm:$0xff] %v3311_v59  ;;  %v686_v17 = vmax.f32 %v493_v18, %v638_v21  ;;  %v642_v37 = vmax.f32 %v733_v56, %v3306_v19  ;;  %v600_v21 = vld [vmem:[#allocation2 + $0x1b0] sm:$0xff] }
  0x54   : > { %v593_v36 = vld [vmem:[#allocation2 + $0x178] sm:$0xf]  ;;  %v402_v49 = vld [vmem:[#allocation2 + $0x148] sm:$0xf]  ;;  %v451_v50 = vld [vmem:[#allocation2 + $0x160] sm:$0xf]  ;;  %v643_v52 = vmax.f32 %v734_v57, %v3308_v20  ;;  %v3332_v45 = vmax.f32 %v687_v51, %v3306_v19  ;;  %v3335_v56 = vmax.f32 %v688_v29, %v3308_v20 }
  0x55   : > { %v641_v46 = vmax.f32 %v544_v27, %v593_v36  ;;  %v3323_v48 = vld [vmem:[#allocation2 + $0x198] sm:$0xff]  ;;  %828 = vst [vmem:[#allocation3 + $0x100] sm:$0xf] %v780_v28  ;;  %v740_v55 = vld [vmem:[#allocation2 + $0x1a0] sm:$0xff]  ;;  %v596_v54 = vld [vmem:[#allocation2 + $0x190] sm:$0xf]  ;;  %v783_v53 = vmax.f32 %v686_v17, %v735_v30  ;;  %v499_v10 = vmax.f32 %v402_v49, %v451_v50  ;;  %v690_v18 = vmax.f32 %v3300_v0, %v642_v37 }
  0x56   : > { %v547_v62 = vld [vmem:[#allocation2 + $0x178] sm:$0xf]  ;;  %829 = vst [vmem:[#allocation3 + $0x108] sm:$0xff] %v3319_v44  ;;  %830 = vst [vmem:[#allocation3 + $0x110] sm:$0xff] %v3321_v2  ;;  %v405_v7 = vld [vmem:[#allocation2 + $0x160] sm:$0xf]  ;;  %v691_v12 = vmax.f32 %v3302_v1, %v643_v52  ;;  %v645_v27 = vmax.f32 %v3306_v19, %v3323_v48  ;;  %v646_v28 = vmax.f32 %v3308_v20, %v740_v55 }
  0x57   : > { %v689_v3 = vmax.f32 %v496_v42, %v641_v46  ;;  %v644_v47 = vmax.f32 %v547_v62, %v596_v54  ;;  %v454_v14 = vld [vmem:[#allocation2 + $0x178] sm:$0xf]  ;;  %v550_v34 = vld [vmem:[#allocation2 + $0x190] sm:$0xf]  ;;  %v599_v13 = vld [vmem:[#allocation2 + $0x1a8] sm:$0xf]  ;;  %v3345_v0 = vmax.f32 %v690_v18, %v3323_v48  ;;  %v648_v54 = vmax.f32 %v3323_v48, %v600_v21 }
  0x58   : > { %v738_v57 = vld [vmem:[#allocation2 + $0x190] sm:$0xf]  ;;  %831 = vst [vmem:[#allocation3 + $0x118] sm:$0xf] %v783_v53  ;;  %v408_v30 = vld [vmem:[#allocation2 + $0x178] sm:$0xf]  ;;  %v3347_v1 = vmax.f32 %v691_v12, %v740_v55  ;;  %v502_v46 = vmax.f32 %v405_v7, %v454_v14  ;;  %v647_v49 = vmax.f32 %v550_v34, %v599_v13  ;;  %v693_v20 = vmax.f32 %v639_v31, %v645_v27 }
  0x59   : > { %v786_v22 = vmax.f32 %v689_v3, %v738_v57  ;;  %v692_v23 = vmax.f32 %v499_v10, %v644_v47  ;;  %v457_v42 = vld [vmem:[#allocation2 + $0x190] sm:$0xf]  ;;  %832 = vst [vmem:[#allocation3 + $0x120] sm:$0xff] %v3332_v45  ;;  %833 = vst [vmem:[#allocation3 + $0x128] sm:$0xff] %v3335_v56  ;;  %v741_v17 = vld [vmem:[#allocation2 + $0x1a8] sm:$0xf]  ;;  %v3349_v29 = vmax.f32 %v640_v38, %v646_v28 }
  0x5a   : > { %v2265_v36 = vld [vmem:[#allocation2 + $0x1b0] sm:$0xff]  ;;  %v553_v50 = vld [vmem:[#allocation2 + $0x1a8] sm:$0xf]  ;;  %v602_v51 = vld [vmem:[#allocation2 + $0x1c0] sm:$0xf]  ;;  %835 = vst [vmem:[#allocation3 + $0x138] sm:$0xff] %v3345_v0  ;;  %v695_v47 = vmax.f32 %v502_v46, %v647_v49  ;;  %v505_v14 = vmax.f32 %v408_v30, %v457_v42  ;;  %v696_v38 = vmax.f32 %v642_v37, %v648_v54 }
  0x5b   : > { %834 = vst [vmem:[#allocation3 + $0x130] sm:$0xf] %v786_v22  ;;  %v789_v19 = vmax.f32 %v692_v23, %v741_v17  ;;  %v744_v62 = vld [vmem:[#allocation2 + $0x1c0] sm:$0xf]  ;;  %836 = vst [vmem:[#allocation3 + $0x140] sm:$0xff] %v3347_v1  ;;  %v745_v7 = vld [vmem:[#allocation2 + $0x1c8] sm:$0xff]  ;;  %v650_v34 = vmax.f32 %v553_v50, %v602_v51  ;;  %v3354_v31 = vmax.f32 %v693_v20, %v2265_v36 }
  0x5c   : > { %v876_v53 = vld [vmem:[#allocation3 + $0x1] sm:$0xff]  ;;  %v877_v57 = vld [vmem:[#allocation3 + $0x9] sm:$0xff]  ;;  %v747_v12 = vld [vmem:[#allocation2 + $0x1d8] sm:$0xf]  ;;  %v792_v22 = vmax.f32 %v695_v47, %v744_v62  ;;  %v3357_v23 = vmax.f32 %v643_v52, %v740_v55  ;;  %839 = vst [vmem:[#allocation3 + $0x158] sm:$0xff] %v3349_v29  ;;  %v3361_v30 = vmax.f32 %v696_v38, %v745_v7 }
  0x5d   : > { %v940_v3 = vld [vmem:[#allocation3 + $0x2] sm:$0xff]  ;;  %v941_v18 = vld [vmem:[#allocation3 + $0xa] sm:$0xff]  ;;  %837 = vst [vmem:[#allocation3 + $0x148] sm:$0xf] %v789_v19  ;;  %v908_v48 = vmax.f32 %v3173_v61, %v876_v53  ;;  %v878_v21 = vld [vmem:[#allocation3 + $0x19] sm:$0xff]  ;;  %v698_v27 = vmax.f32 %v505_v14, %v650_v34  ;;  %v909_v42 = vmax.f32 %v3179_v4, %v877_v57 }
  0x5e   : > { %v972_v10 = vld [vmem:[#allocation3 + $0x3] sm:$0xff]  ;;  %v973_v13 = vld [vmem:[#allocation3 + $0xb] sm:$0xff]  ;;  %v942_v17 = vld [vmem:[#allocation3 + $0x1a] sm:$0xff]  ;;  %838 = vst [vmem:[#allocation3 + $0x150] sm:$0xff] %v3354_v31  ;;  %v910_v36 = vmax.f32 %v3175_v63, %v878_v21 }
  0x5f   : > { %v1004_v28 = vmax.f32 %v940_v3, %v972_v10  ;;  %v974_v46 = vld [vmem:[#allocation3 + $0x1b] sm:$0xff]  ;;  %v1068_v37 = vld [vmem:[#allocation3 + $0x4] sm:$0xff]  ;;  %v1005_v61 = vmax.f32 %v941_v18, %v973_v13  ;;  %840 = vst [vmem:[#allocation3 + $0x160] sm:$0xf] %v792_v22  ;;  %v795_v50 = vmax.f32 %v698_v27, %v747_v12  ;;  %v1069_v19 = vld [vmem:[#allocation3 + $0xc] sm:$0xff] }
  0x60   : > { %v879_v49 = vld [vmem:[#allocation3 + $0x21] sm:$0xff]  ;;  %v1006_v20 = vmax.f32 %v942_v17, %v974_v46  ;;  %v880_v62 = vld [vmem:[#allocation3 + $0x31] sm:$0xff]  ;;  %841 = vst [vmem:[#allocation3 + $0x168] sm:$0xff] %v3361_v30  ;;  %v881_v7 = vld [vmem:[#allocation3 + $0x39] sm:$0xff] }
  0x61   : > { %v943_v52 = vld [vmem:[#allocation3 + $0x22] sm:$0xff]  ;;  %v1036_v51 = vmax.f32 %v908_v48, %v1004_v28  ;;  %v944_v54 = vld [vmem:[#allocation3 + $0x32] sm:$0xff]  ;;  %v1037_v4 = vmax.f32 %v909_v42, %v1005_v61  ;;  %v911_v63 = vmax.f32 %v3181_v6, %v879_v49  ;;  %v912_v10 = vmax.f32 %v3193_v25, %v880_v62  ;;  %842 = vst [vmem:[#allocation3 + $0x170] sm:$0xff] %v3357_v23  ;;  %v945_v12 = vld [vmem:[#allocation3 + $0x3a] sm:$0xff] }
  0x62   : > { %v975_v55 = vld [vmem:[#allocation3 + $0x23] sm:$0xff]  ;;  %v976_v47 = vld [vmem:[#allocation3 + $0x33] sm:$0xff]  ;;  %843 = vst [vmem:[#allocation3 + $0x178] sm:$0xf] %v795_v50  ;;  %v1038_v34 = vmax.f32 %v910_v36, %v1006_v20  ;;  %v913_v38 = vmax.f32 %v3195_v26, %v881_v7  ;;  %v977_v48 = vld [vmem:[#allocation3 + $0x3b] sm:$0xff] }
  0x63   : > { %v1070_v53 = vld [vmem:[#allocation3 + $0x1c] sm:$0xff]  ;;  %v1007_v3 = vmax.f32 %v943_v52, %v975_v55  ;;  %v1100_v14 = vmax.f32 %v1036_v51, %v1068_v37  ;;  %v1071_v57 = vld [vmem:[#allocation3 + $0x24] sm:$0xff]  ;;  %v1008_v18 = vmax.f32 %v944_v54, %v976_v47  ;;  %v1101_v13 = vmax.f32 %v1037_v4, %v1069_v19  ;;  %v1072_v46 = vld [vmem:[#allocation3 + $0x34] sm:$0xff] }
  0x64   : > { %v1009_v21 = vmax.f32 %v945_v12, %v977_v48  ;;  %v882_v22 = vld [vmem:[#allocation3 + $0x49] sm:$0xff]  ;;  %v1102_v28 = vmax.f32 %v1038_v34, %v1070_v53  ;;  %v883_v61 = vld [vmem:[#allocation3 + $0x51] sm:$0xff]  ;;  %v1073_v52 = vld [vmem:[#allocation3 + $0x3c] sm:$0xff] }
  0x65   : > { %v1039_v6 = vmax.f32 %v911_v63, %v1007_v3  ;;  %v946_v25 = vld [vmem:[#allocation3 + $0x4a] sm:$0xff]  ;;  %1132 = vst [vmem:[%s3370_s22] sm:$0xff] %v1100_v14  ;;  %1164 = vst [vmem:[#allocation2 + $0x32] sm:$0xff] %v1100_v14  ;;  %v1040_v17 = vmax.f32 %v912_v10, %v1008_v18  ;;  %v914_v37 = vmax.f32 %v3205_v40, %v882_v22  ;;  %v947_v26 = vld [vmem:[#allocation3 + $0x52] sm:$0xff] }
  0x66   : > { %v978_v27 = vld [vmem:[#allocation3 + $0x4b] sm:$0xff]  ;;  %1133 = vst [vmem:[%s3370_s22 + $0x8] sm:$0xff] %v1101_v13  ;;  %1165 = vst [vmem:[#allocation2 + $0x3a] sm:$0xff] %v1101_v13  ;;  %v1041_v49 = vmax.f32 %v913_v38, %v1009_v21  ;;  %v915_v55 = vmax.f32 %v3207_v41, %v883_v61  ;;  %v979_v50 = vld [vmem:[#allocation3 + $0x53] sm:$0xff] }
  0x67   : > { %v1010_v42 = vmax.f32 %v946_v25, %v978_v27  ;;  %v1103_v36 = vmax.f32 %v1039_v6, %v1071_v57  ;;  %v884_v51 = vld [vmem:[#allocation3 + $0x61] sm:$0xff]  ;;  %1134 = vst [vmem:[%s3370_s22 + $0x10] sm:$0xff] %v1102_v28  ;;  %1166 = vst [vmem:[#allocation2 + $0x4a] sm:$0xff] %v1102_v28  ;;  %v1104_v19 = vmax.f32 %v1040_v17, %v1072_v46  ;;  %v1074_v62 = vld [vmem:[#allocation3 + $0x4c] sm:$0xff] }
  0x68   : > { %v1011_v40 = vmax.f32 %v947_v26, %v979_v50  ;;  %v916_v54 = vmax.f32 %v3221_v60, %v884_v51  ;;  %v948_v4 = vld [vmem:[#allocation3 + $0x62] sm:$0xff]  ;;  %v1105_v63 = vmax.f32 %v1041_v49, %v1073_v52  ;;  %v949_v41 = vld [vmem:[#allocation3 + $0x6a] sm:$0xff]  ;;  %v1075_v34 = vld [vmem:[#allocation3 + $0x54] sm:$0xff] }
  0x69   : > { %v1042_v20 = vmax.f32 %v914_v37, %v1010_v42  ;;  %v980_v53 = vld [vmem:[#allocation3 + $0x63] sm:$0xff]  ;;  %1135 = vst [vmem:[%s3370_s22 + $0x18] sm:$0xff] %v1103_v36  ;;  %1167 = vst [vmem:[#allocation2 + $0x52] sm:$0xff] %v1103_v36  ;;  %v981_v47 = vld [vmem:[#allocation3 + $0x6b] sm:$0xff] }
  0x6a   : > { %v1012_v3 = vmax.f32 %v948_v4, %v980_v53  ;;  %v885_v10 = vld [vmem:[#allocation3 + $0x69] sm:$0xff]  ;;  %1136 = vst [vmem:[%s3370_s22 + $0x20] sm:$0xff] %v1104_v19  ;;  %1168 = vst [vmem:[#allocation2 + $0x62] sm:$0xff] %v1104_v19  ;;  %v1043_v14 = vmax.f32 %v915_v55, %v1011_v40  ;;  %v1013_v18 = vmax.f32 %v949_v41, %v981_v47  ;;  %v886_v60 = vld [vmem:[#allocation3 + $0x79] sm:$0xff] }
  0x6b   : > { %v1106_v7 = vmax.f32 %v1042_v20, %v1074_v62  ;;  %v917_v57 = vmax.f32 %v3229_v9, %v885_v10  ;;  %v950_v38 = vld [vmem:[#allocation3 + $0x7a] sm:$0xff]  ;;  %1137 = vst [vmem:[%s3370_s22 + $0x28] sm:$0xff] %v1105_v63  ;;  %1169 = vst [vmem:[#allocation2 + $0x6a] sm:$0xff] %v1105_v63  ;;  %v1076_v48 = vld [vmem:[#allocation3 + $0x64] sm:$0xff]  ;;  %v918_v13 = vmax.f32 %v3234_v15, %v886_v60 }
  0x6c   : > { %v1044_v12 = vmax.f32 %v916_v54, %v1012_v3  ;;  %v982_v6 = vld [vmem:[#allocation3 + $0x7b] sm:$0xff]  ;;  %v1107_v22 = vmax.f32 %v1043_v14, %v1075_v34  ;;  %v1077_v27 = vld [vmem:[#allocation3 + $0x6c] sm:$0xff]  ;;  %v983_v46 = vld [vmem:[#allocation3 + $0x83] sm:$0xff] }
  0x6d   : > { %v887_v21 = vld [vmem:[#allocation3 + $0x81] sm:$0xff]  ;;  %1138 = vst [vmem:[%s3370_s22 + $0x30] sm:$0xff] %v1106_v7  ;;  %1170 = vst [vmem:[#allocation2 + $0x7a] sm:$0xff] %v1106_v7  ;;  %v1045_v25 = vmax.f32 %v917_v57, %v1013_v18  ;;  %v1014_v28 = vmax.f32 %v950_v38, %v982_v6  ;;  %v888_v61 = vld [vmem:[#allocation3 + $0x91] sm:$0xff] }
  0x6e   : > { %v919_v9 = vmax.f32 %v3239_v24, %v887_v21  ;;  %v951_v17 = vld [vmem:[#allocation3 + $0x82] sm:$0xff]  ;;  %v1108_v37 = vmax.f32 %v1044_v12, %v1076_v48  ;;  %v952_v26 = vld [vmem:[#allocation3 + $0x92] sm:$0xff]  ;;  %1139 = vst [vmem:[%s3370_s22 + $0x38] sm:$0xff] %v1107_v22  ;;  %1171 = vst [vmem:[#allocation2 + $0x82] sm:$0xff] %v1107_v22  ;;  %v920_v55 = vmax.f32 %v3244_v33, %v888_v61 }
  0x6f   : > { %v1015_v42 = vmax.f32 %v951_v17, %v983_v46  ;;  %v984_v36 = vld [vmem:[#allocation3 + $0x93] sm:$0xff]  ;;  %v1109_v15 = vmax.f32 %v1045_v25, %v1077_v27  ;;  %v1046_v49 = vmax.f32 %v918_v13, %v1014_v28  ;;  %v1078_v52 = vld [vmem:[#allocation3 + $0x7c] sm:$0xff]  ;;  %v1079_v20 = vld [vmem:[#allocation3 + $0x84] sm:$0xff] }
  0x70   : > { %v1016_v50 = vmax.f32 %v952_v26, %v984_v36  ;;  %v889_v51 = vld [vmem:[#allocation3 + $0x99] sm:$0xff]  ;;  %1140 = vst [vmem:[%s3370_s22 + $0x40] sm:$0xff] %v1108_v37  ;;  %1172 = vst [vmem:[#allocation2 + $0x92] sm:$0xff] %v1108_v37  ;;  %v890_v54 = vld [vmem:[#allocation3 + $0xa9] sm:$0xff] }
  0x71   : > { %v953_v19 = vld [vmem:[#allocation3 + $0x9a] sm:$0xff]  ;;  %v1047_v24 = vmax.f32 %v919_v9, %v1015_v42  ;;  %v921_v62 = vmax.f32 %v3249_v39, %v889_v51  ;;  %1141 = vst [vmem:[%s3370_s22 + $0x48] sm:$0xff] %v1109_v15  ;;  %1173 = vst [vmem:[#allocation2 + $0x9a] sm:$0xff] %v1109_v15  ;;  %v1110_v4 = vmax.f32 %v1046_v49, %v1078_v52  ;;  %v954_v10 = vld [vmem:[#allocation3 + $0xaa] sm:$0xff] }
  0x72   : > { %v985_v40 = vld [vmem:[#allocation3 + $0x9b] sm:$0xff]  ;;  %v1048_v53 = vmax.f32 %v920_v55, %v1016_v50  ;;  %v922_v33 = vmax.f32 %v3267_v5, %v890_v54  ;;  %v986_v41 = vld [vmem:[#allocation3 + $0xab] sm:$0xff]  ;;  %v987_v57 = vld [vmem:[#allocation3 + $0xb3] sm:$0xff] }
  0x73   : > { %v1080_v63 = vld [vmem:[#allocation3 + $0x94] sm:$0xff]  ;;  %v1017_v3 = vmax.f32 %v953_v19, %v985_v40  ;;  %v1111_v47 = vmax.f32 %v1047_v24, %v1079_v20  ;;  %v1018_v7 = vmax.f32 %v954_v10, %v986_v41  ;;  %1142 = vst [vmem:[%s3370_s22 + $0x50] sm:$0xff] %v1110_v4  ;;  %1174 = vst [vmem:[#allocation2 + $0xaa] sm:$0xff] %v1110_v4  ;;  %v1081_v60 = vld [vmem:[#allocation3 + $0x9c] sm:$0xff] }
  0x74   : > { %v891_v14 = vld [vmem:[#allocation3 + $0xb1] sm:$0xff]  ;;  %v1112_v39 = vmax.f32 %v1048_v53, %v1080_v63  ;;  %v892_v48 = vld [vmem:[#allocation3 + $0xc1] sm:$0xff]  ;;  %v893_v25 = vld [vmem:[#allocation3 + $0xc9] sm:$0xff] }
  0x75   : > { %v955_v34 = vld [vmem:[#allocation3 + $0xb2] sm:$0xff]  ;;  %v1049_v18 = vmax.f32 %v921_v62, %v1017_v3  ;;  %v923_v38 = vmax.f32 %v3269_v58, %v891_v14  ;;  %v956_v13 = vld [vmem:[#allocation3 + $0xc2] sm:$0xff]  ;;  %1143 = vst [vmem:[%s3370_s22 + $0x58] sm:$0xff] %v1111_v47  ;;  %1175 = vst [vmem:[#allocation2 + $0xb2] sm:$0xff] %v1111_v47  ;;  %v1050_v5 = vmax.f32 %v922_v33, %v1018_v7 }
  0x76   : > { %v1019_v12 = vmax.f32 %v955_v34, %v987_v57  ;;  %v1082_v6 = vld [vmem:[#allocation3 + $0xac] sm:$0xff]  ;;  %v924_v21 = vmax.f32 %v3271_v16, %v892_v48  ;;  %v988_v22 = vld [vmem:[#allocation3 + $0xc3] sm:$0xff]  ;;  %1144 = vst [vmem:[%s3370_s22 + $0x60] sm:$0xff] %v1112_v39  ;;  %1176 = vst [vmem:[#allocation2 + $0xc2] sm:$0xff] %v1112_v39  ;;  %v925_v58 = vmax.f32 %v3282_v8, %v893_v25 }
  0x77   : > { %v1113_v27 = vmax.f32 %v1049_v18, %v1081_v60  ;;  %v1083_v9 = vld [vmem:[#allocation3 + $0xb4] sm:$0xff]  ;;  %v1020_v17 = vmax.f32 %v956_v13, %v988_v22  ;;  %v957_v46 = vld [vmem:[#allocation3 + $0xca] sm:$0xff]  ;;  %v1114_v42 = vmax.f32 %v1050_v5, %v1082_v6  ;;  %v895_v51 = vld [vmem:[#allocation3 + $0xe1] sm:$0xff] }
  0x78   : > { %v1051_v28 = vmax.f32 %v923_v38, %v1019_v12  ;;  %v989_v37 = vld [vmem:[#allocation3 + $0xcb] sm:$0xff]  ;;  %v894_v26 = vld [vmem:[#allocation3 + $0xd9] sm:$0xff]  ;;  %v959_v19 = vld [vmem:[#allocation3 + $0xe2] sm:$0xff]  ;;  %v927_v20 = vmax.f32 %v3296_v43, %v895_v51 }
  0x79   : > { %v1021_v61 = vmax.f32 %v957_v46, %v989_v37  ;;  %v958_v36 = vld [vmem:[#allocation3 + $0xda] sm:$0xff]  ;;  %1145 = vst [vmem:[%s3370_s22 + $0x68] sm:$0xff] %v1113_v27  ;;  %1177 = vst [vmem:[#allocation2 + $0xca] sm:$0xff] %v1113_v27  ;;  %v1052_v49 = vmax.f32 %v924_v21, %v1020_v17  ;;  %v1084_v52 = vld [vmem:[#allocation3 + $0xc4] sm:$0xff]  ;;  %v926_v55 = vmax.f32 %v3286_v35, %v894_v26 }
  0x7a   : > { %v990_v15 = vld [vmem:[#allocation3 + $0xdb] sm:$0xff]  ;;  %v1115_v16 = vmax.f32 %v1051_v28, %v1083_v9  ;;  %1146 = vst [vmem:[%s3370_s22 + $0x70] sm:$0xff] %v1114_v42  ;;  %1178 = vst [vmem:[#allocation2 + $0xda] sm:$0xff] %v1114_v42  ;;  %v1085_v24 = vld [vmem:[#allocation3 + $0xcc] sm:$0xff] }
  0x7b   : > { %v1022_v50 = vmax.f32 %v958_v36, %v990_v15  ;;  %v1053_v8 = vmax.f32 %v925_v58, %v1021_v61  ;;  %v991_v62 = vld [vmem:[#allocation3 + $0xe3] sm:$0xff]  ;;  %v896_v40 = vld [vmem:[#allocation3 + $0xf1] sm:$0xff]  ;;  %v1116_v54 = vmax.f32 %v1052_v49, %v1084_v52  ;;  %v897_v47 = vld [vmem:[#allocation3 + $0xf9] sm:$0xff] }
  0x7c   : > { %1147 = vst [vmem:[%s3370_s22 + $0x78] sm:$0xff] %v1115_v16  ;;  %1179 = vst [vmem:[#allocation2 + $0xe2] sm:$0xff] %v1115_v16  ;;  %v1086_v53 = vld [vmem:[#allocation3 + $0xdc] sm:$0xff]  ;;  %v1023_v63 = vmax.f32 %v959_v19, %v991_v62  ;;  %v928_v35 = vmax.f32 %v3304_v11, %v896_v40  ;;  %v960_v3 = vld [vmem:[#allocation3 + $0xf2] sm:$0xff]  ;;  %v929_v39 = vmax.f32 %v3311_v59, %v897_v47 }
  0x7d   : > { %v1054_v4 = vmax.f32 %v926_v55, %v1022_v50  ;;  %v992_v33 = vld [vmem:[#allocation3 + $0xf3] sm:$0xff]  ;;  %v1117_v10 = vmax.f32 %v1053_v8, %v1085_v24  ;;  %v993_v14 = vld [vmem:[#allocation3 + $0xfb] sm:$0xff]  ;;  %1148 = vst [vmem:[%s3370_s22 + $0x80] sm:$0xff] %v1116_v54  ;;  %1180 = vst [vmem:[#allocation2 + $0xf2] sm:$0xff] %v1116_v54 }
  0x7e   : > { %v1024_v41 = vmax.f32 %v960_v3, %v992_v33  ;;  %v961_v7 = vld [vmem:[#allocation3 + $0xfa] sm:$0xff]  ;;  %v1055_v34 = vmax.f32 %v927_v20, %v1023_v63  ;;  %v1087_v57 = vld [vmem:[#allocation3 + $0xe4] sm:$0xff]  ;;  %v899_v5 = vld [vmem:[#allocation3 + $0x111] sm:$0xff] }
  0x7f   : > { %v1118_v43 = vmax.f32 %v1054_v4, %v1086_v53  ;;  %v1025_v18 = vmax.f32 %v961_v7, %v993_v14  ;;  %v898_v60 = vld [vmem:[#allocation3 + $0x109] sm:$0xff]  ;;  %1149 = vst [vmem:[%s3370_s22 + $0x88] sm:$0xff] %v1117_v10  ;;  %1181 = vst [vmem:[#allocation2 + $0xfa] sm:$0xff] %v1117_v10  ;;  %v1088_v12 = vld [vmem:[#allocation3 + $0xf4] sm:$0xff]  ;;  %v931_v59 = vmax.f32 %v3321_v2, %v899_v5 }
  0x80   : > { %v962_v38 = vld [vmem:[#allocation3 + $0x10a] sm:$0xff]  ;;  %v1056_v11 = vmax.f32 %v928_v35, %v1024_v41  ;;  %v930_v48 = vmax.f32 %v3319_v44, %v898_v60  ;;  %v1119_v6 = vmax.f32 %v1055_v34, %v1087_v57  ;;  %v1089_v22 = vld [vmem:[#allocation3 + $0xfc] sm:$0xff]  ;;  %v963_v27 = vld [vmem:[#allocation3 + $0x112] sm:$0xff] }
  0x81   : > { %v994_v13 = vld [vmem:[#allocation3 + $0x10b] sm:$0xff]  ;;  %1150 = vst [vmem:[%s3370_s22 + $0x90] sm:$0xff] %v1118_v43  ;;  %1182 = vst [vmem:[#allocation2 + $0x10a] sm:$0xff] %v1118_v43  ;;  %v1057_v21 = vmax.f32 %v929_v39, %v1025_v18  ;;  %v995_v28 = vld [vmem:[#allocation3 + $0x113] sm:$0xff] }
  0x82   : > { %v1026_v25 = vmax.f32 %v962_v38, %v994_v13  ;;  %v1120_v9 = vmax.f32 %v1056_v11, %v1088_v12  ;;  %v1027_v17 = vmax.f32 %v963_v27, %v995_v28  ;;  %v900_v58 = vld [vmem:[#allocation3 + $0x121] sm:$0xff]  ;;  %1151 = vst [vmem:[%s3370_s22 + $0x98] sm:$0xff] %v1119_v6  ;;  %1183 = vst [vmem:[#allocation2 + $0x112] sm:$0xff] %v1119_v6  ;;  %v1090_v61 = vld [vmem:[#allocation3 + $0x10c] sm:$0xff] }
  0x83   : > { %v964_v46 = vld [vmem:[#allocation3 + $0x122] sm:$0xff]  ;;  %v1121_v44 = vmax.f32 %v1057_v21, %v1089_v22  ;;  %v932_v26 = vmax.f32 %v3332_v45, %v900_v58  ;;  %v965_v16 = vld [vmem:[#allocation3 + $0x12a] sm:$0xff]  ;;  %v1091_v49 = vld [vmem:[#allocation3 + $0x114] sm:$0xff] }
  0x84   : > { %v996_v37 = vld [vmem:[#allocation3 + $0x123] sm:$0xff]  ;;  %v1058_v42 = vmax.f32 %v930_v48, %v1026_v25  ;;  %1152 = vst [vmem:[%s3370_s22 + $0xa0] sm:$0xff] %v1120_v9  ;;  %1184 = vst [vmem:[#allocation2 + $0x122] sm:$0xff] %v1120_v9  ;;  %v1059_v2 = vmax.f32 %v931_v59, %v1027_v17  ;;  %v997_v55 = vld [vmem:[#allocation3 + $0x12b] sm:$0xff] }
  0x85   : > { %v1028_v36 = vmax.f32 %v964_v46, %v996_v37  ;;  %v901_v15 = vld [vmem:[#allocation3 + $0x129] sm:$0xff]  ;;  %v902_v50 = vld [vmem:[#allocation3 + $0x139] sm:$0xff]  ;;  %1153 = vst [vmem:[%s3370_s22 + $0xa8] sm:$0xff] %v1121_v44  ;;  %1185 = vst [vmem:[#allocation2 + $0x12a] sm:$0xff] %v1121_v44  ;;  %v1029_v24 = vmax.f32 %v965_v16, %v997_v55 }
  0x86   : > { %v933_v52 = vmax.f32 %v3335_v56, %v901_v15  ;;  %v1122_v51 = vmax.f32 %v1058_v42, %v1090_v61  ;;  %v1092_v8 = vld [vmem:[#allocation3 + $0x124] sm:$0xff]  ;;  %v934_v45 = vmax.f32 %v3345_v0, %v902_v50  ;;  %v966_v20 = vld [vmem:[#allocation3 + $0x13a] sm:$0xff]  ;;  %v1123_v40 = vmax.f32 %v1059_v2, %v1091_v49  ;;  %v1093_v3 = vld [vmem:[#allocation3 + $0x12c] sm:$0xff] }
  0x87   : > { %v1060_v19 = vmax.f32 %v932_v26, %v1028_v36  ;;  %v998_v62 = vld [vmem:[#allocation3 + $0x13b] sm:$0xff]  ;;  %v999_v63 = vld [vmem:[#allocation3 + $0x143] sm:$0xff]  ;;  %v904_v41 = vld [vmem:[#allocation3 + $0x151] sm:$0xff] }
  0x88   : > { %v1030_v54 = vmax.f32 %v966_v20, %v998_v62  ;;  %v903_v4 = vld [vmem:[#allocation3 + $0x141] sm:$0xff]  ;;  %1154 = vst [vmem:[%s3370_s22 + $0xb0] sm:$0xff] %v1122_v51  ;;  %1186 = vst [vmem:[#allocation2 + $0x13a] sm:$0xff] %v1122_v51  ;;  %v1061_v35 = vmax.f32 %v933_v52, %v1029_v24  ;;  %v968_v47 = vld [vmem:[#allocation3 + $0x152] sm:$0xff]  ;;  %v936_v14 = vmax.f32 %v3354_v31, %v904_v41 }
  0x89   : > { %v967_v53 = vld [vmem:[#allocation3 + $0x142] sm:$0xff]  ;;  %v1124_v56 = vmax.f32 %v1060_v19, %v1092_v8  ;;  %v935_v33 = vmax.f32 %v3347_v1, %v903_v4  ;;  %1155 = vst [vmem:[%s3370_s22 + $0xb8] sm:$0xff] %v1123_v40  ;;  %1187 = vst [vmem:[#allocation2 + $0x142] sm:$0xff] %v1123_v40  ;;  %v1000_v43 = vld [vmem:[#allocation3 + $0x153] sm:$0xff] }
  0x8a   : > { %v1031_v10 = vmax.f32 %v967_v53, %v999_v63  ;;  %v1062_v0 = vmax.f32 %v934_v45, %v1030_v54  ;;  %v1094_v7 = vld [vmem:[#allocation3 + $0x13c] sm:$0xff]  ;;  %v1125_v57 = vmax.f32 %v1061_v35, %v1093_v3  ;;  %v1095_v18 = vld [vmem:[#allocation3 + $0x144] sm:$0xff]  ;;  %v1032_v60 = vmax.f32 %v968_v47, %v1000_v43  ;;  %v1096_v48 = vld [vmem:[#allocation3 + $0x154] sm:$0xff] }
  0x8b   : > { %v905_v34 = vld [vmem:[#allocation3 + $0x159] sm:$0xff]  ;;  %1156 = vst [vmem:[%s3370_s22 + $0xc0] sm:$0xff] %v1124_v56  ;;  %1188 = vst [vmem:[#allocation2 + $0x152] sm:$0xff] %v1124_v56  ;;  %v906_v5 = vld [vmem:[#allocation3 + $0x169] sm:$0xff] }
  0x8c   : > { %v1063_v39 = vmax.f32 %v935_v33, %v1031_v10  ;;  %v937_v1 = vmax.f32 %v3349_v29, %v905_v34  ;;  %v969_v38 = vld [vmem:[#allocation3 + $0x15a] sm:$0xff]  ;;  %v1126_v12 = vmax.f32 %v1062_v0, %v1094_v7  ;;  %v970_v6 = vld [vmem:[#allocation3 + $0x16a] sm:$0xff]  ;;  %1157 = vst [vmem:[%s3370_s22 + $0xc8] sm:$0xff] %v1125_v57  ;;  %1189 = vst [vmem:[#allocation2 + $0x15a] sm:$0xff] %v1125_v57 }
  0x8d   : > { %v1001_v11 = vld [vmem:[#allocation3 + $0x15b] sm:$0xff]  ;;  %v1002_v31 = vld [vmem:[#allocation3 + $0x16b] sm:$0xff]  ;;  %v1064_v22 = vmax.f32 %v936_v14, %v1032_v60  ;;  %v938_v59 = vmax.f32 %v3361_v30, %v906_v5  ;;  %v1003_v46 = vld [vmem:[#allocation3 + $0x173] sm:$0xff] }
  0x8e   : > { %v1033_v13 = vmax.f32 %v969_v38, %v1001_v11  ;;  %v1127_v21 = vmax.f32 %v1063_v39, %v1095_v18  ;;  %v1097_v25 = vld [vmem:[#allocation3 + $0x15c] sm:$0xff]  ;;  %v1034_v27 = vmax.f32 %v970_v6, %v1002_v31  ;;  %v907_v28 = vld [vmem:[#allocation3 + $0x171] sm:$0xff]  ;;  %1158 = vst [vmem:[%s3370_s22 + $0xd0] sm:$0xff] %v1126_v12  ;;  %1190 = vst [vmem:[#allocation2 + $0x16a] sm:$0xff] %v1126_v12 }
  0x8f   : > { %v971_v29 = vld [vmem:[#allocation3 + $0x172] sm:$0xff]  ;;  %v939_v58 = vmax.f32 %v3357_v23, %v907_v28  ;;  %v1128_v44 = vmax.f32 %v1064_v22, %v1096_v48  ;;  %v1209_v36 = vld [vmem:[#allocation2 + $0x68] sm:$0xff]  ;;  %v1212_v30 = vld [vmem:[#allocation2 + $0x80] sm:$0xff] }
  0x90   : > { %v1065_v9 = vmax.f32 %v937_v1, %v1033_v13  ;;  %v1098_v17 = vld [vmem:[#allocation3 + $0x16c] sm:$0xff]  ;;  %v1203_v37 = vld [vmem:[#allocation2 + $0x38] sm:$0xff]  ;;  %1159 = vst [vmem:[%s3370_s22 + $0xd8] sm:$0xff] %v1127_v21  ;;  %1191 = vst [vmem:[#allocation2 + $0x172] sm:$0xff] %v1127_v21  ;;  %v1066_v42 = vmax.f32 %v938_v59, %v1034_v27  ;;  %v1035_v61 = vmax.f32 %v971_v29, %v1003_v46 }
  0x91   : > { %v1206_v26 = vld [vmem:[#allocation2 + $0x50] sm:$0xff]  ;;  %v3430_v15 = vld [vmem:[#allocation2 + $0x8] sm:$0xff]  ;;  %v1215_v49 = vld [vmem:[#allocation2 + $0x98] sm:$0xff]  ;;  %v1305_v51 = vmax.f32 %v1209_v36, %v1212_v30  ;;  %1160 = vst [vmem:[%s3370_s22 + $0xe0] sm:$0xff] %v1128_v44 }
  0x92   : > { %v1296_v16 = vmax.f32 %v3430_v15, %v1203_v37  ;;  %v1129_v2 = vmax.f32 %v1065_v9, %v1097_v25  ;;  %v1218_v52 = vld [vmem:[#allocation2 + $0xb0] sm:$0xff]  ;;  %v1221_v23 = vld [vmem:[#allocation2 + $0xc8] sm:$0xff]  ;;  %v1299_v55 = vmax.f32 %v1203_v37, %v1206_v26  ;;  %v1302_v50 = vmax.f32 %v1206_v26, %v1209_v36  ;;  %1192 = vst [vmem:[#allocation2 + $0x182] sm:$0xff] %v1128_v44  ;;  %v1224_v24 = vld [vmem:[#allocation2 + $0xe0] sm:$0xff] }
  0x93   : > { %v1130_v19 = vmax.f32 %v1066_v42, %v1098_v17  ;;  %v1067_v8 = vmax.f32 %v939_v58, %v1035_v61  ;;  %v1227_v45 = vld [vmem:[#allocation2 + $0xf8] sm:$0xff]  ;;  %v1230_v20 = vld [vmem:[#allocation2 + $0x110] sm:$0xff]  ;;  %v1308_v62 = vmax.f32 %v1212_v30, %v1215_v49  ;;  %v1311_v40 = vmax.f32 %v1215_v49, %v1218_v52  ;;  %v1233_v4 = vld [vmem:[#allocation2 + $0x128] sm:$0xff] }
  0x94   : > { %1161 = vst [vmem:[%s3370_s22 + $0xe8] sm:$0xff] %v1129_v2  ;;  %1193 = vst [vmem:[#allocation2 + $0x18a] sm:$0xff] %v1129_v2  ;;  %v1099_v54 = vld [vmem:[#allocation3 + $0x174] sm:$0xff]  ;;  %v1236_v53 = vld [vmem:[#allocation2 + $0x140] sm:$0xff]  ;;  %v1314_v63 = vmax.f32 %v1218_v52, %v1221_v23  ;;  %v1317_v56 = vmax.f32 %v1221_v23, %v1224_v24  ;;  %v1320_v35 = vmax.f32 %v1224_v24, %v1227_v45 }
  0x95   : > { %v1323_v3 = vmax.f32 %v1227_v45, %v1230_v20  ;;  %1162 = vst [vmem:[%s3370_s22 + $0xf0] sm:$0xff] %v1130_v19  ;;  %1194 = vst [vmem:[#allocation2 + $0x19a] sm:$0xff] %v1130_v19  ;;  %v1131_v33 = vmax.f32 %v1067_v8, %v1099_v54  ;;  %v1326_v10 = vmax.f32 %v1230_v20, %v1233_v4  ;;  %v1239_v47 = vld [vmem:[#allocation2 + $0x158] sm:$0xff]  ;;  %v1196_v48 = vld [vmem:[#allocation2] sm:$0xff] }
  0x96   : > { %v1329_v41 = vmax.f32 %v1233_v4, %v1236_v53  ;;  %v1488_v0 = vmax.f32 %v1296_v16, %v1302_v50  ;;  %v1491_v7 = vmax.f32 %v1299_v55, %v1305_v51  ;;  %v1494_v14 = vmax.f32 %v1302_v50, %v1308_v62  ;;  %v3441_v13 = vld [vmem:[#allocation2 + $0x18] sm:$0xff]  ;;  %v1340_v22 = vld [vmem:[#allocation2 + $0x30] sm:$0xff]  ;;  %v1388_v25 = vld [vmem:[#allocation2 + $0x48] sm:$0xff] }
  0x97   : > { %v1497_v43 = vmax.f32 %v1305_v51, %v1311_v40  ;;  %1163 = vst [vmem:[%s3370_s22 + $0xf8] sm:$0xff] %v1131_v33  ;;  %1195 = vst [vmem:[#allocation2 + $0x1a2] sm:$0xff] %v1131_v33  ;;  %v3437_v34 = vmax.f32 %v1236_v53, %v1239_v47  ;;  %v1500_v57 = vmax.f32 %v1308_v62, %v1314_v63  ;;  %v1242_v60 = vld [vmem:[#allocation2 + $0x170] sm:$0xff]  ;;  %v1246_v17 = vld [vmem:[#allocation2 + $0x28] sm:$0xf] }
  0x98   : > { %v1503_v39 = vmax.f32 %v1311_v40, %v1317_v56  ;;  %v1506_v18 = vmax.f32 %v1314_v63, %v1320_v35  ;;  %v1509_v1 = vmax.f32 %v1317_v56, %v1323_v3  ;;  %v1512_v38 = vmax.f32 %v1320_v35, %v1326_v10  ;;  %v1198_v59 = vld [vmem:[#allocation2 + $0x10] sm:$0xf]  ;;  %v1342_v58 = vld [vmem:[#allocation2 + $0x40] sm:$0xf]  ;;  %v1390_v46 = vld [vmem:[#allocation2 + $0x58] sm:$0xf] }
  0x99   : > { %v1515_v11 = vmax.f32 %v1323_v3, %v1329_v41  ;;  %v3439_v12 = vmax.f32 %v1299_v55, %v1209_v36  ;;  %v3443_v5 = vmax.f32 %v1239_v47, %v1242_v60  ;;  %v1518_v6 = vmax.f32 %v1326_v10, %v3437_v34  ;;  %v1532_v36 = vld [vmem:[#allocation2 + $0x60] sm:$0xff]  ;;  %v1201_v8 = vld [vmem:[#allocation2 + $0x28] sm:$0xf]  ;;  %v1534_v40 = vld [vmem:[#allocation2 + $0x70] sm:$0xf] }
  0x9a   : > { %v3446_v31 = vmax.f32 %v1488_v0, %v1212_v30  ;;  %v3448_v21 = vmax.f32 %v1491_v7, %v1215_v49  ;;  %v3450_v27 = vmax.f32 %v1494_v14, %v1218_v52  ;;  %v3452_v28 = vmax.f32 %v1497_v43, %v1221_v23  ;;  %v1249_v30 = vld [vmem:[#allocation2 + $0x40] sm:$0xf]  ;;  %v1535_v23 = vld [vmem:[#allocation2 + $0x78] sm:$0xff]  ;;  %v1538_v63 = vld [vmem:[#allocation2 + $0x90] sm:$0xff] }
  0x9b   : > { %v3454_v29 = vmax.f32 %v1500_v57, %v1224_v24  ;;  %v3456_v9 = vmax.f32 %v1503_v39, %v1227_v45  ;;  %1629 = vst [vmem:[#allocation3 + $0x8] sm:$0xff] %v3439_v12  ;;  %v1290_v37 = vld [vmem:[#allocation2 + $0x188] sm:$0xff]  ;;  %v1521_v44 = vmax.f32 %v1329_v41, %v3443_v5  ;;  %v3460_v42 = vmax.f32 %v1506_v18, %v1230_v20  ;;  %v1345_v24 = vld [vmem:[#allocation2 + $0x58] sm:$0xf]  ;;  %v1393_v45 = vld [vmem:[#allocation2 + $0x70] sm:$0xf] }
  0x9c   : > { %v1605_v61 = vmax.f32 %v1509_v1, %v1233_v4  ;;  %v1608_v26 = vmax.f32 %v1512_v38, %v1236_v53  ;;  %1632 = vst [vmem:[#allocation3 + $0x20] sm:$0xff] %v3446_v31  ;;  %1635 = vst [vmem:[#allocation3 + $0x38] sm:$0xff] %v3448_v21  ;;  %v1338_v16 = vmax.f32 %v1242_v60, %v1290_v37  ;;  %v1204_v56 = vld [vmem:[#allocation2 + $0x40] sm:$0xf]  ;;  %v1252_v41 = vld [vmem:[#allocation2 + $0x58] sm:$0xf] }
  0x9d   : > { %v1611_v2 = vmax.f32 %v1515_v11, %v1239_v47  ;;  %v1614_v49 = vmax.f32 %v1518_v6, %v1242_v60  ;;  %1638 = vst [vmem:[#allocation3 + $0x50] sm:$0xff] %v3450_v27  ;;  %1641 = vst [vmem:[#allocation3 + $0x68] sm:$0xff] %v3452_v28  ;;  %v1292_v52 = vmax.f32 %v1196_v48, %v3441_v13  ;;  %v1348_v47 = vld [vmem:[#allocation2 + $0x70] sm:$0xf]  ;;  %v1396_v0 = vld [vmem:[#allocation2 + $0x88] sm:$0xf] }
  0x9e   : > { %1644 = vst [vmem:[#allocation3 + $0x80] sm:$0xff] %v3454_v29  ;;  %1647 = vst [vmem:[#allocation3 + $0x98] sm:$0xff] %v3456_v9  ;;  %v1617_v55 = vmax.f32 %v1521_v44, %v1290_v37  ;;  %v1436_v50 = vmax.f32 %v1340_v22, %v1388_v25  ;;  %v1294_v51 = vmax.f32 %v1198_v59, %v1246_v17  ;;  %v1386_v20 = vld [vmem:[#allocation2 + $0x1a0] sm:$0xff]  ;;  %v1541_v57 = vld [vmem:[#allocation2 + $0xa8] sm:$0xff] }
  0x9f   : > { %1650 = vst [vmem:[#allocation3 + $0xb0] sm:$0xff] %v3460_v42  ;;  %1653 = vst [vmem:[#allocation3 + $0xc8] sm:$0xff] %v1605_v61  ;;  %v1438_v19 = vmax.f32 %v1342_v58, %v1390_v46  ;;  %v1524_v62 = vmax.f32 %v3437_v34, %v1338_v16  ;;  %v1295_v54 = vmax.f32 %v3441_v13, %v1340_v22  ;;  %v1207_v39 = vld [vmem:[#allocation2 + $0x58] sm:$0xf]  ;;  %v1255_v18 = vld [vmem:[#allocation2 + $0x70] sm:$0xf] }
  0xa0   : > { %1656 = vst [vmem:[#allocation3 + $0xe0] sm:$0xff] %v1608_v26  ;;  %1659 = vst [vmem:[#allocation3 + $0xf8] sm:$0xff] %v1611_v2  ;;  %v3472_v4 = vmax.f32 %v1388_v25, %v1532_v36  ;;  %v1297_v53 = vmax.f32 %v1201_v8, %v1249_v30  ;;  %v1479_v35 = vmax.f32 %v1290_v37, %v1386_v20  ;;  %v1537_v48 = vld [vmem:[#allocation2 + $0x88] sm:$0xf]  ;;  %v1399_v6 = vld [vmem:[#allocation2 + $0xa0] sm:$0xf] }
  0xa1   : > { %1662 = vst [vmem:[#allocation3 + $0x110] sm:$0xff] %v1614_v49  ;;  %v1482_v3 = vmax.f32 %v1386_v20, %v3430_v15  ;;  %1665 = vst [vmem:[#allocation3 + $0x128] sm:$0xff] %v1617_v55  ;;  %v1484_v33 = vmax.f32 %v1292_v52, %v1436_v50  ;;  %v1486_v10 = vmax.f32 %v1294_v51, %v1438_v19  ;;  %v1351_v13 = vld [vmem:[#allocation2 + $0x88] sm:$0xf]  ;;  %v1544_v22 = vld [vmem:[#allocation2 + $0xc0] sm:$0xff] }
  0xa2   : > { %v1620_v7 = vmax.f32 %v1524_v62, %v1386_v20  ;;  %v1487_v14 = vmax.f32 %v1295_v54, %v3472_v4  ;;  %v1441_v43 = vmax.f32 %v1345_v24, %v1393_v45  ;;  %v3476_v34 = vmax.f32 %v1532_v36, %v1535_v23  ;;  %v1210_v46 = vld [vmem:[#allocation2 + $0x70] sm:$0xf]  ;;  %v1258_v37 = vld [vmem:[#allocation2 + $0x88] sm:$0xf]  ;;  %v1354_v44 = vld [vmem:[#allocation2 + $0xa0] sm:$0xf] }
  0xa3   : > { %v1527_v60 = vmax.f32 %v3443_v5, %v1479_v35  ;;  %v1530_v1 = vmax.f32 %v1338_v16, %v1482_v3  ;;  %v3479_v38 = vmax.f32 %v1484_v33, %v1532_v36  ;;  %v1582_v11 = vmax.f32 %v1486_v10, %v1534_v40  ;;  %v1402_v30 = vld [vmem:[#allocation2 + $0xb8] sm:$0xf]  ;;  %v1213_v16 = vld [vmem:[#allocation2 + $0x88] sm:$0xf]  ;;  %v1261_v2 = vld [vmem:[#allocation2 + $0xa0] sm:$0xf] }
  0xa4   : > { %1668 = vst [vmem:[#allocation3 + $0x140] sm:$0xff] %v1620_v7  ;;  %v3481_v25 = vmax.f32 %v1487_v14, %v1535_v23  ;;  %v1489_v59 = vmax.f32 %v1297_v53, %v1441_v43  ;;  %v1490_v17 = vmax.f32 %v1436_v50, %v3476_v34  ;;  %v1300_v58 = vmax.f32 %v1204_v56, %v1252_v41  ;;  %v1540_v55 = vld [vmem:[#allocation2 + $0xa0] sm:$0xf]  ;;  %v1357_v19 = vld [vmem:[#allocation2 + $0xb8] sm:$0xf]  ;;  %v1550_v7 = vld [vmem:[#allocation2 + $0xf0] sm:$0xff] }
  0xa5   : > { %v1623_v5 = vmax.f32 %v1527_v60, %v3430_v15  ;;  %v1626_v61 = vmax.f32 %v1530_v1, %v3430_v15  ;;  %1628 = vst [vmem:[#allocation3] sm:$0xff] %v3479_v38  ;;  %1630 = vst [vmem:[#allocation3 + $0x10] sm:$0xf] %v1582_v11  ;;  %v1444_v26 = vmax.f32 %v1348_v47, %v1396_v0  ;;  %v1405_v8 = vld [vmem:[#allocation2 + $0xd0] sm:$0xf]  ;;  %v1547_v62 = vld [vmem:[#allocation2 + $0xd8] sm:$0xff] }
  0xa6   : > { %v1445_v36 = vmax.f32 %v1535_v23, %v1538_v63  ;;  %1631 = vst [vmem:[#allocation3 + $0x18] sm:$0xff] %v3481_v25  ;;  %v1585_v49 = vmax.f32 %v1489_v59, %v1537_v48  ;;  %v3488_v52 = vmax.f32 %v1490_v17, %v1538_v63  ;;  %v1303_v50 = vmax.f32 %v1207_v39, %v1255_v18  ;;  %v1543_v45 = vld [vmem:[#allocation2 + $0xb8] sm:$0xf]  ;;  %v1216_v40 = vld [vmem:[#allocation2 + $0xa0] sm:$0xf]  ;;  %v1553_v14 = vld [vmem:[#allocation2 + $0x108] sm:$0xff] }
  0xa7   : > { %v1447_v51 = vmax.f32 %v1351_v13, %v1399_v6  ;;  %1671 = vst [vmem:[#allocation3 + $0x158] sm:$0xff] %v1623_v5  ;;  %1674 = vst [vmem:[#allocation3 + $0x170] sm:$0xff] %v1626_v61  ;;  %v1492_v15 = vmax.f32 %v1300_v58, %v1444_v26  ;;  %v1448_v23 = vmax.f32 %v1538_v63, %v1541_v57  ;;  %v1264_v3 = vld [vmem:[#allocation2 + $0xb8] sm:$0xf]  ;;  %v1360_v33 = vld [vmem:[#allocation2 + $0xd0] sm:$0xf] }
  0xa8   : > { %v1493_v24 = vmax.f32 %v3472_v4, %v1445_v36  ;;  %v1306_v20 = vmax.f32 %v1210_v46, %v1258_v37  ;;  %1633 = vst [vmem:[#allocation3 + $0x28] sm:$0xf] %v1585_v49  ;;  %1634 = vst [vmem:[#allocation3 + $0x30] sm:$0xff] %v3488_v52  ;;  %v1450_v53 = vmax.f32 %v1354_v44, %v1402_v30  ;;  %v1408_v10 = vld [vmem:[#allocation2 + $0xe8] sm:$0xf]  ;;  %v1556_v58 = vld [vmem:[#allocation2 + $0x120] sm:$0xff] }
  0xa9   : > { %v1495_v54 = vmax.f32 %v1303_v50, %v1447_v51  ;;  %v3492_v56 = vmax.f32 %v1541_v57, %v1544_v22  ;;  %v1309_v35 = vmax.f32 %v1213_v16, %v1261_v2  ;;  %v1588_v41 = vmax.f32 %v1492_v15, %v1540_v55  ;;  %v1546_v63 = vld [vmem:[#allocation2 + $0xd0] sm:$0xf]  ;;  %v1219_v43 = vld [vmem:[#allocation2 + $0xb8] sm:$0xf]  ;;  %v1549_v1 = vld [vmem:[#allocation2 + $0xe8] sm:$0xf] }
  0xaa   : > { %v3494_v47 = vmax.f32 %v1493_v24, %v1541_v57  ;;  %v1496_v4 = vmax.f32 %v3476_v34, %v1448_v23  ;;  %v1453_v0 = vmax.f32 %v1357_v19, %v1405_v8  ;;  %v1498_v18 = vmax.f32 %v1306_v20, %v1450_v53  ;;  %v1267_v48 = vld [vmem:[#allocation2 + $0xd0] sm:$0xf]  ;;  %v1363_v13 = vld [vmem:[#allocation2 + $0xe8] sm:$0xf]  ;;  %v1411_v6 = vld [vmem:[#allocation2 + $0x100] sm:$0xf] }
  0xab   : > { %v1591_v39 = vmax.f32 %v1495_v54, %v1543_v45  ;;  %v1499_v60 = vmax.f32 %v1445_v36, %v3492_v56  ;;  %v3498_v11 = vmax.f32 %v1544_v22, %v1547_v62  ;;  %1636 = vst [vmem:[#allocation3 + $0x40] sm:$0xf] %v1588_v41  ;;  %v1312_v59 = vmax.f32 %v1216_v40, %v1264_v3  ;;  %v1222_v46 = vld [vmem:[#allocation2 + $0xd0] sm:$0xf]  ;;  %v1270_v37 = vld [vmem:[#allocation2 + $0xe8] sm:$0xf] }
  0xac   : > { %1637 = vst [vmem:[#allocation3 + $0x48] sm:$0xff] %v3494_v47  ;;  %v3501_v57 = vmax.f32 %v1496_v4, %v1544_v22  ;;  %v1501_v34 = vmax.f32 %v1309_v35, %v1453_v0  ;;  %v1456_v17 = vmax.f32 %v1360_v33, %v1408_v10  ;;  %v1594_v44 = vmax.f32 %v1498_v18, %v1546_v63  ;;  %v1552_v26 = vld [vmem:[#allocation2 + $0x100] sm:$0xf]  ;;  %v1414_v16 = vld [vmem:[#allocation2 + $0x118] sm:$0xf] }
  0xad   : > { %1639 = vst [vmem:[#allocation3 + $0x58] sm:$0xf] %v1591_v39  ;;  %v3503_v5 = vmax.f32 %v1499_v60, %v1547_v62  ;;  %v1502_v61 = vmax.f32 %v1448_v23, %v3498_v11  ;;  %v1457_v36 = vmax.f32 %v1547_v62, %v1550_v7  ;;  %v1366_v30 = vld [vmem:[#allocation2 + $0x100] sm:$0xf]  ;;  %v1225_v2 = vld [vmem:[#allocation2 + $0xe8] sm:$0xf]  ;;  %v1315_v55 = vmax.f32 %v1219_v43, %v1267_v48 }
  0xae   : > { %1640 = vst [vmem:[#allocation3 + $0x60] sm:$0xff] %v3501_v57  ;;  %v1597_v22 = vmax.f32 %v1501_v34, %v1549_v1  ;;  %v1504_v49 = vmax.f32 %v1312_v59, %v1456_v17  ;;  %v1459_v50 = vmax.f32 %v1363_v13, %v1411_v6  ;;  %v1273_v51 = vld [vmem:[#allocation2 + $0x100] sm:$0xf]  ;;  %v1369_v19 = vld [vmem:[#allocation2 + $0x118] sm:$0xf]  ;;  %v1460_v23 = vmax.f32 %v1550_v7, %v1553_v14  ;;  %v1562_v43 = vld [vmem:[#allocation2 + $0x150] sm:$0xff] }
  0xaf   : > { %v1417_v8 = vld [vmem:[#allocation2 + $0x130] sm:$0xf]  ;;  %1642 = vst [vmem:[#allocation3 + $0x70] sm:$0xf] %v1594_v44  ;;  %1643 = vst [vmem:[#allocation3 + $0x78] sm:$0xff] %v3503_v5  ;;  %v3508_v15 = vmax.f32 %v1502_v61, %v1550_v7  ;;  %v1505_v24 = vmax.f32 %v3492_v56, %v1457_v36  ;;  %v1318_v20 = vmax.f32 %v1222_v46, %v1270_v37  ;;  %v1559_v62 = vld [vmem:[#allocation2 + $0x138] sm:$0xff] }
  0xb0   : > { %v1555_v45 = vld [vmem:[#allocation2 + $0x118] sm:$0xf]  ;;  %v1228_v40 = vld [vmem:[#allocation2 + $0x100] sm:$0xf]  ;;  %1645 = vst [vmem:[#allocation3 + $0x88] sm:$0xf] %v1597_v22  ;;  %v1600_v54 = vmax.f32 %v1504_v49, %v1552_v26  ;;  %v1507_v53 = vmax.f32 %v1315_v55, %v1459_v50  ;;  %v1462_v35 = vmax.f32 %v1366_v30, %v1414_v16  ;;  %v3511_v3 = vmax.f32 %v1553_v14, %v1556_v58 }
  0xb1   : > { %v1276_v33 = vld [vmem:[#allocation2 + $0x118] sm:$0xf]  ;;  %v1372_v10 = vld [vmem:[#allocation2 + $0x130] sm:$0xf]  ;;  %v1420_v41 = vld [vmem:[#allocation2 + $0x148] sm:$0xf]  ;;  %v3514_v4 = vmax.f32 %v1505_v24, %v1553_v14  ;;  %v1508_v56 = vmax.f32 %v3498_v11, %v1460_v23  ;;  %v1321_v0 = vmax.f32 %v1225_v2, %v1273_v51  ;;  %v1465_v7 = vmax.f32 %v1369_v19, %v1417_v8 }
  0xb2   : > { %1646 = vst [vmem:[#allocation3 + $0x90] sm:$0xff] %v3508_v15  ;;  %v1558_v63 = vld [vmem:[#allocation2 + $0x130] sm:$0xf]  ;;  %v1565_v39 = vld [vmem:[#allocation2 + $0x168] sm:$0xff]  ;;  %v1231_v18 = vld [vmem:[#allocation2 + $0x118] sm:$0xf]  ;;  %v1603_v60 = vmax.f32 %v1507_v53, %v1555_v45  ;;  %v1510_v1 = vmax.f32 %v1318_v20, %v1462_v35  ;;  %v1511_v48 = vmax.f32 %v1457_v36, %v3511_v3  ;;  %v3518_v6 = vmax.f32 %v1556_v58, %v1559_v62 }
  0xb3   : > { %1648 = vst [vmem:[#allocation3 + $0xa0] sm:$0xf] %v1600_v54  ;;  %v1561_v13 = vld [vmem:[#allocation2 + $0x148] sm:$0xf]  ;;  %v1279_v34 = vld [vmem:[#allocation2 + $0x130] sm:$0xf]  ;;  %v3521_v11 = vmax.f32 %v1508_v56, %v1556_v58  ;;  %v1513_v17 = vmax.f32 %v1321_v0, %v1465_v7  ;;  %v1324_v46 = vmax.f32 %v1228_v40, %v1276_v33  ;;  %v1468_v37 = vmax.f32 %v1372_v10, %v1420_v41 }
  0xb4   : > { %v1375_v59 = vld [vmem:[#allocation2 + $0x148] sm:$0xf]  ;;  %v1423_v14 = vld [vmem:[#allocation2 + $0x160] sm:$0xf]  ;;  %1649 = vst [vmem:[#allocation3 + $0xa8] sm:$0xff] %v3514_v4  ;;  %v1606_v30 = vmax.f32 %v1510_v1, %v1558_v63  ;;  %v3525_v36 = vmax.f32 %v1511_v48, %v1559_v62  ;;  %v1514_v16 = vmax.f32 %v1460_v23, %v3518_v6  ;;  %v1469_v2 = vmax.f32 %v1559_v62, %v1562_v43  ;;  %v1571_v53 = vld [vmem:[#allocation2 + $0x198] sm:$0xff] }
  0xb5   : > { %v3523_v44 = vld [vmem:[#allocation2 + $0x180] sm:$0xff]  ;;  %v1234_v61 = vld [vmem:[#allocation2 + $0x130] sm:$0xf]  ;;  %v1282_v26 = vld [vmem:[#allocation2 + $0x148] sm:$0xf]  ;;  %1652 = vst [vmem:[#allocation3 + $0xc0] sm:$0xff] %v3521_v11  ;;  %v1609_v58 = vmax.f32 %v1513_v17, %v1561_v13  ;;  %v1516_v50 = vmax.f32 %v1324_v46, %v1468_v37  ;;  %v1327_v51 = vmax.f32 %v1231_v18, %v1279_v34  ;;  %v1471_v19 = vmax.f32 %v1375_v59, %v1423_v14 }
  0xb6   : > { %1651 = vst [vmem:[#allocation3 + $0xb8] sm:$0xf] %v1603_v60  ;;  %v1378_v22 = vld [vmem:[#allocation2 + $0x160] sm:$0xf]  ;;  %v1426_v49 = vld [vmem:[#allocation2 + $0x178] sm:$0xf]  ;;  %v3530_v20 = vmax.f32 %v1514_v16, %v1562_v43  ;;  %v1517_v23 = vmax.f32 %v3511_v3, %v1469_v2  ;;  %v1472_v62 = vmax.f32 %v1562_v43, %v1565_v39  ;;  %v1330_v54 = vmax.f32 %v1234_v61, %v1282_v26 }
  0xb7   : > { %v1237_v55 = vld [vmem:[#allocation2 + $0x148] sm:$0xf]  ;;  %v1285_v8 = vld [vmem:[#allocation2 + $0x160] sm:$0xf]  ;;  %v1381_v24 = vld [vmem:[#allocation2 + $0x178] sm:$0xf]  ;;  %v1519_v10 = vmax.f32 %v1327_v51, %v1471_v19  ;;  %v1474_v41 = vmax.f32 %v1378_v22, %v1426_v49  ;;  %v1475_v56 = vmax.f32 %v1565_v39, %v3523_v44  ;;  %v1478_v17 = vmax.f32 %v3523_v44, %v1571_v53 }
  0xb8   : > { %v1429_v45 = vld [vmem:[#allocation2 + $0x190] sm:$0xf]  ;;  %1654 = vst [vmem:[#allocation3 + $0xd0] sm:$0xf] %v1606_v30  ;;  %1655 = vst [vmem:[#allocation3 + $0xd8] sm:$0xff] %v3525_v36  ;;  %v3535_v18 = vmax.f32 %v1517_v23, %v1565_v39  ;;  %v1520_v3 = vmax.f32 %v3518_v6, %v1472_v62  ;;  %v1333_v1 = vmax.f32 %v1237_v55, %v1285_v8  ;;  %v1708_v22 = vld [vmem:[#allocation3 + $0x1] sm:$0xff] }
  0xb9   : > { %v1564_v40 = vld [vmem:[#allocation2 + $0x160] sm:$0xf]  ;;  %1657 = vst [vmem:[#allocation3 + $0xe8] sm:$0xf] %v1609_v58  ;;  %v1288_v63 = vld [vmem:[#allocation2 + $0x178] sm:$0xf]  ;;  %v1477_v48 = vmax.f32 %v1381_v24, %v1429_v45  ;;  %v1522_v34 = vmax.f32 %v1330_v54, %v1474_v41  ;;  %v1523_v59 = vmax.f32 %v1469_v2, %v1475_v56  ;;  %v1526_v58 = vmax.f32 %v1472_v62, %v1478_v17 }
  0xba   : > { %v1240_v35 = vld [vmem:[#allocation2 + $0x160] sm:$0xf]  ;;  %v1612_v33 = vmax.f32 %v1516_v50, %v1564_v40  ;;  %v1384_v0 = vld [vmem:[#allocation2 + $0x190] sm:$0xf]  ;;  %v1432_v7 = vld [vmem:[#allocation2 + $0x1a8] sm:$0xf]  ;;  %v3541_v39 = vmax.f32 %v1520_v3, %v3523_v44 }
  0xbb   : > { %1658 = vst [vmem:[#allocation3 + $0xf0] sm:$0xff] %v3530_v20  ;;  %v1567_v60 = vld [vmem:[#allocation2 + $0x178] sm:$0xf]  ;;  %v1570_v43 = vld [vmem:[#allocation2 + $0x190] sm:$0xf]  ;;  %1661 = vst [vmem:[#allocation3 + $0x108] sm:$0xff] %v3535_v18  ;;  %v1525_v26 = vmax.f32 %v1333_v1, %v1477_v48  ;;  %v1336_v30 = vmax.f32 %v1240_v35, %v1288_v63  ;;  %v1480_v16 = vmax.f32 %v1384_v0, %v1432_v7 }
  0xbc   : > { %1660 = vst [vmem:[#allocation3 + $0x100] sm:$0xf] %v1612_v33  ;;  %v1615_v13 = vmax.f32 %v1519_v10, %v1567_v60  ;;  %v1573_v14 = vld [vmem:[#allocation2 + $0x1a8] sm:$0xf]  ;;  %v1243_v46 = vld [vmem:[#allocation2 + $0x178] sm:$0xf]  ;;  %v1618_v55 = vmax.f32 %v1522_v34, %v1570_v43  ;;  %v3543_v2 = vmax.f32 %v1523_v59, %v1571_v53 }
  0xbd   : > { %v1291_v37 = vld [vmem:[#allocation2 + $0x190] sm:$0xf]  ;;  %v1387_v61 = vld [vmem:[#allocation2 + $0x1a8] sm:$0xf]  ;;  %v1576_v50 = vld [vmem:[#allocation2 + $0x1c0] sm:$0xf]  ;;  %v1621_v44 = vmax.f32 %v1525_v26, %v1573_v14  ;;  %v1528_v45 = vmax.f32 %v1336_v30, %v1480_v16 }
  0xbe   : > { %v1574_v6 = vld [vmem:[#allocation2 + $0x1b0] sm:$0xff]  ;;  %v1772_v49 = vld [vmem:[#allocation3 + $0x2] sm:$0xff]  ;;  %1663 = vst [vmem:[#allocation3 + $0x118] sm:$0xf] %v1615_v13  ;;  %1664 = vst [vmem:[#allocation3 + $0x120] sm:$0xff] %v3541_v39  ;;  %v1339_v23 = vmax.f32 %v1243_v46, %v1291_v37 }
  0xbf   : > { %v1481_v51 = vmax.f32 %v1571_v53, %v1574_v6  ;;  %v1435_v19 = vld [vmem:[#allocation2 + $0x1c0] sm:$0xf]  ;;  %v1709_v24 = vld [vmem:[#allocation3 + $0x9] sm:$0xff]  ;;  %1666 = vst [vmem:[#allocation3 + $0x130] sm:$0xf] %v1618_v55  ;;  %1667 = vst [vmem:[#allocation3 + $0x138] sm:$0xff] %v3543_v2  ;;  %v3547_v10 = vmax.f32 %v1526_v58, %v1574_v6  ;;  %v1740_v53 = vmax.f32 %v3479_v38, %v1708_v22 }
  0xc0   : > { %v1804_v8 = vld [vmem:[#allocation3 + $0x3] sm:$0xff]  ;;  %v1483_v54 = vmax.f32 %v1387_v61, %v1435_v19  ;;  %v1805_v33 = vld [vmem:[#allocation3 + $0xb] sm:$0xff]  ;;  %v1579_v41 = vld [vmem:[#allocation2 + $0x1d8] sm:$0xf]  ;;  %1669 = vst [vmem:[#allocation3 + $0x148] sm:$0xf] %v1621_v44  ;;  %v1624_v3 = vmax.f32 %v1528_v45, %v1576_v50  ;;  %v1741_v48 = vmax.f32 %v3439_v12, %v1709_v24 }
  0xc1   : > { %v1577_v40 = vld [vmem:[#allocation2 + $0x1c8] sm:$0xff]  ;;  %v1529_v62 = vmax.f32 %v1475_v56, %v1481_v51  ;;  %v1836_v63 = vmax.f32 %v1772_v49, %v1804_v8  ;;  %v1710_v0 = vld [vmem:[#allocation3 + $0x19] sm:$0xff]  ;;  %1670 = vst [vmem:[#allocation3 + $0x150] sm:$0xff] %v3547_v10  ;;  %v1712_v61 = vld [vmem:[#allocation3 + $0x31] sm:$0xff] }
  0xc2   : > { %v1773_v35 = vld [vmem:[#allocation3 + $0xa] sm:$0xff]  ;;  %v1774_v7 = vld [vmem:[#allocation3 + $0x1a] sm:$0xff]  ;;  %v1531_v43 = vmax.f32 %v1339_v23, %v1483_v54  ;;  %v1775_v59 = vld [vmem:[#allocation3 + $0x22] sm:$0xff]  ;;  %v1742_v17 = vmax.f32 %v3481_v25, %v1710_v0  ;;  %1672 = vst [vmem:[#allocation3 + $0x160] sm:$0xf] %v1624_v3  ;;  %v1744_v58 = vmax.f32 %v3488_v52, %v1712_v61 }
  0xc3   : > { %v1806_v60 = vld [vmem:[#allocation3 + $0x1b] sm:$0xff]  ;;  %v1900_v1 = vld [vmem:[#allocation3 + $0x4] sm:$0xff]  ;;  %v1837_v13 = vmax.f32 %v1773_v35, %v1805_v33  ;;  %v3552_v56 = vmax.f32 %v1529_v62, %v1577_v40  ;;  %v1868_v14 = vmax.f32 %v1740_v53, %v1836_v63  ;;  %v1901_v38 = vld [vmem:[#allocation3 + $0xc] sm:$0xff] }
  0xc4   : > { %v1711_v34 = vld [vmem:[#allocation3 + $0x21] sm:$0xff]  ;;  %v1838_v46 = vmax.f32 %v1774_v7, %v1806_v60  ;;  %v1627_v26 = vmax.f32 %v1531_v43, %v1579_v41  ;;  %v1776_v22 = vld [vmem:[#allocation3 + $0x32] sm:$0xff]  ;;  %v1714_v23 = vld [vmem:[#allocation3 + $0x49] sm:$0xff] }
  0xc5   : > { %v1807_v37 = vld [vmem:[#allocation3 + $0x23] sm:$0xff]  ;;  %v1869_v12 = vmax.f32 %v1741_v48, %v1837_v13  ;;  %v1743_v30 = vmax.f32 %v3446_v31, %v1711_v34  ;;  %v1808_v49 = vld [vmem:[#allocation3 + $0x33] sm:$0xff]  ;;  %1673 = vst [vmem:[#allocation3 + $0x168] sm:$0xff] %v3552_v56  ;;  %v1932_v25 = vmax.f32 %v1868_v14, %v1900_v1  ;;  %v1809_v8 = vld [vmem:[#allocation3 + $0x3b] sm:$0xff]  ;;  %v1746_v62 = vmax.f32 %v3494_v47, %v1714_v23 }
  0xc6   : > { %v1902_v6 = vld [vmem:[#allocation3 + $0x1c] sm:$0xff]  ;;  %v1839_v16 = vmax.f32 %v1775_v59, %v1807_v37  ;;  %v1870_v55 = vmax.f32 %v1742_v17, %v1838_v46  ;;  %v1840_v50 = vmax.f32 %v1776_v22, %v1808_v49  ;;  %1675 = vst [vmem:[#allocation3 + $0x178] sm:$0xf] %v1627_v26  ;;  %v1903_v45 = vld [vmem:[#allocation3 + $0x24] sm:$0xff]  ;;  %v1904_v52 = vld [vmem:[#allocation3 + $0x34] sm:$0xff] }
  0xc7   : > { %v1713_v51 = vld [vmem:[#allocation3 + $0x39] sm:$0xff]  ;;  %v1933_v24 = vmax.f32 %v1869_v12, %v1901_v38  ;;  %v1778_v54 = vld [vmem:[#allocation3 + $0x4a] sm:$0xff]  ;;  %1964 = vst [vmem:[%s3559_s25] sm:$0xff] %v1932_v25  ;;  %1996 = vst [vmem:[#allocation2 + $0x32] sm:$0xff] %v1932_v25 }
  0xc8   : > { %v1777_v19 = vld [vmem:[#allocation3 + $0x3a] sm:$0xff]  ;;  %v1871_v44 = vmax.f32 %v1743_v30, %v1839_v16  ;;  %v1745_v31 = vmax.f32 %v3448_v21, %v1713_v51  ;;  %v1934_v35 = vmax.f32 %v1870_v55, %v1902_v6  ;;  %v1872_v33 = vmax.f32 %v1744_v58, %v1840_v50  ;;  %v1810_v41 = vld [vmem:[#allocation3 + $0x4b] sm:$0xff]  ;;  %v1780_v47 = vld [vmem:[#allocation3 + $0x62] sm:$0xff] }
  0xc9   : > { %v1841_v40 = vmax.f32 %v1777_v19, %v1809_v8  ;;  %v1715_v53 = vld [vmem:[#allocation3 + $0x51] sm:$0xff]  ;;  %1965 = vst [vmem:[%s3559_s25 + $0x8] sm:$0xff] %v1933_v24  ;;  %1997 = vst [vmem:[#allocation2 + $0x3a] sm:$0xff] %v1933_v24  ;;  %v1905_v7 = vld [vmem:[#allocation3 + $0x3c] sm:$0xff]  ;;  %v1842_v21 = vmax.f32 %v1778_v54, %v1810_v41 }
  0xca   : > { %v1935_v63 = vmax.f32 %v1871_v44, %v1903_v45  ;;  %v1747_v60 = vmax.f32 %v3450_v27, %v1715_v53  ;;  %v1779_v3 = vld [vmem:[#allocation3 + $0x52] sm:$0xff]  ;;  %1966 = vst [vmem:[%s3559_s25 + $0x10] sm:$0xff] %v1934_v35  ;;  %1998 = vst [vmem:[#allocation2 + $0x4a] sm:$0xff] %v1934_v35  ;;  %v1936_v1 = vmax.f32 %v1872_v33, %v1904_v52  ;;  %v1716_v13 = vld [vmem:[#allocation3 + $0x61] sm:$0xff] }
  0xcb   : > { %v1873_v0 = vmax.f32 %v1745_v31, %v1841_v40  ;;  %v1811_v43 = vld [vmem:[#allocation3 + $0x53] sm:$0xff]  ;;  %v1812_v34 = vld [vmem:[#allocation3 + $0x63] sm:$0xff]  ;;  %v1874_v14 = vmax.f32 %v1746_v62, %v1842_v21  ;;  %v1748_v17 = vmax.f32 %v3501_v57, %v1716_v13  ;;  %v1813_v6 = vld [vmem:[#allocation3 + $0x6b] sm:$0xff] }
  0xcc   : > { %v1843_v48 = vmax.f32 %v1779_v3, %v1811_v43  ;;  %1967 = vst [vmem:[%s3559_s25 + $0x18] sm:$0xff] %v1935_v63  ;;  %1999 = vst [vmem:[#allocation2 + $0x52] sm:$0xff] %v1935_v63  ;;  %v1906_v38 = vld [vmem:[#allocation3 + $0x4c] sm:$0xff]  ;;  %v1844_v46 = vmax.f32 %v1780_v47, %v1812_v34  ;;  %v1907_v26 = vld [vmem:[#allocation3 + $0x54] sm:$0xff] }
  0xcd   : > { %v1937_v59 = vmax.f32 %v1873_v0, %v1905_v7  ;;  %v1717_v27 = vld [vmem:[#allocation3 + $0x69] sm:$0xff]  ;;  %1968 = vst [vmem:[%s3559_s25 + $0x20] sm:$0xff] %v1936_v1  ;;  %2000 = vst [vmem:[#allocation2 + $0x62] sm:$0xff] %v1936_v1  ;;  %v1718_v30 = vld [vmem:[#allocation3 + $0x79] sm:$0xff]  ;;  %v1938_v16 = vmax.f32 %v1874_v14, %v1906_v38 }
  0xce   : > { %v1781_v37 = vld [vmem:[#allocation3 + $0x6a] sm:$0xff]  ;;  %v1875_v61 = vmax.f32 %v1747_v60, %v1843_v48  ;;  %v1749_v12 = vmax.f32 %v3452_v28, %v1717_v27  ;;  %v1876_v22 = vmax.f32 %v1748_v17, %v1844_v46  ;;  %v1750_v57 = vmax.f32 %v3503_v5, %v1718_v30  ;;  %v1782_v55 = vld [vmem:[#allocation3 + $0x7a] sm:$0xff]  ;;  %v1783_v8 = vld [vmem:[#allocation3 + $0x82] sm:$0xff] }
  0xcf   : > { %1969 = vst [vmem:[%s3559_s25 + $0x28] sm:$0xff] %v1937_v59  ;;  %2001 = vst [vmem:[#allocation2 + $0x6a] sm:$0xff] %v1937_v59  ;;  %v1908_v49 = vld [vmem:[#allocation3 + $0x64] sm:$0xff]  ;;  %v1845_v25 = vmax.f32 %v1781_v37, %v1813_v6  ;;  %v1814_v58 = vld [vmem:[#allocation3 + $0x7b] sm:$0xff] }
  0xd0   : > { %v1939_v50 = vmax.f32 %v1875_v61, %v1907_v26  ;;  %v1846_v51 = vmax.f32 %v1782_v55, %v1814_v58  ;;  %v1719_v19 = vld [vmem:[#allocation3 + $0x81] sm:$0xff]  ;;  %1970 = vst [vmem:[%s3559_s25 + $0x30] sm:$0xff] %v1938_v16  ;;  %2002 = vst [vmem:[#allocation2 + $0x7a] sm:$0xff] %v1938_v16  ;;  %v1940_v28 = vmax.f32 %v1876_v22, %v1908_v49  ;;  %v1909_v45 = vld [vmem:[#allocation3 + $0x6c] sm:$0xff] }
  0xd1   : > { %v1815_v24 = vld [vmem:[#allocation3 + $0x83] sm:$0xff]  ;;  %v1877_v44 = vmax.f32 %v1749_v12, %v1845_v25  ;;  %v1751_v31 = vmax.f32 %v3454_v29, %v1719_v19  ;;  %v1720_v23 = vld [vmem:[#allocation3 + $0x91] sm:$0xff]  ;;  %v1721_v62 = vld [vmem:[#allocation3 + $0x99] sm:$0xff] }
  0xd2   : > { %v1847_v40 = vmax.f32 %v1783_v8, %v1815_v24  ;;  %v1784_v54 = vld [vmem:[#allocation3 + $0x92] sm:$0xff]  ;;  %1971 = vst [vmem:[%s3559_s25 + $0x38] sm:$0xff] %v1939_v50  ;;  %2003 = vst [vmem:[#allocation2 + $0x82] sm:$0xff] %v1939_v50  ;;  %v1878_v5 = vmax.f32 %v1750_v57, %v1846_v51  ;;  %v1910_v35 = vld [vmem:[#allocation3 + $0x7c] sm:$0xff]  ;;  %v1752_v33 = vmax.f32 %v3508_v15, %v1720_v23 }
  0xd3   : > { %v1816_v52 = vld [vmem:[#allocation3 + $0x93] sm:$0xff]  ;;  %1972 = vst [vmem:[%s3559_s25 + $0x40] sm:$0xff] %v1940_v28  ;;  %2004 = vst [vmem:[#allocation2 + $0x92] sm:$0xff] %v1940_v28  ;;  %v1941_v41 = vmax.f32 %v1877_v44, %v1909_v45  ;;  %v1911_v63 = vld [vmem:[#allocation3 + $0x84] sm:$0xff]  ;;  %v1753_v29 = vmax.f32 %v3456_v9, %v1721_v62 }
  0xd4   : > { %v1879_v53 = vmax.f32 %v1751_v31, %v1847_v40  ;;  %v1848_v0 = vmax.f32 %v1784_v54, %v1816_v52  ;;  %v1785_v7 = vld [vmem:[#allocation3 + $0x9a] sm:$0xff]  ;;  %v1942_v60 = vmax.f32 %v1878_v5, %v1910_v35  ;;  %v1722_v43 = vld [vmem:[#allocation3 + $0xa9] sm:$0xff]  ;;  %v1723_v14 = vld [vmem:[#allocation3 + $0xb1] sm:$0xff] }
  0xd5   : > { %v1817_v21 = vld [vmem:[#allocation3 + $0x9b] sm:$0xff]  ;;  %v1786_v1 = vld [vmem:[#allocation3 + $0xaa] sm:$0xff]  ;;  %1973 = vst [vmem:[%s3559_s25 + $0x48] sm:$0xff] %v1941_v41  ;;  %2005 = vst [vmem:[#allocation2 + $0x9a] sm:$0xff] %v1941_v41  ;;  %v1754_v34 = vmax.f32 %v3514_v4, %v1722_v43  ;;  %v1755_v46 = vmax.f32 %v3460_v42, %v1723_v14 }
  0xd6   : > { %v1849_v3 = vmax.f32 %v1785_v7, %v1817_v21  ;;  %v1818_v48 = vld [vmem:[#allocation3 + $0xab] sm:$0xff]  ;;  %v1943_v15 = vmax.f32 %v1879_v53, %v1911_v63  ;;  %v1880_v13 = vmax.f32 %v1752_v33, %v1848_v0  ;;  %v1912_v47 = vld [vmem:[#allocation3 + $0x94] sm:$0xff]  ;;  %1974 = vst [vmem:[%s3559_s25 + $0x50] sm:$0xff] %v1942_v60  ;;  %2006 = vst [vmem:[#allocation2 + $0xaa] sm:$0xff] %v1942_v60 }
  0xd7   : > { %v1850_v59 = vmax.f32 %v1786_v1, %v1818_v48  ;;  %v1787_v38 = vld [vmem:[#allocation3 + $0xb2] sm:$0xff]  ;;  %v1913_v17 = vld [vmem:[#allocation3 + $0x9c] sm:$0xff]  ;;  %v1693_v25 = vld [vmem:[#allocation3 + $0xc8] sm:$0xff] }
  0xd8   : > { %v1881_v9 = vmax.f32 %v1753_v29, %v1849_v3  ;;  %v1819_v27 = vld [vmem:[#allocation3 + $0xb3] sm:$0xff]  ;;  %v1724_v37 = vld [vmem:[#allocation3 + $0xc1] sm:$0xff]  ;;  %1975 = vst [vmem:[%s3559_s25 + $0x58] sm:$0xff] %v1943_v15  ;;  %2007 = vst [vmem:[#allocation2 + $0xb2] sm:$0xff] %v1943_v15  ;;  %v1944_v61 = vmax.f32 %v1880_v13, %v1912_v47 }
  0xd9   : > { %v1882_v26 = vmax.f32 %v1754_v34, %v1850_v59  ;;  %v1914_v12 = vld [vmem:[#allocation3 + $0xac] sm:$0xff]  ;;  %v1851_v6 = vmax.f32 %v1787_v38, %v1819_v27  ;;  %v1756_v4 = vmax.f32 %v3521_v11, %v1724_v37  ;;  %v1788_v30 = vld [vmem:[#allocation3 + $0xc2] sm:$0xff]  ;;  %v1915_v50 = vld [vmem:[#allocation3 + $0xb4] sm:$0xff] }
  0xda   : > { %v1820_v16 = vld [vmem:[#allocation3 + $0xc3] sm:$0xff]  ;;  %v1945_v22 = vmax.f32 %v1881_v9, %v1913_v17  ;;  %1976 = vst [vmem:[%s3559_s25 + $0x60] sm:$0xff] %v1944_v61  ;;  %2008 = vst [vmem:[#allocation2 + $0xc2] sm:$0xff] %v1944_v61  ;;  %v1821_v19 = vld [vmem:[#allocation3 + $0xcb] sm:$0xff] }
  0xdb   : > { %v1852_v49 = vmax.f32 %v1788_v30, %v1820_v16  ;;  %v1725_v57 = vld [vmem:[#allocation3 + $0xc9] sm:$0xff]  ;;  %v1946_v42 = vmax.f32 %v1882_v26, %v1914_v12  ;;  %v1883_v58 = vmax.f32 %v1755_v46, %v1851_v6  ;;  %v1726_v8 = vld [vmem:[#allocation3 + $0xd9] sm:$0xff]  ;;  %v1727_v5 = vld [vmem:[#allocation3 + $0xe1] sm:$0xff] }
  0xdc   : > { %v1789_v55 = vld [vmem:[#allocation3 + $0xca] sm:$0xff]  ;;  %v1757_v51 = vmax.f32 %v1693_v25, %v1725_v57  ;;  %1977 = vst [vmem:[%s3559_s25 + $0x68] sm:$0xff] %v1945_v22  ;;  %2009 = vst [vmem:[#allocation2 + $0xca] sm:$0xff] %v1945_v22  ;;  %v1758_v44 = vmax.f32 %v3525_v36, %v1726_v8  ;;  %v1790_v45 = vld [vmem:[#allocation3 + $0xda] sm:$0xff] }
  0xdd   : > { %v1884_v11 = vmax.f32 %v1756_v4, %v1852_v49  ;;  %v1916_v24 = vld [vmem:[#allocation3 + $0xc4] sm:$0xff]  ;;  %v1853_v28 = vmax.f32 %v1789_v55, %v1821_v19  ;;  %v1822_v31 = vld [vmem:[#allocation3 + $0xdb] sm:$0xff]  ;;  %1978 = vst [vmem:[%s3559_s25 + $0x70] sm:$0xff] %v1946_v42  ;;  %2010 = vst [vmem:[#allocation2 + $0xda] sm:$0xff] %v1946_v42  ;;  %v1947_v40 = vmax.f32 %v1883_v58, %v1915_v50 }
  0xde   : > { %v1854_v23 = vmax.f32 %v1790_v45, %v1822_v31  ;;  %v1695_v54 = vld [vmem:[#allocation3 + $0xe0] sm:$0xff]  ;;  %v1917_v62 = vld [vmem:[#allocation3 + $0xcc] sm:$0xff]  ;;  %v1697_v1 = vld [vmem:[#allocation3 + $0xf8] sm:$0xff] }
  0xdf   : > { %v1791_v35 = vld [vmem:[#allocation3 + $0xe2] sm:$0xff]  ;;  %v1948_v33 = vmax.f32 %v1884_v11, %v1916_v24  ;;  %v1885_v52 = vmax.f32 %v1757_v51, %v1853_v28  ;;  %v1759_v41 = vmax.f32 %v1695_v54, %v1727_v5  ;;  %v1728_v63 = vld [vmem:[#allocation3 + $0xf1] sm:$0xff]  ;;  %1979 = vst [vmem:[%s3559_s25 + $0x78] sm:$0xff] %v1947_v40  ;;  %2011 = vst [vmem:[#allocation2 + $0xe2] sm:$0xff] %v1947_v40 }
  0xe0   : > { %v1823_v53 = vld [vmem:[#allocation3 + $0xe3] sm:$0xff]  ;;  %v1886_v36 = vmax.f32 %v1758_v44, %v1854_v23  ;;  %v1760_v7 = vmax.f32 %v3530_v20, %v1728_v63  ;;  %v1792_v21 = vld [vmem:[#allocation3 + $0xf2] sm:$0xff]  ;;  %v1793_v15 = vld [vmem:[#allocation3 + $0xfa] sm:$0xff] }
  0xe1   : > { %v1918_v0 = vld [vmem:[#allocation3 + $0xdc] sm:$0xff]  ;;  %v1855_v29 = vmax.f32 %v1791_v35, %v1823_v53  ;;  %v1824_v60 = vld [vmem:[#allocation3 + $0xf3] sm:$0xff]  ;;  %1980 = vst [vmem:[%s3559_s25 + $0x80] sm:$0xff] %v1948_v33  ;;  %2012 = vst [vmem:[#allocation2 + $0xf2] sm:$0xff] %v1948_v33  ;;  %v1949_v3 = vmax.f32 %v1885_v52, %v1917_v62 }
  0xe2   : > { %v1856_v43 = vmax.f32 %v1792_v21, %v1824_v60  ;;  %v1729_v48 = vld [vmem:[#allocation3 + $0xf9] sm:$0xff]  ;;  %v1950_v13 = vmax.f32 %v1886_v36, %v1918_v0  ;;  %v1919_v34 = vld [vmem:[#allocation3 + $0xe4] sm:$0xff]  ;;  %v1699_v12 = vld [vmem:[#allocation3 + $0x110] sm:$0xff] }
  0xe3   : > { %v1887_v47 = vmax.f32 %v1759_v41, %v1855_v29  ;;  %v1761_v59 = vmax.f32 %v1697_v1, %v1729_v48  ;;  %v1825_v14 = vld [vmem:[#allocation3 + $0xfb] sm:$0xff]  ;;  %v1730_v38 = vld [vmem:[#allocation3 + $0x109] sm:$0xff]  ;;  %1981 = vst [vmem:[%s3559_s25 + $0x88] sm:$0xff] %v1949_v3  ;;  %2013 = vst [vmem:[#allocation2 + $0xfa] sm:$0xff] %v1949_v3 }
  0xe4   : > { %v1888_v20 = vmax.f32 %v1760_v7, %v1856_v43  ;;  %v1920_v9 = vld [vmem:[#allocation3 + $0xf4] sm:$0xff]  ;;  %v1857_v17 = vmax.f32 %v1793_v15, %v1825_v14  ;;  %v1762_v46 = vmax.f32 %v3535_v18, %v1730_v38  ;;  %v1794_v27 = vld [vmem:[#allocation3 + $0x10a] sm:$0xff]  ;;  %1982 = vst [vmem:[%s3559_s25 + $0x90] sm:$0xff] %v1950_v13  ;;  %2014 = vst [vmem:[#allocation2 + $0x10a] sm:$0xff] %v1950_v13 }
  0xe5   : > { %v1826_v37 = vld [vmem:[#allocation3 + $0x10b] sm:$0xff]  ;;  %v1951_v61 = vmax.f32 %v1887_v47, %v1919_v34  ;;  %v1921_v22 = vld [vmem:[#allocation3 + $0xfc] sm:$0xff]  ;;  %v1827_v25 = vld [vmem:[#allocation3 + $0x113] sm:$0xff] }
  0xe6   : > { %v1858_v26 = vmax.f32 %v1794_v27, %v1826_v37  ;;  %v1731_v6 = vld [vmem:[#allocation3 + $0x111] sm:$0xff]  ;;  %v1952_v30 = vmax.f32 %v1888_v20, %v1920_v9  ;;  %v1889_v16 = vmax.f32 %v1761_v59, %v1857_v17  ;;  %v1732_v57 = vld [vmem:[#allocation3 + $0x121] sm:$0xff]  ;;  %v1733_v24 = vld [vmem:[#allocation3 + $0x129] sm:$0xff] }
  0xe7   : > { %v1795_v4 = vld [vmem:[#allocation3 + $0x112] sm:$0xff]  ;;  %v1763_v49 = vmax.f32 %v1699_v12, %v1731_v6  ;;  %1983 = vst [vmem:[%s3559_s25 + $0x98] sm:$0xff] %v1951_v61  ;;  %2015 = vst [vmem:[#allocation2 + $0x112] sm:$0xff] %v1951_v61  ;;  %v1764_v58 = vmax.f32 %v3541_v39, %v1732_v57  ;;  %v1796_v50 = vld [vmem:[#allocation3 + $0x122] sm:$0xff] }
  0xe8   : > { %v1890_v18 = vmax.f32 %v1762_v46, %v1858_v26  ;;  %v1922_v55 = vld [vmem:[#allocation3 + $0x10c] sm:$0xff]  ;;  %v1859_v42 = vmax.f32 %v1795_v4, %v1827_v25  ;;  %v1828_v51 = vld [vmem:[#allocation3 + $0x123] sm:$0xff]  ;;  %1984 = vst [vmem:[%s3559_s25 + $0xa0] sm:$0xff] %v1952_v30  ;;  %2016 = vst [vmem:[#allocation2 + $0x122] sm:$0xff] %v1952_v30  ;;  %v1953_v19 = vmax.f32 %v1889_v16, %v1921_v22 }
  0xe9   : > { %v1860_v8 = vmax.f32 %v1796_v50, %v1828_v51  ;;  %v1701_v11 = vld [vmem:[#allocation3 + $0x128] sm:$0xff]  ;;  %v1923_v31 = vld [vmem:[#allocation3 + $0x114] sm:$0xff]  ;;  %v1703_v63 = vld [vmem:[#allocation3 + $0x140] sm:$0xff] }
  0xea   : > { %v1797_v28 = vld [vmem:[#allocation3 + $0x12a] sm:$0xff]  ;;  %v1954_v44 = vmax.f32 %v1890_v18, %v1922_v55  ;;  %v1891_v45 = vmax.f32 %v1763_v49, %v1859_v42  ;;  %v1765_v40 = vmax.f32 %v1701_v11, %v1733_v24  ;;  %v1734_v54 = vld [vmem:[#allocation3 + $0x139] sm:$0xff]  ;;  %1985 = vst [vmem:[%s3559_s25 + $0xa8] sm:$0xff] %v1953_v19  ;;  %2017 = vst [vmem:[#allocation2 + $0x12a] sm:$0xff] %v1953_v19 }
  0xeb   : > { %v1829_v23 = vld [vmem:[#allocation3 + $0x12b] sm:$0xff]  ;;  %v1892_v39 = vmax.f32 %v1764_v58, %v1860_v8  ;;  %v1766_v33 = vmax.f32 %v3543_v2, %v1734_v54  ;;  %v1798_v52 = vld [vmem:[#allocation3 + $0x13a] sm:$0xff]  ;;  %v1799_v0 = vld [vmem:[#allocation3 + $0x142] sm:$0xff] }
  0xec   : > { %v1924_v5 = vld [vmem:[#allocation3 + $0x124] sm:$0xff]  ;;  %v1861_v35 = vmax.f32 %v1797_v28, %v1829_v23  ;;  %v1830_v62 = vld [vmem:[#allocation3 + $0x13b] sm:$0xff]  ;;  %1986 = vst [vmem:[%s3559_s25 + $0xb0] sm:$0xff] %v1954_v44  ;;  %2018 = vst [vmem:[#allocation2 + $0x13a] sm:$0xff] %v1954_v44  ;;  %v1955_v41 = vmax.f32 %v1891_v45, %v1923_v31 }
  0xed   : > { %v1862_v53 = vmax.f32 %v1798_v52, %v1830_v62  ;;  %v1735_v36 = vld [vmem:[#allocation3 + $0x141] sm:$0xff]  ;;  %v1956_v29 = vmax.f32 %v1892_v39, %v1924_v5  ;;  %v1925_v21 = vld [vmem:[#allocation3 + $0x12c] sm:$0xff]  ;;  %v1705_v14 = vld [vmem:[#allocation3 + $0x158] sm:$0xff] }
  0xee   : > { %v1893_v7 = vmax.f32 %v1765_v40, %v1861_v35  ;;  %v1767_v60 = vmax.f32 %v1703_v63, %v1735_v36  ;;  %v1831_v3 = vld [vmem:[#allocation3 + $0x143] sm:$0xff]  ;;  %v1736_v43 = vld [vmem:[#allocation3 + $0x151] sm:$0xff]  ;;  %1987 = vst [vmem:[%s3559_s25 + $0xb8] sm:$0xff] %v1955_v41  ;;  %2019 = vst [vmem:[#allocation2 + $0x142] sm:$0xff] %v1955_v41 }
  0xef   : > { %v1894_v2 = vmax.f32 %v1766_v33, %v1862_v53  ;;  %v1926_v1 = vld [vmem:[#allocation3 + $0x13c] sm:$0xff]  ;;  %v1863_v48 = vmax.f32 %v1799_v0, %v1831_v3  ;;  %v1768_v15 = vmax.f32 %v3547_v10, %v1736_v43  ;;  %v1800_v13 = vld [vmem:[#allocation3 + $0x152] sm:$0xff]  ;;  %1988 = vst [vmem:[%s3559_s25 + $0xc0] sm:$0xff] %v1956_v29  ;;  %2020 = vst [vmem:[#allocation2 + $0x152] sm:$0xff] %v1956_v29 }
  0xf0   : > { %v1832_v47 = vld [vmem:[#allocation3 + $0x153] sm:$0xff]  ;;  %v1957_v34 = vmax.f32 %v1893_v7, %v1925_v21  ;;  %v1927_v46 = vld [vmem:[#allocation3 + $0x144] sm:$0xff]  ;;  %v1833_v37 = vld [vmem:[#allocation3 + $0x15b] sm:$0xff] }
  0xf1   : > { %v1864_v59 = vmax.f32 %v1800_v13, %v1832_v47  ;;  %v1737_v38 = vld [vmem:[#allocation3 + $0x159] sm:$0xff]  ;;  %v1958_v9 = vmax.f32 %v1894_v2, %v1926_v1  ;;  %v1895_v17 = vmax.f32 %v1767_v60, %v1863_v48  ;;  %v1738_v61 = vld [vmem:[#allocation3 + $0x169] sm:$0xff]  ;;  %v1739_v57 = vld [vmem:[#allocation3 + $0x171] sm:$0xff] }
  0xf2   : > { %v1801_v20 = vld [vmem:[#allocation3 + $0x15a] sm:$0xff]  ;;  %v1769_v27 = vmax.f32 %v1705_v14, %v1737_v38  ;;  %1989 = vst [vmem:[%s3559_s25 + $0xc8] sm:$0xff] %v1957_v34  ;;  %2021 = vst [vmem:[#allocation2 + $0x15a] sm:$0xff] %v1957_v34  ;;  %v1770_v6 = vmax.f32 %v3552_v56, %v1738_v61  ;;  %v1802_v4 = vld [vmem:[#allocation3 + $0x16a] sm:$0xff] }
  0xf3   : > { %v1896_v10 = vmax.f32 %v1768_v15, %v1864_v59  ;;  %v1928_v26 = vld [vmem:[#allocation3 + $0x154] sm:$0xff]  ;;  %v1865_v12 = vmax.f32 %v1801_v20, %v1833_v37  ;;  %v1834_v30 = vld [vmem:[#allocation3 + $0x16b] sm:$0xff]  ;;  %1990 = vst [vmem:[%s3559_s25 + $0xd0] sm:$0xff] %v1958_v9  ;;  %2022 = vst [vmem:[#allocation2 + $0x16a] sm:$0xff] %v1958_v9  ;;  %v1959_v22 = vmax.f32 %v1895_v17, %v1927_v46 }
  0xf4   : > { %v3609_v16 = vld [vmem:[#allocation2 + $0x10] sm:$0xf]  ;;  %v1866_v49 = vmax.f32 %v1802_v4, %v1834_v30  ;;  %v3612_v55 = vld [vmem:[#allocation2 + $0x28] sm:$0xf]  ;;  %v1929_v19 = vld [vmem:[#allocation3 + $0x15c] sm:$0xff] }
  0xf5   : > { %4455 = vst [vmem:[#allocation4_spill] sm:$0xff] %v3609_v16  ;;  %v1707_v25 = vld [vmem:[#allocation3 + $0x170] sm:$0xff]  ;;  %4456 = vst [vmem:[#allocation5_spill] sm:$0xff] %v3612_v55  ;;  %v1960_v42 = vmax.f32 %v1896_v10, %v1928_v26  ;;  %v1897_v58 = vmax.f32 %v1769_v27, %v1865_v12  ;;  %v2035_v24 = vld [vmem:[#allocation2 + $0x38] sm:$0xff] }
  0xf6   : > { %v1803_v18 = vld [vmem:[#allocation3 + $0x172] sm:$0xff]  ;;  %v1771_v50 = vmax.f32 %v1707_v25, %v1739_v57  ;;  %1991 = vst [vmem:[%s3559_s25 + $0xd8] sm:$0xff] %v1959_v22  ;;  %2023 = vst [vmem:[#allocation2 + $0x172] sm:$0xff] %v1959_v22  ;;  %v1898_v8 = vmax.f32 %v1770_v6, %v1866_v49  ;;  %v2037_v28 = vld [vmem:[#allocation2 + $0x48] sm:$0xff] }
  0xf7   : > { %v1835_v51 = vld [vmem:[#allocation3 + $0x173] sm:$0xff]  ;;  %1992 = vst [vmem:[%s3559_s25 + $0xe0] sm:$0xff] %v1960_v42  ;;  %2024 = vst [vmem:[#allocation2 + $0x182] sm:$0xff] %v1960_v42  ;;  %v1961_v44 = vmax.f32 %v1897_v58, %v1929_v19  ;;  %v3616_v40 = vld [vmem:[#allocation2 + $0x60] sm:$0xff] }
  0xf8   : > { %v2034_v56 = vld [vmem:[#allocation2 + $0x30] sm:$0xff]  ;;  %v1867_v11 = vmax.f32 %v1803_v18, %v1835_v51  ;;  %v3050_v23 = vld [vmem:[#allocation2 + $0x18] sm:$0xff]  ;;  %v3618_v39 = vld [vmem:[#allocation2 + $0x8] sm:$0xff]  ;;  %v3630_v63 = vmax.f32 %v2037_v28, %v3616_v40 }
  0xf9   : > { %v1930_v45 = vld [vmem:[#allocation3 + $0x16c] sm:$0xff]  ;;  %v2127_v54 = vmax.f32 %v3050_v23, %v2034_v56  ;;  %4457 = vst [vmem:[#allocation6_spill] sm:$0xff] %v3618_v39  ;;  %v2128_v5 = vmax.f32 %v3618_v39, %v2035_v24  ;;  %v3621_v35 = vmax.f32 %v2034_v56, %v2037_v28  ;;  %v3625_v41 = vld [vmem:[#allocation2 + $0x78] sm:$0xff]  ;;  %1993 = vst [vmem:[%s3559_s25 + $0xe8] sm:$0xff] %v1961_v44 }
  0xfa   : > { %v2038_v31 = vld [vmem:[#allocation2 + $0x50] sm:$0xff]  ;;  %v1962_v33 = vmax.f32 %v1898_v8, %v1930_v45  ;;  %v1899_v52 = vmax.f32 %v1771_v50, %v1867_v11  ;;  %v3623_v62 = vld [vmem:[#allocation2 + $0x68] sm:$0xff]  ;;  %2025 = vst [vmem:[#allocation2 + $0x18a] sm:$0xff] %v1961_v44  ;;  %v3635_v29 = vld [vmem:[#allocation2 + $0x80] sm:$0xff]  ;;  %v3644_v60 = vmax.f32 %v3616_v40, %v3625_v41 }
  0xfb   : > { %v3627_v53 = vmax.f32 %v2035_v24, %v2038_v31  ;;  %v1931_v0 = vld [vmem:[#allocation3 + $0x174] sm:$0xff]  ;;  %v3640_v21 = vmax.f32 %v2038_v31, %v3623_v62  ;;  %v3651_v1 = vld [vmem:[#allocation2 + $0xa8] sm:$0xff]  ;;  %v3655_v48 = vmax.f32 %v3623_v62, %v3635_v29  ;;  %v3663_v47 = vld [vmem:[#allocation2 + $0xc0] sm:$0xff]  ;;  %v3674_v14 = vmax.f32 %v2127_v54, %v3630_v63 }
  0xfc   : > { %v3637_v7 = vld [vmem:[#allocation2 + $0x90] sm:$0xff]  ;;  %1994 = vst [vmem:[%s3559_s25 + $0xf0] sm:$0xff] %v1962_v33  ;;  %2026 = vst [vmem:[#allocation2 + $0x19a] sm:$0xff] %v1962_v33  ;;  %v1963_v43 = vmax.f32 %v1899_v52, %v1931_v0  ;;  %v3649_v2 = vld [vmem:[#allocation2 + $0x98] sm:$0xff]  ;;  %v3690_v46 = vmax.f32 %v3651_v1, %v3663_v47 }
  0xfd   : > { %v3659_v15 = vmax.f32 %v3625_v41, %v3637_v7  ;;  %v3661_v13 = vld [vmem:[#allocation2 + $0xb0] sm:$0xff]  ;;  %v3667_v34 = vmax.f32 %v3635_v29, %v3649_v2  ;;  %v3671_v59 = vmax.f32 %v3637_v7, %v3651_v1  ;;  %v3677_v38 = vmax.f32 %v2128_v5, %v3640_v21  ;;  %v3680_v20 = vld [vmem:[#allocation2 + $0xc8] sm:$0xff]  ;;  %v3682_v9 = vld [vmem:[#allocation2 + $0xd8] sm:$0xff] }
  0xfe   : > { %1995 = vst [vmem:[%s3559_s25 + $0xf8] sm:$0xff] %v1963_v43  ;;  %2027 = vst [vmem:[#allocation2 + $0x1a2] sm:$0xff] %v1963_v43  ;;  %v3686_v17 = vmax.f32 %v3649_v2, %v3661_v13  ;;  %v3696_v61 = vld [vmem:[#allocation2 + $0xe0] sm:$0xff]  ;;  %v3698_v10 = vld [vmem:[#allocation2 + $0xf0] sm:$0xff]  ;;  %v3702_v26 = vmax.f32 %v3661_v13, %v3680_v20  ;;  %v3706_v12 = vmax.f32 %v3663_v47, %v3682_v9 }
  0xff   : > { %4458 = vst [vmem:[#allocation7_spill] sm:$0xff] %v3698_v10  ;;  %v3712_v30 = vld [vmem:[#allocation2 + $0xf8] sm:$0xff]  ;;  %v3714_v22 = vld [vmem:[#allocation2 + $0x108] sm:$0xff]  ;;  %v3718_v49 = vmax.f32 %v3680_v20, %v3696_v61  ;;  %v3722_v25 = vmax.f32 %v3682_v9, %v3698_v10  ;;  %v3728_v42 = vld [vmem:[#allocation2 + $0x110] sm:$0xff] }
 0x100   : > { %4459 = vst [vmem:[#allocation8_spill] sm:$0xff] %v3702_v26  ;;  %4460 = vst [vmem:[#allocation9_spill] sm:$0xff] %v3706_v12  ;;  %v3730_v58 = vld [vmem:[#allocation2 + $0x120] sm:$0xff]  ;;  %v3734_v50 = vmax.f32 %v3696_v61, %v3712_v30  ;;  %v3738_v51 = vmax.f32 %v3698_v10, %v3714_v22  ;;  %v3746_v11 = vld [vmem:[#allocation2 + $0x58] sm:$0xf]  ;;  %v3756_v45 = vmax.f32 %v3712_v30, %v3728_v42 }
 0x101   : > { %4461 = vst [vmem:[#allocation10_spill] sm:$0xff] %v3712_v30  ;;  %4462 = vst [vmem:[#allocation11_spill] sm:$0xff] %v3714_v22  ;;  %v3744_v8 = vld [vmem:[#allocation2 + $0x40] sm:$0xf]  ;;  %v3748_v24 = vld [vmem:[#allocation2 + $0x70] sm:$0xf]  ;;  %v3760_v31 = vmax.f32 %v3714_v22, %v3730_v58 }
 0x102   : > { %4463 = vst [vmem:[#allocation12_spill] sm:$0xff] %v3718_v49  ;;  %4464 = vst [vmem:[#allocation13_spill] sm:$0xff] %v3722_v25  ;;  %v3750_v28 = vld [vmem:[#allocation2 + $0x128] sm:$0xff]  ;;  %v3752_v44 = vld [vmem:[#allocation2 + $0x138] sm:$0xff] }
 0x103   : > { %4465 = vst [vmem:[#allocation14_spill] sm:$0xff] %v3728_v42  ;;  %4466 = vst [vmem:[#allocation15_spill] sm:$0xff] %v3730_v58  ;;  %v3766_v5 = vld [vmem:[#allocation2 + $0x28] sm:$0xf]  ;;  %v3770_v52 = vld [vmem:[#allocation2 + $0xa0] sm:$0xf]  ;;  %v3780_v19 = vmax.f32 %v3728_v42, %v3750_v28  ;;  %v3784_v23 = vmax.f32 %v3730_v58, %v3752_v44 }
 0x104   : > { %4467 = vst [vmem:[#allocation16_spill] sm:$0xff] %v3734_v50  ;;  %4468 = vst [vmem:[#allocation17_spill] sm:$0xff] %v3738_v51  ;;  %v3768_v33 = vld [vmem:[#allocation2 + $0x88] sm:$0xf]  ;;  %v3772_v0 = vld [vmem:[#allocation2 + $0xb8] sm:$0xf]  ;;  %v4499_v51 = vmax.f32 %v3159_v32, %v3621_v35 }
 0x105   : > { %4469 = vst [vmem:[#allocation18_spill] sm:$0xff] %v3748_v24  ;;  %4470 = vst [vmem:[#allocation19_spill] sm:$0xff] %v3750_v28  ;;  %v3774_v43 = vld [vmem:[#allocation2 + $0x140] sm:$0xff]  ;;  %v3776_v36 = vld [vmem:[#allocation2 + $0x150] sm:$0xff] }
 0x106   : > { %4471 = vst [vmem:[#allocation20_spill] sm:$0xff] %v3752_v44  ;;  %4472 = vst [vmem:[#allocation21_spill] sm:$0xff] %v3756_v45  ;;  %v3790_v18 = vld [vmem:[#allocation2 + $0xd0] sm:$0xf]  ;;  %v3792_v57 = vld [vmem:[#allocation2 + $0xe8] sm:$0xf]  ;;  %v3802_v27 = vmax.f32 %v3750_v28, %v3774_v43  ;;  %v3806_v54 = vmax.f32 %v3752_v44, %v3776_v36 }
 0x107   : > { %4473 = vst [vmem:[#allocation22_spill] sm:$0xff] %v3766_v5  ;;  %4474 = vst [vmem:[#allocation23_spill] sm:$0xff] %v3772_v0  ;;  %v3794_v4 = vld [vmem:[#allocation2 + $0x100] sm:$0xf]  ;;  %v3796_v6 = vld [vmem:[#allocation2 + $0x158] sm:$0xff] }
 0x108   : > { %4475 = vst [vmem:[#allocation24_spill] sm:$0xff] %v3774_v43  ;;  %4476 = vst [vmem:[#allocation25_spill] sm:$0xff] %v3776_v36  ;;  %v3798_v37 = vld [vmem:[#allocation2 + $0x168] sm:$0xff]  ;;  %v3812_v55 = vld [vmem:[#allocation2 + $0x118] sm:$0xf]  ;;  %v3824_v44 = vmax.f32 %v3774_v43, %v3796_v6 }
 0x109   : > { %4477 = vst [vmem:[#allocation26_spill] sm:$0xff] %v3780_v19  ;;  %4478 = vst [vmem:[#allocation27_spill] sm:$0xff] %v3784_v23  ;;  %v3814_v16 = vld [vmem:[#allocation2 + $0x130] sm:$0xf]  ;;  %v3816_v39 = vld [vmem:[#allocation2 + $0x148] sm:$0xf]  ;;  %v3828_v56 = vmax.f32 %v3776_v36, %v3798_v37 }
 0x10a   : > { %4479 = vst [vmem:[#allocation28_spill] sm:$0xff] %v3796_v6  ;;  %4480 = vst [vmem:[#allocation29_spill] sm:$0xff] %v3798_v37  ;;  %v3818_v58 = vld [vmem:[#allocation2 + $0x170] sm:$0xff]  ;;  %v3820_v28 = vld [vmem:[#allocation2 + $0x40] sm:$0xf] }
 0x10b   : > { %4481 = vst [vmem:[#allocation30_spill] sm:$0xff] %v3802_v27  ;;  %4482 = vst [vmem:[#allocation31_spill] sm:$0xff] %v3806_v54  ;;  %v3834_v22 = vld [vmem:[#allocation2 + $0x160] sm:$0xf]  ;;  %v3836_v49 = vld [vmem:[#allocation2 + $0x58] sm:$0xf]  ;;  %v3846_v36 = vmax.f32 %v3796_v6, %v3818_v58  ;;  %v3932_v6 = vmax.f32 %v3627_v53, %v3623_v62  ;;  %v4504_v62 = vmax.f32 %v3621_v35, %v3644_v60 }
 0x10c   : > { %4483 = vst [vmem:[#allocation32_spill] sm:$0xff] %v3818_v58  ;;  %4484 = vst [vmem:[#allocation33_spill] sm:$0xff] %v3820_v28  ;;  %v3838_v30 = vld [vmem:[#allocation2 + $0x70] sm:$0xf]  ;;  %v3840_v12 = vld [vmem:[#allocation2 + $0x88] sm:$0xf]  ;;  %v4508_v35 = vmax.f32 %v3630_v63, %v3659_v15 }
 0x10d   : > { %4485 = vst [vmem:[#allocation34_spill] sm:$0xff] %v3824_v44  ;;  %4486 = vst [vmem:[#allocation35_spill] sm:$0xff] %v3834_v22  ;;  %v3852_v50 = vld [vmem:[#allocation2 + $0x178] sm:$0xf]  ;;  %v3854_v25 = vld [vmem:[#allocation2 + $0xa0] sm:$0xf] }
 0x10e   : > { %4487 = vst [vmem:[#allocation36_spill] sm:$0xff] %v3838_v30  ;;  %4488 = vst [vmem:[#allocation37_spill] sm:$0xff] %v3840_v12  ;;  %v3856_v10 = vld [vmem:[#allocation2 + $0xb8] sm:$0xf]  ;;  %v3858_v26 = vld [vmem:[#allocation2 + $0xd0] sm:$0xf]  ;;  %v3926_v30 = vmax.f32 %v4499_v51, %v3616_v40  ;;  %v4514_v51 = vmax.f32 %v3655_v48, %v3686_v17 }
 0x10f   : > { %4489 = vst [vmem:[#allocation38_spill] sm:$0xff] %v3846_v36  ;;  %4490 = vst [vmem:[#allocation39_spill] sm:$0xff] %v3852_v50  ;;  %v3868_v28 = vld [vmem:[#allocation2 + $0xe8] sm:$0xf]  ;;  %v3870_v5 = vld [vmem:[#allocation2 + $0x100] sm:$0xf] }
 0x110   : > { %4491 = vst [vmem:[#allocation40_spill] sm:$0xff] %v3858_v26  ;;  %v3872_v45 = vld [vmem:[#allocation2 + $0x118] sm:$0xf]  ;;  %v3882_v12 = vld [vmem:[#allocation2 + $0x130] sm:$0xf]  ;;  %v3898_v3 = vld [vmem:[#allocation2 + $0x180] sm:$0xff] }
 0x111   : > { %4492 = vst [vmem:[#allocation41_spill] sm:$0xff] %v3872_v45  ;;  %v3884_v42 = vld [vmem:[#allocation2 + $0x148] sm:$0xf]  ;;  %v3886_v24 = vld [vmem:[#allocation2 + $0x160] sm:$0xf]  ;;  %4494 = vst [vmem:[#allocation43_spill] sm:$0xff] %v3898_v3  ;;  %v3916_v23 = vmax.f32 %v3798_v37, %v3898_v3  ;;  %v3936_v37 = vmax.f32 %v3674_v14, %v3625_v41  ;;  %v3954_v41 = vmax.f32 %v4504_v62, %v3637_v7 }
 0x112   : > { %v3896_v26 = vld [vmem:[#allocation2 + $0x178] sm:$0xf]  ;;  %v3900_v19 = vld [vmem:[#allocation2 + $0x188] sm:$0xff]  ;;  %v3910_v45 = vld [vmem:[#allocation2 + $0x190] sm:$0xf]  ;;  %4500 = vst [vmem:[#allocation48_spill] sm:$0xff] %v3926_v30  ;;  %v3973_v7 = vmax.f32 %v4508_v35, %v3651_v1  ;;  %v4512_v62 = vmax.f32 %v3644_v60, %v3671_v59 }
 0x113   : > { %4493 = vst [vmem:[#allocation42_spill] sm:$0xff] %v3896_v26  ;;  %4495 = vst [vmem:[#allocation44_spill] sm:$0xff] %v3900_v19  ;;  %v3920_v0 = vmax.f32 %v3818_v58, %v3900_v19  ;;  %v3940_v58 = vmax.f32 %v3677_v38, %v3635_v29  ;;  %v3942_v27 = vld [vmem:[#allocation2 + $0x40] sm:$0xf]  ;;  %v3944_v32 = vld [vmem:[#allocation2 + $0x58] sm:$0xf]  ;;  %v4506_v29 = vmax.f32 %v3627_v53, %v3655_v48 }
 0x114   : > { %4496 = vst [vmem:[#allocation45_spill] sm:$0xff] %v3910_v45  ;;  %4497 = vst [vmem:[#allocation46_spill] sm:$0xff] %v3916_v23  ;;  %v3963_v38 = vld [vmem:[#allocation2 + $0x70] sm:$0xf]  ;;  %v3965_v40 = vld [vmem:[#allocation2 + $0x88] sm:$0xf]  ;;  %v4510_v53 = vmax.f32 %v3640_v21, %v3667_v34  ;;  %v4516_v48 = vmax.f32 %v3659_v15, %v3690_v46 }
 0x115   : > { %4498 = vst [vmem:[#allocation47_spill] sm:$0xff] %v3920_v0  ;;  %4501 = vst [vmem:[#allocation49_spill] sm:$0xff] %v3932_v6  ;;  %v3960_v14 = vmax.f32 %v4506_v29, %v3649_v2  ;;  %v3967_v43 = vld [vmem:[#allocation2 + $0xa0] sm:$0xf]  ;;  %v3985_v29 = vmax.f32 %v4512_v62, %v3663_v47  ;;  %v3998_v21 = vld [vmem:[#allocation2 + $0xb8] sm:$0xf] }
 0x116   : > { %4502 = vst [vmem:[#allocation50_spill] sm:$0xff] %v3936_v37  ;;  %4503 = vst [vmem:[#allocation51_spill] sm:$0xff] %v3940_v58  ;;  %v3979_v2 = vmax.f32 %v4510_v53, %v3661_v13  ;;  %v3996_v63 = vld [vmem:[#allocation2 + $0x1c0] sm:$0xf]  ;;  %v4000_v1 = vld [vmem:[#allocation2 + $0xd0] sm:$0xf]  ;;  %v4008_v13 = vmax.f32 %v4516_v48, %v3682_v9 }
 0x117   : > { %4505 = vst [vmem:[#allocation52_spill] sm:$0xff] %v3954_v41  ;;  %4507 = vst [vmem:[#allocation53_spill] sm:$0xff] %v3960_v14  ;;  %v4002_v60 = vld [vmem:[#allocation2 + $0xe8] sm:$0xf]  ;;  %v4518_v47 = vld [vmem:[#allocation8_spill] sm:$0xff] }
 0x118   : > { %2460 = vst [vmem:[#allocation3] sm:$0xff] %v3926_v30  ;;  %4509 = vst [vmem:[#allocation54_spill] sm:$0xff] %v3973_v7  ;;  %v3991_v30 = vmax.f32 %v4514_v51, %v3680_v20  ;;  %v4519_v20 = vmax.f32 %v3667_v34, %v4518_v47  ;;  %v4521_v35 = vld [vmem:[#allocation7_spill] sm:$0xff]  ;;  %v4522_v53 = vld [vmem:[#allocation9_spill] sm:$0xff] }
 0x119   : > { %4511 = vst [vmem:[#allocation55_spill] sm:$0xff] %v3979_v2  ;;  %4513 = vst [vmem:[#allocation56_spill] sm:$0xff] %v3985_v29  ;;  %v4523_v62 = vmax.f32 %v3671_v59, %v4522_v53  ;;  %v4030_v15 = vld [vmem:[#allocation2 + $0x100] sm:$0xf]  ;;  %v4032_v34 = vld [vmem:[#allocation2 + $0x118] sm:$0xf] }
 0x11a   : > { %4515 = vst [vmem:[#allocation57_spill] sm:$0xff] %v3991_v30  ;;  %2461 = vst [vmem:[#allocation3 + $0x8] sm:$0xff] %v3932_v6  ;;  %v4014_v51 = vmax.f32 %v4519_v20, %v3696_v61  ;;  %v4525_v6 = vld [vmem:[#allocation10_spill] sm:$0xff]  ;;  %v4036_v61 = vld [vmem:[#allocation2 + $0x198] sm:$0xff] }
 0x11b   : > { %2463 = vst [vmem:[#allocation3 + $0x18] sm:$0xff] %v3936_v37  ;;  %2464 = vst [vmem:[#allocation3 + $0x20] sm:$0xff] %v3940_v58  ;;  %v4020_v58 = vmax.f32 %v4523_v62, %v4521_v35  ;;  %v4526_v37 = vld [vmem:[#allocation12_spill] sm:$0xff]  ;;  %v4034_v9 = vld [vmem:[#allocation2 + $0x130] sm:$0xf] }
 0x11c   : > { %4517 = vst [vmem:[#allocation58_spill] sm:$0xff] %v4008_v13  ;;  %4520 = vst [vmem:[#allocation8_spill] sm:$0xff] %v4014_v51  ;;  %v4527_v44 = vmax.f32 %v3686_v17, %v4526_v37  ;;  %v4038_v59 = vld [vmem:[#allocation2 + $0x1a0] sm:$0xff]  ;;  %v4530_v48 = vld [vmem:[#allocation11_spill] sm:$0xff] }
 0x11d   : > { %4524 = vst [vmem:[#allocation7_spill] sm:$0xff] %v4020_v58  ;;  %2466 = vst [vmem:[#allocation3 + $0x30] sm:$0xff] %v3954_v41  ;;  %v4531_v20 = vld [vmem:[#allocation13_spill] sm:$0xff]  ;;  %v4535_v35 = vld [vmem:[#allocation16_spill] sm:$0xff] }
 0x11e   : > { %v4026_v54 = vmax.f32 %v4527_v44, %v4525_v6  ;;  %2467 = vst [vmem:[#allocation3 + $0x38] sm:$0xff] %v3960_v14  ;;  %4529 = vst [vmem:[#allocation10_spill] sm:$0xff] %v4038_v59  ;;  %v4532_v17 = vmax.f32 %v3690_v46, %v4531_v20  ;;  %v4534_v44 = vld [vmem:[#allocation14_spill] sm:$0xff]  ;;  %v4536_v62 = vmax.f32 %v4518_v47, %v4535_v35  ;;  %v4538_v41 = vld [vmem:[#allocation15_spill] sm:$0xff] }
 0x11f   : > { %v4539_v45 = vld [vmem:[#allocation17_spill] sm:$0xff]  ;;  %v4542_v23 = vld [vmem:[#allocation19_spill] sm:$0xff]  ;;  %2469 = vst [vmem:[#allocation3 + $0x48] sm:$0xff] %v3973_v7  ;;  %2470 = vst [vmem:[#allocation3 + $0x50] sm:$0xff] %v3979_v2 }
 0x120   : > { %4528 = vst [vmem:[#allocation9_spill] sm:$0xff] %v4026_v54  ;;  %v4044_v6 = vmax.f32 %v4532_v17, %v4530_v48  ;;  %v4050_v14 = vmax.f32 %v4536_v62, %v4534_v44  ;;  %v4540_v50 = vmax.f32 %v4522_v53, %v4539_v45  ;;  %v4543_v26 = vld [vmem:[#allocation21_spill] sm:$0xff]  ;;  %2472 = vst [vmem:[#allocation3 + $0x60] sm:$0xff] %v3985_v29  ;;  %v4070_v47 = vld [vmem:[#allocation2 + $0x160] sm:$0xf] }
 0x121   : > { %v4544_v22 = vmax.f32 %v4526_v37, %v4543_v26  ;;  %2473 = vst [vmem:[#allocation3 + $0x68] sm:$0xff] %v3991_v30  ;;  %v4068_v46 = vld [vmem:[#allocation2 + $0x148] sm:$0xf]  ;;  %v2222_v53 = vld [vmem:[#allocation2 + $0x58] sm:$0xf]  ;;  %v4080_v48 = vld [vmem:[#allocation2 + $0x1b0] sm:$0xff] }
 0x122   : > { %4533 = vst [vmem:[#allocation12_spill] sm:$0xff] %v4044_v6  ;;  %4537 = vst [vmem:[#allocation11_spill] sm:$0xff] %v4050_v14  ;;  %v4056_v0 = vmax.f32 %v4540_v50, %v4538_v41  ;;  %v4072_v50 = vld [vmem:[#allocation2 + $0x178] sm:$0xf]  ;;  %v4074_v41 = vld [vmem:[#allocation2 + $0x1a8] sm:$0xf]  ;;  %v2313_v17 = vmax.f32 %v4036_v61, %v4080_v48 }
 0x123   : > { %v4062_v36 = vmax.f32 %v4544_v22, %v4542_v23  ;;  %v2225_v37 = vld [vmem:[#allocation2 + $0x70] sm:$0xf]  ;;  %v2310_v22 = vmax.f32 %v3898_v3, %v4036_v61  ;;  %v2311_v23 = vmax.f32 %v3900_v19, %v4038_v59  ;;  %4546 = vst [vmem:[#allocation16_spill] sm:$0xff] %v4080_v48  ;;  %2475 = vst [vmem:[#allocation3 + $0x78] sm:$0xff] %v4008_v13  ;;  %v2228_v2 = vld [vmem:[#allocation2 + $0x88] sm:$0xf] }
 0x124   : > { %4541 = vst [vmem:[#allocation13_spill] sm:$0xff] %v4056_v0  ;;  %v4547_v44 = vld [vmem:[#allocation6_spill] sm:$0xff]  ;;  %2476 = vst [vmem:[#allocation3 + $0x80] sm:$0xff] %v4014_v51  ;;  %v2231_v29 = vld [vmem:[#allocation2 + $0xa0] sm:$0xf]  ;;  %v2270_v19 = vmax.f32 %v3942_v27, %v2222_v53  ;;  %v2273_v3 = vmax.f32 %v3944_v32, %v2225_v37  ;;  %v2315_v48 = vmax.f32 %v4074_v41, %v3996_v63 }
 0x125   : > { %4545 = vst [vmem:[#allocation14_spill] sm:$0xff] %v4062_v36  ;;  %v2314_v62 = vmax.f32 %v4038_v59, %v4547_v44  ;;  %2478 = vst [vmem:[#allocation3 + $0x90] sm:$0xff] %v4020_v58  ;;  %v2216_v30 = vld [vmem:[#allocation2 + $0x190] sm:$0xf]  ;;  %v2234_v7 = vld [vmem:[#allocation2 + $0xb8] sm:$0xf]  ;;  %v4549_v13 = vmax.f32 %v4531_v20, %v3760_v31  ;;  %v2276_v37 = vmax.f32 %v3963_v38, %v2228_v2 }
 0x126   : > { %2479 = vst [vmem:[#allocation3 + $0x98] sm:$0xff] %v4026_v54  ;;  %v4548_v44 = vld [vmem:[#allocation20_spill] sm:$0xff]  ;;  %2481 = vst [vmem:[#allocation3 + $0xa8] sm:$0xff] %v4044_v6  ;;  %v2237_v27 = vld [vmem:[#allocation2 + $0xd0] sm:$0xf]  ;;  %v2279_v63 = vmax.f32 %v3965_v40, %v2231_v29  ;;  %v2282_v41 = vmax.f32 %v3967_v43, %v2234_v7 }
 0x127   : > { %v4098_v51 = vmax.f32 %v4549_v13, %v4548_v44  ;;  %2482 = vst [vmem:[#allocation3 + $0xb0] sm:$0xff] %v4050_v14  ;;  %2484 = vst [vmem:[#allocation3 + $0xc0] sm:$0xff] %v4056_v0  ;;  %v2240_v53 = vld [vmem:[#allocation2 + $0xe8] sm:$0xf]  ;;  %v2243_v32 = vld [vmem:[#allocation2 + $0x100] sm:$0xf]  ;;  %v4108_v13 = vmax.f32 %v3828_v56, %v2310_v22  ;;  %v2285_v14 = vmax.f32 %v3998_v21, %v2237_v27 }
 0x128   : > { %2485 = vst [vmem:[#allocation3 + $0xc8] sm:$0xff] %v4062_v36  ;;  %v2246_v20 = vld [vmem:[#allocation2 + $0x118] sm:$0xf]  ;;  %v2249_v44 = vld [vmem:[#allocation2 + $0x130] sm:$0xf]  ;;  %v2288_v0 = vmax.f32 %v4000_v1, %v2240_v53  ;;  %v2291_v36 = vmax.f32 %v4002_v60, %v2243_v32  ;;  %v4550_v54 = vld [vmem:[#allocation4_spill] sm:$0xff] }
 0x129   : > { %v2252_v6 = vld [vmem:[#allocation2 + $0x148] sm:$0xf]  ;;  %2487 = vst [vmem:[#allocation3 + $0xd8] sm:$0xff] %v4098_v51  ;;  %v2255_v40 = vld [vmem:[#allocation2 + $0x160] sm:$0xf]  ;;  %v2294_v2 = vmax.f32 %v4030_v15, %v2246_v20  ;;  %v2297_v29 = vmax.f32 %v4032_v34, %v2249_v44  ;;  %v4553_v21 = vld [vmem:[#allocation22_spill] sm:$0xff] }
 0x12a   : > { %v4551_v58 = vld [vmem:[#allocation5_spill] sm:$0xff]  ;;  %v2258_v43 = vld [vmem:[#allocation2 + $0x178] sm:$0xf]  ;;  %v2261_v7 = vld [vmem:[#allocation2 + $0x190] sm:$0xf]  ;;  %v2300_v22 = vmax.f32 %v4034_v9, %v2252_v6  ;;  %v2303_v32 = vmax.f32 %v4068_v46, %v2255_v40  ;;  %v4562_v46 = vmax.f32 %v3768_v33, %v3854_v25 }
 0x12b   : > { %v4552_v59 = vmax.f32 %v4550_v54, %v4551_v58  ;;  %v4554_v27 = vld [vmem:[#allocation33_spill] sm:$0xff]  ;;  %v2306_v58 = vmax.f32 %v4070_v47, %v2258_v43  ;;  %v4556_v54 = vmax.f32 %v3744_v8, %v3836_v49  ;;  %v4557_v34 = vld [vmem:[#allocation36_spill] sm:$0xff]  ;;  %v4559_v6 = vld [vmem:[#allocation18_spill] sm:$0xff]  ;;  %v4563_v47 = vmax.f32 %v3770_v52, %v3856_v10 }
 0x12c   : > { %v4555_v1 = vmax.f32 %v4553_v21, %v4554_v27  ;;  %v2264_v60 = vld [vmem:[#allocation2 + $0x1a8] sm:$0xf]  ;;  %v4558_v20 = vmax.f32 %v3746_v11, %v4557_v34  ;;  %v2333_v40 = vmax.f32 %v4562_v46, %v2285_v14  ;;  %v4564_v43 = vld [vmem:[#allocation23_spill] sm:$0xff]  ;;  %v4565_v49 = vld [vmem:[#allocation40_spill] sm:$0xff]  ;;  %v4567_v11 = vmax.f32 %v3790_v18, %v3868_v28 }
 0x12d   : > { %v2318_v38 = vmax.f32 %v4552_v59, %v2270_v19  ;;  %v2309_v19 = vmax.f32 %v4072_v50, %v2261_v7  ;;  %v2324_v59 = vmax.f32 %v4556_v54, %v2276_v37  ;;  %v2312_v15 = vmax.f32 %v2216_v30, %v2264_v60  ;;  %v4560_v44 = vld [vmem:[#allocation37_spill] sm:$0xff]  ;;  %v2366_v28 = vld [vmem:[#allocation2 + $0x70] sm:$0xf]  ;;  %v2387_v34 = vld [vmem:[#allocation2 + $0x118] sm:$0xf] }
 0x12e   : > { %v2321_v53 = vmax.f32 %v4555_v1, %v2273_v3  ;;  %v2327_v9 = vmax.f32 %v4558_v20, %v2279_v63  ;;  %v4561_v21 = vmax.f32 %v4559_v6, %v4560_v44  ;;  %v2336_v50 = vmax.f32 %v4563_v47, %v2288_v0  ;;  %v4569_v7 = vld [vmem:[#allocation41_spill] sm:$0xff]  ;;  %v4574_v14 = vld [vmem:[#allocation38_spill] sm:$0xff]  ;;  %v2399_v46 = vld [vmem:[#allocation2 + $0x178] sm:$0xf] }
 0x12f   : > { %v4566_v8 = vmax.f32 %v4564_v43, %v4565_v49  ;;  %v2342_v37 = vmax.f32 %v4567_v11, %v2294_v2  ;;  %v4568_v63 = vmax.f32 %v3792_v57, %v3870_v5  ;;  %v4570_v25 = vmax.f32 %v3794_v4, %v4569_v7  ;;  %v2369_v5 = vld [vmem:[#allocation2 + $0x88] sm:$0xf]  ;;  %v2372_v4 = vld [vmem:[#allocation2 + $0xa0] sm:$0xf]  ;;  %v4578_v27 = vld [vmem:[#allocation46_spill] sm:$0xff] }
 0x130   : > { %v2330_v3 = vmax.f32 %v4561_v21, %v2282_v41  ;;  %v4571_v10 = vmax.f32 %v3812_v55, %v3882_v12  ;;  %v4573_v18 = vmax.f32 %v3816_v39, %v3886_v24  ;;  %v4171_v2 = vmax.f32 %v4574_v14, %v2311_v23  ;;  %v4576_v55 = vld [vmem:[#allocation42_spill] sm:$0xff]  ;;  %v2375_v39 = vld [vmem:[#allocation2 + $0xb8] sm:$0xf]  ;;  %v2381_v60 = vld [vmem:[#allocation2 + $0xe8] sm:$0xf] }
 0x131   : > { %v2339_v30 = vmax.f32 %v4566_v8, %v2291_v36  ;;  %v2345_v41 = vmax.f32 %v4568_v63, %v2297_v29  ;;  %v4153_v33 = vmax.f32 %v4570_v25, %v2300_v22  ;;  %v4572_v36 = vmax.f32 %v3814_v16, %v3884_v42  ;;  %v4575_v29 = vld [vmem:[#allocation35_spill] sm:$0xff]  ;;  %v2378_v24 = vld [vmem:[#allocation2 + $0xd0] sm:$0xf]  ;;  %v2384_v23 = vld [vmem:[#allocation2 + $0x100] sm:$0xf] }
 0x132   : > { %v4158_v52 = vmax.f32 %v4571_v10, %v2303_v32  ;;  %v4168_v57 = vmax.f32 %v4573_v18, %v2309_v19  ;;  %v4577_v12 = vmax.f32 %v4575_v29, %v4576_v55  ;;  %v4179_v16 = vmax.f32 %v4578_v27, %v2313_v17  ;;  %v4579_v42 = vld [vmem:[#allocation47_spill] sm:$0xff]  ;;  %v2390_v20 = vld [vmem:[#allocation2 + $0x130] sm:$0xf]  ;;  %v2393_v21 = vld [vmem:[#allocation2 + $0x148] sm:$0xf] }
 0x133   : > { %v4163_v0 = vmax.f32 %v4572_v36, %v2306_v58  ;;  %v4182_v1 = vmax.f32 %v4579_v42, %v2314_v62  ;;  %v4580_v32 = vld [vmem:[#allocation39_spill] sm:$0xff]  ;;  %v4581_v58 = vld [vmem:[#allocation45_spill] sm:$0xff]  ;;  %v2414_v6 = vmax.f32 %v2318_v38, %v2366_v28  ;;  %v2420_v44 = vmax.f32 %v2324_v59, %v2372_v4  ;;  %v2396_v17 = vld [vmem:[#allocation2 + $0x160] sm:$0xf] }
 0x134   : > { %v4176_v22 = vmax.f32 %v4577_v12, %v2312_v15  ;;  %v4582_v19 = vmax.f32 %v4580_v32, %v4581_v58  ;;  %v2417_v15 = vmax.f32 %v2321_v53, %v2369_v5  ;;  %v2423_v47 = vmax.f32 %v2327_v9, %v2375_v39  ;;  %v2402_v8 = vld [vmem:[#allocation2 + $0x190] sm:$0xf]  ;;  %v2405_v11 = vld [vmem:[#allocation2 + $0x1a8] sm:$0xf]  ;;  %v4583_v25 = vld [vmem:[#allocation24_spill] sm:$0xff] }
 0x135   : > { %v2426_v62 = vmax.f32 %v2330_v3, %v2378_v24  ;;  %v2429_v43 = vmax.f32 %v2333_v40, %v2381_v60  ;;  %v2432_v49 = vmax.f32 %v2336_v50, %v2384_v23  ;;  %v2435_v63 = vmax.f32 %v2339_v30, %v2387_v34  ;;  %2462 = vst [vmem:[#allocation3 + $0x10] sm:$0xf] %v2414_v6  ;;  %v4195_v53 = vld [vmem:[#allocation3 + $0x1] sm:$0xff]  ;;  %v4587_v40 = vld [vmem:[#allocation27_spill] sm:$0xff]  ;;  %v4590_v18 = vld [vmem:[#allocation30_spill] sm:$0xff] }
 0x136   : > { %v4187_v54 = vmax.f32 %v4582_v19, %v2315_v48  ;;  %v2438_v7 = vmax.f32 %v2342_v37, %v2390_v20  ;;  %v4584_v48 = vld [vmem:[#allocation26_spill] sm:$0xff]  ;;  %v2441_v38 = vmax.f32 %v2345_v41, %v2393_v21  ;;  %2465 = vst [vmem:[#allocation3 + $0x28] sm:$0xf] %v2417_v15  ;;  %2468 = vst [vmem:[#allocation3 + $0x40] sm:$0xf] %v2420_v44  ;;  %v2409_v9 = vld [vmem:[#allocation2 + $0x1c8] sm:$0xff] }
 0x137   : > { %v4585_v10 = vmax.f32 %v4535_v35, %v4584_v48  ;;  %v2408_v59 = vld [vmem:[#allocation2 + $0x1c0] sm:$0xf]  ;;  %v4586_v3 = vld [vmem:[#allocation25_spill] sm:$0xff]  ;;  %v4588_v50 = vmax.f32 %v4539_v45, %v4587_v40  ;;  %v4591_v35 = vmax.f32 %v4543_v26, %v4590_v18  ;;  %v2444_v41 = vmax.f32 %v4153_v33, %v2396_v17  ;;  %v4593_v4 = vld [vmem:[#allocation31_spill] sm:$0xff]  ;;  %2471 = vst [vmem:[#allocation3 + $0x58] sm:$0xf] %v2423_v47 }
 0x138   : > { %v4589_v37 = vld [vmem:[#allocation28_spill] sm:$0xff]  ;;  %v4592_v5 = vld [vmem:[#allocation29_spill] sm:$0xff]  ;;  %v4594_v29 = vmax.f32 %v3760_v31, %v4593_v4  ;;  %2474 = vst [vmem:[#allocation3 + $0x70] sm:$0xf] %v2426_v62  ;;  %2477 = vst [vmem:[#allocation3 + $0x88] sm:$0xf] %v2429_v43  ;;  %v2447_v58 = vmax.f32 %v4158_v52, %v2399_v46  ;;  %v4599_v19 = vmax.f32 %v4587_v40, %v3828_v56 }
 0x139   : > { %v4193_v36 = vmax.f32 %v4585_v10, %v4583_v25  ;;  %v4201_v30 = vmax.f32 %v4588_v50, %v4586_v3  ;;  %v4207_v28 = vmax.f32 %v4591_v35, %v4589_v37  ;;  %2480 = vst [vmem:[#allocation3 + $0xa0] sm:$0xf] %v2432_v49  ;;  %v2604_v45 = vld [vmem:[#allocation3 + $0x2] sm:$0xff]  ;;  %v4216_v39 = vld [vmem:[#allocation3 + $0x19] sm:$0xff]  ;;  %v4596_v60 = vld [vmem:[#allocation34_spill] sm:$0xff]  ;;  %v4601_v20 = vmax.f32 %v4590_v18, %v4574_v14 }
 0x13a   : > { %v4214_v55 = vmax.f32 %v4594_v29, %v4592_v5  ;;  %v2636_v12 = vld [vmem:[#allocation3 + $0x3] sm:$0xff]  ;;  %v2411_v24 = vld [vmem:[#allocation2 + $0x1d8] sm:$0xf]  ;;  %v4597_v32 = vmax.f32 %v4584_v48, %v4596_v60  ;;  %2483 = vst [vmem:[#allocation3 + $0xb8] sm:$0xf] %v2435_v63  ;;  %v2450_v21 = vmax.f32 %v4163_v0, %v2402_v8  ;;  %v4602_v56 = vmax.f32 %v4593_v4, %v4578_v27  ;;  %v4603_v46 = vld [vmem:[#allocation10_spill] sm:$0xff] }
 0x13b   : > { %v4595_v26 = vld [vmem:[#allocation32_spill] sm:$0xff]  ;;  %v4598_v31 = vld [vmem:[#allocation43_spill] sm:$0xff]  ;;  %2486 = vst [vmem:[#allocation3 + $0xd0] sm:$0xf] %v2438_v7  ;;  %2488 = vst [vmem:[#allocation3 + $0xe0] sm:$0xff] %v4193_v36  ;;  %v4604_v14 = vmax.f32 %v4596_v60, %v4579_v42  ;;  %v2453_v62 = vmax.f32 %v4168_v57, %v2405_v11  ;;  %v2456_v57 = vmax.f32 %v4176_v22, %v2408_v59 }
 0x13c   : > { %v4222_v33 = vmax.f32 %v4597_v32, %v4595_v26  ;;  %v4229_v23 = vmax.f32 %v4599_v19, %v4598_v31  ;;  %v4600_v34 = vld [vmem:[#allocation44_spill] sm:$0xff]  ;;  %2489 = vst [vmem:[#allocation3 + $0xe8] sm:$0xf] %v2441_v38  ;;  %v2544_v52 = vld [vmem:[#allocation3 + $0x31] sm:$0xff]  ;;  %v4243_v17 = vmax.f32 %v4602_v56, %v4036_v61  ;;  %2490 = vst [vmem:[#allocation3 + $0xf0] sm:$0xff] %v4201_v30 }
 0x13d   : > { %v4235_v6 = vmax.f32 %v4601_v20, %v4600_v34  ;;  %v2606_v15 = vld [vmem:[#allocation3 + $0x1a] sm:$0xff]  ;;  %v4249_v47 = vmax.f32 %v4604_v14, %v4603_v46  ;;  %2491 = vst [vmem:[#allocation3 + $0xf8] sm:$0xff] %v4207_v28  ;;  %2492 = vst [vmem:[#allocation3 + $0x100] sm:$0xf] %v2444_v41  ;;  %v2608_v0 = vld [vmem:[#allocation3 + $0x32] sm:$0xff]  ;;  %v4265_v11 = vmax.f32 %v4179_v16, %v2409_v9 }
 0x13e   : > { %v2638_v44 = vld [vmem:[#allocation3 + $0x1b] sm:$0xff]  ;;  %2493 = vst [vmem:[#allocation3 + $0x108] sm:$0xff] %v4214_v55  ;;  %v2640_v43 = vld [vmem:[#allocation3 + $0x33] sm:$0xff]  ;;  %v2546_v27 = vld [vmem:[#allocation3 + $0x49] sm:$0xff]  ;;  %v2459_v22 = vmax.f32 %v4187_v54, %v2411_v24  ;;  %v2668_v48 = vmax.f32 %v2604_v45, %v2636_v12 }
 0x13f   : > { %v4605_v61 = vld [vmem:[#allocation16_spill] sm:$0xff]  ;;  %v4606_v8 = vld [vmem:[#allocation6_spill] sm:$0xff]  ;;  %2494 = vst [vmem:[#allocation3 + $0x110] sm:$0xff] %v4222_v33  ;;  %2495 = vst [vmem:[#allocation3 + $0x118] sm:$0xf] %v2447_v58  ;;  %v2670_v38 = vmax.f32 %v2606_v15, %v2638_v44  ;;  %v2672_v3 = vmax.f32 %v2608_v0, %v2640_v43 }
 0x140   : > { %v4257_v49 = vmax.f32 %v4108_v13, %v4605_v61  ;;  %v4261_v42 = vmax.f32 %v4171_v2, %v4606_v8  ;;  %2496 = vst [vmem:[#allocation3 + $0x120] sm:$0xff] %v4229_v23  ;;  %2497 = vst [vmem:[#allocation3 + $0x128] sm:$0xff] %v4235_v6  ;;  %v2610_v63 = vld [vmem:[#allocation3 + $0x4a] sm:$0xff]  ;;  %v4270_v13 = vld [vmem:[#allocation3 + $0x61] sm:$0xff]  ;;  %v4274_v2 = vmax.f32 %v4182_v1, %v4606_v8 }
 0x141   : > { %v2642_v7 = vld [vmem:[#allocation3 + $0x4b] sm:$0xff]  ;;  %2498 = vst [vmem:[#allocation3 + $0x130] sm:$0xf] %v2450_v21  ;;  %2499 = vst [vmem:[#allocation3 + $0x138] sm:$0xff] %v4243_v17  ;;  %v4607_v16 = vld [vmem:[#allocation48_spill] sm:$0xff] }
 0x142   : > { %2500 = vst [vmem:[#allocation3 + $0x140] sm:$0xff] %v4249_v47  ;;  %2501 = vst [vmem:[#allocation3 + $0x148] sm:$0xf] %v2453_v62  ;;  %v2572_v25 = vmax.f32 %v4607_v16, %v4195_v53  ;;  %v2732_v1 = vld [vmem:[#allocation3 + $0x4] sm:$0xff]  ;;  %v4608_v54 = vld [vmem:[#allocation50_spill] sm:$0xff]  ;;  %v2674_v45 = vmax.f32 %v2610_v63, %v2642_v7 }
 0x143   : > { %2502 = vst [vmem:[#allocation3 + $0x150] sm:$0xff] %v4257_v49  ;;  %2503 = vst [vmem:[#allocation3 + $0x158] sm:$0xff] %v4261_v42  ;;  %v2574_v10 = vmax.f32 %v4608_v54, %v4216_v39  ;;  %v4609_v59 = vld [vmem:[#allocation52_spill] sm:$0xff]  ;;  %v2541_v37 = vld [vmem:[#allocation3 + $0x9] sm:$0xff] }
 0x144   : > { %2504 = vst [vmem:[#allocation3 + $0x160] sm:$0xf] %v2456_v57  ;;  %2505 = vst [vmem:[#allocation3 + $0x168] sm:$0xff] %v4265_v11  ;;  %v2576_v9 = vmax.f32 %v4609_v59, %v2544_v52  ;;  %v2612_v40 = vld [vmem:[#allocation3 + $0x62] sm:$0xff]  ;;  %v2700_v53 = vmax.f32 %v2572_v25, %v2668_v48  ;;  %v2605_v18 = vld [vmem:[#allocation3 + $0xa] sm:$0xff] }
 0x145   : > { %v2644_v50 = vld [vmem:[#allocation3 + $0x63] sm:$0xff]  ;;  %2506 = vst [vmem:[#allocation3 + $0x170] sm:$0xff] %v4274_v2  ;;  %2507 = vst [vmem:[#allocation3 + $0x178] sm:$0xf] %v2459_v22  ;;  %v2637_v35 = vld [vmem:[#allocation3 + $0xb] sm:$0xff]  ;;  %v2702_v32 = vmax.f32 %v2574_v10, %v2670_v38 }
 0x146   : > { %v2734_v41 = vld [vmem:[#allocation3 + $0x1c] sm:$0xff]  ;;  %v2736_v5 = vld [vmem:[#allocation3 + $0x34] sm:$0xff]  ;;  %v4612_v24 = vld [vmem:[#allocation49_spill] sm:$0xff]  ;;  %v2669_v60 = vmax.f32 %v2605_v18, %v2637_v35  ;;  %v2704_v19 = vmax.f32 %v2576_v9, %v2672_v3  ;;  %v2764_v15 = vmax.f32 %v2700_v53, %v2732_v1  ;;  %v2676_v14 = vmax.f32 %v2612_v40, %v2644_v50 }
 0x147   : > { %v4610_v4 = vld [vmem:[#allocation54_spill] sm:$0xff]  ;;  %v4611_v12 = vld [vmem:[#allocation56_spill] sm:$0xff]  ;;  %v2573_v26 = vmax.f32 %v4612_v24, %v2541_v37  ;;  %v4613_v44 = vld [vmem:[#allocation51_spill] sm:$0xff]  ;;  %v2766_v61 = vmax.f32 %v2702_v32, %v2734_v41 }
 0x148   : > { %v2578_v29 = vmax.f32 %v4610_v4, %v2546_v27  ;;  %v2580_v39 = vmax.f32 %v4611_v12, %v4270_v13  ;;  %v2543_v58 = vld [vmem:[#allocation3 + $0x21] sm:$0xff]  ;;  %v2738_v34 = vld [vmem:[#allocation3 + $0x4c] sm:$0xff]  ;;  %v4298_v20 = vld [vmem:[#allocation3 + $0x79] sm:$0xff]  ;;  %v2768_v57 = vmax.f32 %v2704_v19, %v2736_v5  ;;  %2796 = vst [vmem:[%s4295_s28] sm:$0xff] %v2764_v15 }
 0x149   : > { %v2607_v31 = vld [vmem:[#allocation3 + $0x22] sm:$0xff]  ;;  %v2575_v52 = vmax.f32 %v4613_v44, %v2543_v58  ;;  %v2545_v56 = vld [vmem:[#allocation3 + $0x39] sm:$0xff]  ;;  %v2701_v43 = vmax.f32 %v2573_v26, %v2669_v60  ;;  %v2733_v27 = vld [vmem:[#allocation3 + $0xc] sm:$0xff]  ;;  %2798 = vst [vmem:[%s4295_s28 + $0x10] sm:$0xff] %v2766_v61 }
 0x14a   : > { %v2639_v21 = vld [vmem:[#allocation3 + $0x23] sm:$0xff]  ;;  %v2706_v46 = vmax.f32 %v2578_v29, %v2674_v45  ;;  %v2614_v62 = vld [vmem:[#allocation3 + $0x7a] sm:$0xff]  ;;  %v4301_v22 = vld [vmem:[#allocation3 + $0x91] sm:$0xff]  ;;  %v2708_v59 = vmax.f32 %v2580_v39, %v2676_v14  ;;  %2800 = vst [vmem:[%s4295_s28 + $0x20] sm:$0xff] %v2768_v57 }
 0x14b   : > { %v2646_v0 = vld [vmem:[#allocation3 + $0x7b] sm:$0xff]  ;;  %v2671_v8 = vmax.f32 %v2607_v31, %v2639_v21  ;;  %v2740_v13 = vld [vmem:[#allocation3 + $0x64] sm:$0xff]  ;;  %v2547_v54 = vld [vmem:[#allocation3 + $0x51] sm:$0xff]  ;;  %v2765_v40 = vmax.f32 %v2701_v43, %v2733_v27 }
 0x14c   : > { %v2609_v63 = vld [vmem:[#allocation3 + $0x3a] sm:$0xff]  ;;  %v4614_v16 = vld [vmem:[#allocation53_spill] sm:$0xff]  ;;  %v2770_v1 = vmax.f32 %v2706_v46, %v2738_v34  ;;  %v2611_v10 = vld [vmem:[#allocation3 + $0x52] sm:$0xff]  ;;  %v2772_v45 = vmax.f32 %v2708_v59, %v2740_v13  ;;  %v2678_v15 = vmax.f32 %v2614_v62, %v2646_v0 }
 0x14d   : > { %v2641_v7 = vld [vmem:[#allocation3 + $0x3b] sm:$0xff]  ;;  %v2577_v25 = vmax.f32 %v4614_v16, %v2545_v56  ;;  %v2643_v38 = vld [vmem:[#allocation3 + $0x53] sm:$0xff]  ;;  %v2703_v50 = vmax.f32 %v2575_v52, %v2671_v8  ;;  %v2735_v53 = vld [vmem:[#allocation3 + $0x24] sm:$0xff]  ;;  %2797 = vst [vmem:[%s4295_s28 + $0x8] sm:$0xff] %v2765_v40 }
 0x14e   : > { %v2673_v48 = vmax.f32 %v2609_v63, %v2641_v7  ;;  %v2616_v9 = vld [vmem:[#allocation3 + $0x92] sm:$0xff]  ;;  %v2675_v35 = vmax.f32 %v2611_v10, %v2643_v38  ;;  %v2549_v41 = vld [vmem:[#allocation3 + $0x69] sm:$0xff]  ;;  %v2737_v29 = vld [vmem:[#allocation3 + $0x3c] sm:$0xff]  ;;  %2802 = vst [vmem:[%s4295_s28 + $0x30] sm:$0xff] %v2770_v1 }
 0x14f   : > { %v2648_v3 = vld [vmem:[#allocation3 + $0x93] sm:$0xff]  ;;  %v2613_v5 = vld [vmem:[#allocation3 + $0x6a] sm:$0xff]  ;;  %v2551_v32 = vld [vmem:[#allocation3 + $0x81] sm:$0xff]  ;;  %v2767_v58 = vmax.f32 %v2703_v50, %v2735_v53  ;;  %2804 = vst [vmem:[%s4295_s28 + $0x40] sm:$0xff] %v2772_v45 }
 0x150   : > { %v4615_v37 = vld [vmem:[#allocation55_spill] sm:$0xff]  ;;  %v2705_v4 = vmax.f32 %v2577_v25, %v2673_v48  ;;  %v4616_v12 = vld [vmem:[#allocation57_spill] sm:$0xff]  ;;  %v4617_v26 = vld [vmem:[#allocation58_spill] sm:$0xff]  ;;  %v2680_v13 = vmax.f32 %v2616_v9, %v2648_v3 }
 0x151   : > { %v2579_v18 = vmax.f32 %v4615_v37, %v2547_v54  ;;  %v2581_v39 = vmax.f32 %v4616_v12, %v2549_v41  ;;  %v2645_v24 = vld [vmem:[#allocation3 + $0x6b] sm:$0xff]  ;;  %v2582_v60 = vmax.f32 %v4617_v26, %v4298_v20  ;;  %v2739_v19 = vld [vmem:[#allocation3 + $0x54] sm:$0xff]  ;;  %v2615_v44 = vld [vmem:[#allocation3 + $0x82] sm:$0xff]  ;;  %2799 = vst [vmem:[%s4295_s28 + $0x18] sm:$0xff] %v2767_v58 }
 0x152   : > { %v2677_v34 = vmax.f32 %v2613_v5, %v2645_v24  ;;  %v2647_v52 = vld [vmem:[#allocation3 + $0x83] sm:$0xff]  ;;  %v2769_v21 = vmax.f32 %v2705_v4, %v2737_v29  ;;  %v2741_v56 = vld [vmem:[#allocation3 + $0x6c] sm:$0xff]  ;;  %v4619_v20 = vld [vmem:[#allocation7_spill] sm:$0xff] }
 0x153   : > { %v2707_v31 = vmax.f32 %v2579_v18, %v2675_v35  ;;  %v2742_v46 = vld [vmem:[#allocation3 + $0x7c] sm:$0xff]  ;;  %v2679_v27 = vmax.f32 %v2615_v44, %v2647_v52  ;;  %v2584_v61 = vmax.f32 %v4619_v20, %v4301_v22  ;;  %v2710_v62 = vmax.f32 %v2582_v60, %v2678_v15  ;;  %v2743_v0 = vld [vmem:[#allocation3 + $0x84] sm:$0xff]  ;;  %v2744_v1 = vld [vmem:[#allocation3 + $0x94] sm:$0xff] }
 0x154   : > { %v4618_v14 = vld [vmem:[#allocation8_spill] sm:$0xff]  ;;  %v2709_v7 = vmax.f32 %v2581_v39, %v2677_v34  ;;  %v2554_v25 = vld [vmem:[#allocation3 + $0xa9] sm:$0xff]  ;;  %2801 = vst [vmem:[%s4295_s28 + $0x28] sm:$0xff] %v2769_v21  ;;  %v2555_v9 = vld [vmem:[#allocation3 + $0xb1] sm:$0xff] }
 0x155   : > { %v2583_v43 = vmax.f32 %v4618_v14, %v2551_v32  ;;  %v2553_v8 = vld [vmem:[#allocation3 + $0x99] sm:$0xff]  ;;  %v2771_v63 = vmax.f32 %v2707_v31, %v2739_v19  ;;  %v4620_v54 = vld [vmem:[#allocation9_spill] sm:$0xff]  ;;  %v2774_v37 = vmax.f32 %v2710_v62, %v2742_v46  ;;  %v2712_v18 = vmax.f32 %v2584_v61, %v2680_v13  ;;  %v4624_v46 = vld [vmem:[#allocation14_spill] sm:$0xff] }
 0x156   : > { %v2617_v57 = vld [vmem:[#allocation3 + $0x9a] sm:$0xff]  ;;  %v2585_v10 = vmax.f32 %v4620_v54, %v2553_v8  ;;  %v2618_v22 = vld [vmem:[#allocation3 + $0xaa] sm:$0xff]  ;;  %v2773_v53 = vmax.f32 %v2709_v7, %v2741_v56  ;;  %v2619_v3 = vld [vmem:[#allocation3 + $0xb2] sm:$0xff] }
 0x157   : > { %v2649_v16 = vld [vmem:[#allocation3 + $0x9b] sm:$0xff]  ;;  %v2711_v48 = vmax.f32 %v2583_v43, %v2679_v27  ;;  %v2650_v50 = vld [vmem:[#allocation3 + $0xab] sm:$0xff]  ;;  %2803 = vst [vmem:[%s4295_s28 + $0x38] sm:$0xff] %v2771_v63  ;;  %v2651_v41 = vld [vmem:[#allocation3 + $0xb3] sm:$0xff]  ;;  %v2776_v60 = vmax.f32 %v2712_v18, %v2744_v1 }
 0x158   : > { %v2681_v38 = vmax.f32 %v2617_v57, %v2649_v16  ;;  %v4621_v59 = vld [vmem:[#allocation12_spill] sm:$0xff]  ;;  %v2682_v35 = vmax.f32 %v2618_v22, %v2650_v50  ;;  %v4622_v45 = vld [vmem:[#allocation11_spill] sm:$0xff]  ;;  %v2683_v39 = vmax.f32 %v2619_v3, %v2651_v41  ;;  %2805 = vst [vmem:[%s4295_s28 + $0x48] sm:$0xff] %v2773_v53  ;;  %2806 = vst [vmem:[%s4295_s28 + $0x50] sm:$0xff] %v2774_v37 }
 0x159   : > { %v2586_v40 = vmax.f32 %v4621_v59, %v2554_v25  ;;  %v2775_v5 = vmax.f32 %v2711_v48, %v2743_v0  ;;  %v2745_v29 = vld [vmem:[#allocation3 + $0x9c] sm:$0xff]  ;;  %v2587_v12 = vmax.f32 %v4622_v45, %v2555_v9  ;;  %v2746_v58 = vld [vmem:[#allocation3 + $0xac] sm:$0xff]  ;;  %v2747_v21 = vld [vmem:[#allocation3 + $0xb4] sm:$0xff]  ;;  %2808 = vst [vmem:[%s4295_s28 + $0x60] sm:$0xff] %v2776_v60 }
 0x15a   : > { %v2713_v4 = vmax.f32 %v2585_v10, %v2681_v38  ;;  %v2556_v24 = vld [vmem:[#allocation3 + $0xc1] sm:$0xff]  ;;  %v2557_v15 = vld [vmem:[#allocation3 + $0xc9] sm:$0xff]  ;;  %v2558_v8 = vld [vmem:[#allocation3 + $0xd9] sm:$0xff] }
 0x15b   : > { %v2620_v26 = vld [vmem:[#allocation3 + $0xc2] sm:$0xff]  ;;  %v2714_v32 = vmax.f32 %v2586_v40, %v2682_v35  ;;  %2807 = vst [vmem:[%s4295_s28 + $0x58] sm:$0xff] %v2775_v5  ;;  %v2715_v52 = vmax.f32 %v2587_v12, %v2683_v39  ;;  %v2589_v14 = vmax.f32 %v4624_v46, %v2557_v15  ;;  %v2621_v43 = vld [vmem:[#allocation3 + $0xca] sm:$0xff]  ;;  %v2622_v57 = vld [vmem:[#allocation3 + $0xda] sm:$0xff]  ;;  %v2590_v13 = vmax.f32 %v4098_v51, %v2558_v8 }
 0x15c   : > { %v4623_v31 = vld [vmem:[#allocation13_spill] sm:$0xff]  ;;  %v2777_v44 = vmax.f32 %v2713_v4, %v2745_v29  ;;  %v2654_v63 = vld [vmem:[#allocation3 + $0xdb] sm:$0xff]  ;;  %v2560_v59 = vld [vmem:[#allocation3 + $0xf1] sm:$0xff] }
 0x15d   : > { %v2588_v19 = vmax.f32 %v4623_v31, %v2556_v24  ;;  %v2652_v34 = vld [vmem:[#allocation3 + $0xc3] sm:$0xff]  ;;  %v2653_v27 = vld [vmem:[#allocation3 + $0xcb] sm:$0xff]  ;;  %v2778_v20 = vmax.f32 %v2714_v32, %v2746_v58  ;;  %v2779_v7 = vmax.f32 %v2715_v52, %v2747_v21  ;;  %v2686_v16 = vmax.f32 %v2622_v57, %v2654_v63  ;;  %v2656_v18 = vld [vmem:[#allocation3 + $0xf3] sm:$0xff] }
 0x15e   : > { %v2684_v56 = vmax.f32 %v2620_v26, %v2652_v34  ;;  %v2685_v61 = vmax.f32 %v2621_v43, %v2653_v27  ;;  %2809 = vst [vmem:[%s4295_s28 + $0x68] sm:$0xff] %v2777_v44  ;;  %v2748_v0 = vld [vmem:[#allocation3 + $0xc4] sm:$0xff]  ;;  %v2749_v54 = vld [vmem:[#allocation3 + $0xcc] sm:$0xff]  ;;  %v2750_v50 = vld [vmem:[#allocation3 + $0xdc] sm:$0xff]  ;;  %v2592_v37 = vmax.f32 %v4201_v30, %v2560_v59 }
 0x15f   : > { %v2559_v25 = vld [vmem:[#allocation3 + $0xe1] sm:$0xff]  ;;  %2810 = vst [vmem:[%s4295_s28 + $0x70] sm:$0xff] %v2778_v20  ;;  %2811 = vst [vmem:[%s4295_s28 + $0x78] sm:$0xff] %v2779_v7  ;;  %v2718_v22 = vmax.f32 %v2590_v13, %v2686_v16  ;;  %v2624_v51 = vld [vmem:[#allocation3 + $0xf2] sm:$0xff] }
 0x160   : > { %v2716_v62 = vmax.f32 %v2588_v19, %v2684_v56  ;;  %v2623_v48 = vld [vmem:[#allocation3 + $0xe2] sm:$0xff]  ;;  %v2717_v1 = vmax.f32 %v2589_v14, %v2685_v61  ;;  %v2591_v10 = vmax.f32 %v4193_v36, %v2559_v25  ;;  %v2688_v9 = vmax.f32 %v2624_v51, %v2656_v18  ;;  %v2561_v3 = vld [vmem:[#allocation3 + $0xf9] sm:$0xff]  ;;  %v2626_v24 = vld [vmem:[#allocation3 + $0x10a] sm:$0xff] }
 0x161   : > { %v2655_v38 = vld [vmem:[#allocation3 + $0xe3] sm:$0xff]  ;;  %v2625_v41 = vld [vmem:[#allocation3 + $0xfa] sm:$0xff]  ;;  %v2782_v36 = vmax.f32 %v2718_v22, %v2750_v50  ;;  %v2593_v45 = vmax.f32 %v4207_v28, %v2561_v3  ;;  %v2658_v32 = vld [vmem:[#allocation3 + $0x10b] sm:$0xff] }
 0x162   : > { %v2780_v40 = vmax.f32 %v2716_v62, %v2748_v0  ;;  %v2687_v53 = vmax.f32 %v2623_v48, %v2655_v38  ;;  %v2781_v35 = vmax.f32 %v2717_v1, %v2749_v54  ;;  %v2657_v5 = vld [vmem:[#allocation3 + $0xfb] sm:$0xff]  ;;  %v2751_v29 = vld [vmem:[#allocation3 + $0xe4] sm:$0xff]  ;;  %v2720_v30 = vmax.f32 %v2592_v37, %v2688_v9  ;;  %v2563_v58 = vld [vmem:[#allocation3 + $0x111] sm:$0xff] }
 0x163   : > { %v2689_v12 = vmax.f32 %v2625_v41, %v2657_v5  ;;  %v2562_v39 = vld [vmem:[#allocation3 + $0x109] sm:$0xff]  ;;  %v2752_v26 = vld [vmem:[#allocation3 + $0xf4] sm:$0xff]  ;;  %2814 = vst [vmem:[%s4295_s28 + $0x90] sm:$0xff] %v2782_v36  ;;  %v2753_v34 = vld [vmem:[#allocation3 + $0xfc] sm:$0xff]  ;;  %v2690_v15 = vmax.f32 %v2626_v24, %v2658_v32  ;;  %v2595_v44 = vmax.f32 %v4222_v33, %v2563_v58 }
 0x164   : > { %2812 = vst [vmem:[%s4295_s28 + $0x80] sm:$0xff] %v2780_v40  ;;  %v2719_v4 = vmax.f32 %v2591_v10, %v2687_v53  ;;  %2813 = vst [vmem:[%s4295_s28 + $0x88] sm:$0xff] %v2781_v35  ;;  %v2594_v60 = vmax.f32 %v4214_v55, %v2562_v39  ;;  %v2627_v28 = vld [vmem:[#allocation3 + $0x112] sm:$0xff]  ;;  %v2784_v21 = vmax.f32 %v2720_v30, %v2752_v26  ;;  %v2564_v46 = vld [vmem:[#allocation3 + $0x121] sm:$0xff] }
 0x165   : > { %v2721_v19 = vmax.f32 %v2593_v45, %v2689_v12  ;;  %v2659_v52 = vld [vmem:[#allocation3 + $0x113] sm:$0xff]  ;;  %v2628_v14 = vld [vmem:[#allocation3 + $0x122] sm:$0xff]  ;;  %v2596_v61 = vmax.f32 %v4229_v23, %v2564_v46  ;;  %v2629_v63 = vld [vmem:[#allocation3 + $0x12a] sm:$0xff] }
 0x166   : > { %v2783_v31 = vmax.f32 %v2719_v4, %v2751_v29  ;;  %v2691_v56 = vmax.f32 %v2627_v28, %v2659_v52  ;;  %v2660_v43 = vld [vmem:[#allocation3 + $0x123] sm:$0xff]  ;;  %v2722_v27 = vmax.f32 %v2594_v60, %v2690_v15  ;;  %v2754_v20 = vld [vmem:[#allocation3 + $0x10c] sm:$0xff]  ;;  %2816 = vst [vmem:[%s4295_s28 + $0xa0] sm:$0xff] %v2784_v21  ;;  %v2755_v7 = vld [vmem:[#allocation3 + $0x114] sm:$0xff] }
 0x167   : > { %v2785_v55 = vmax.f32 %v2721_v19, %v2753_v34  ;;  %v2692_v8 = vmax.f32 %v2628_v14, %v2660_v43  ;;  %v2565_v57 = vld [vmem:[#allocation3 + $0x129] sm:$0xff]  ;;  %v2566_v13 = vld [vmem:[#allocation3 + $0x139] sm:$0xff]  ;;  %v2567_v40 = vld [vmem:[#allocation3 + $0x141] sm:$0xff] }
 0x168   : > { %2815 = vst [vmem:[%s4295_s28 + $0x98] sm:$0xff] %v2783_v31  ;;  %v2723_v33 = vmax.f32 %v2595_v44, %v2691_v56  ;;  %v2597_v62 = vmax.f32 %v4235_v6, %v2565_v57  ;;  %v2661_v0 = vld [vmem:[#allocation3 + $0x12b] sm:$0xff]  ;;  %v2786_v16 = vmax.f32 %v2722_v27, %v2754_v20  ;;  %v2598_v54 = vmax.f32 %v4243_v17, %v2566_v13  ;;  %v2630_v23 = vld [vmem:[#allocation3 + $0x13a] sm:$0xff]  ;;  %v2631_v22 = vld [vmem:[#allocation3 + $0x142] sm:$0xff] }
 0x169   : > { %2817 = vst [vmem:[%s4295_s28 + $0xa8] sm:$0xff] %v2785_v55  ;;  %v2724_v25 = vmax.f32 %v2596_v61, %v2692_v8  ;;  %v2756_v48 = vld [vmem:[#allocation3 + $0x124] sm:$0xff]  ;;  %v2693_v1 = vmax.f32 %v2629_v63, %v2661_v0  ;;  %v2662_v10 = vld [vmem:[#allocation3 + $0x13b] sm:$0xff]  ;;  %v2757_v37 = vld [vmem:[#allocation3 + $0x12c] sm:$0xff]  ;;  %v2599_v51 = vmax.f32 %v4249_v47, %v2567_v40 }
 0x16a   : > { %v2787_v38 = vmax.f32 %v2723_v33, %v2755_v7  ;;  %v2694_v59 = vmax.f32 %v2630_v23, %v2662_v10  ;;  %v2663_v50 = vld [vmem:[#allocation3 + $0x143] sm:$0xff]  ;;  %2818 = vst [vmem:[%s4295_s28 + $0xb0] sm:$0xff] %v2786_v16  ;;  %v2568_v35 = vld [vmem:[#allocation3 + $0x151] sm:$0xff]  ;;  %v2569_v36 = vld [vmem:[#allocation3 + $0x159] sm:$0xff] }
 0x16b   : > { %v2788_v6 = vmax.f32 %v2724_v25, %v2756_v48  ;;  %v2725_v53 = vmax.f32 %v2597_v62, %v2693_v1  ;;  %v2695_v18 = vmax.f32 %v2631_v22, %v2663_v50  ;;  %v2632_v9 = vld [vmem:[#allocation3 + $0x152] sm:$0xff]  ;;  %v2758_v3 = vld [vmem:[#allocation3 + $0x13c] sm:$0xff]  ;;  %v2600_v41 = vmax.f32 %v4257_v49, %v2568_v35  ;;  %v2759_v45 = vld [vmem:[#allocation3 + $0x144] sm:$0xff] }
 0x16c   : > { %2819 = vst [vmem:[%s4295_s28 + $0xb8] sm:$0xff] %v2787_v38  ;;  %v2726_v17 = vmax.f32 %v2598_v54, %v2694_v59  ;;  %v2664_v5 = vld [vmem:[#allocation3 + $0x153] sm:$0xff]  ;;  %v2601_v39 = vmax.f32 %v4261_v42, %v2569_v36  ;;  %v2665_v24 = vld [vmem:[#allocation3 + $0x15b] sm:$0xff]  ;;  %v2570_v60 = vld [vmem:[#allocation3 + $0x169] sm:$0xff] }
 0x16d   : > { %2820 = vst [vmem:[%s4295_s28 + $0xc0] sm:$0xff] %v2788_v6  ;;  %v2789_v4 = vmax.f32 %v2725_v53, %v2757_v37  ;;  %v2727_v29 = vmax.f32 %v2599_v51, %v2695_v18  ;;  %v2696_v12 = vmax.f32 %v2632_v9, %v2664_v5  ;;  %v2633_v47 = vld [vmem:[#allocation3 + $0x15a] sm:$0xff]  ;;  %v2634_v32 = vld [vmem:[#allocation3 + $0x16a] sm:$0xff]  ;;  %v2602_v19 = vmax.f32 %v4265_v11, %v2570_v60  ;;  %v2635_v44 = vld [vmem:[#allocation3 + $0x172] sm:$0xff] }
 0x16e   : > { %v2790_v30 = vmax.f32 %v2726_v17, %v2758_v3  ;;  %v2697_v26 = vmax.f32 %v2633_v47, %v2665_v24  ;;  %v2666_v58 = vld [vmem:[#allocation3 + $0x16b] sm:$0xff]  ;;  %v2760_v42 = vld [vmem:[#allocation3 + $0x154] sm:$0xff]  ;;  %v2761_v46 = vld [vmem:[#allocation3 + $0x15c] sm:$0xff] }
 0x16f   : > { %2821 = vst [vmem:[%s4295_s28 + $0xc8] sm:$0xff] %v2789_v4  ;;  %v2791_v49 = vmax.f32 %v2727_v29, %v2759_v45  ;;  %v2728_v31 = vmax.f32 %v2600_v41, %v2696_v12  ;;  %v2698_v34 = vmax.f32 %v2634_v32, %v2666_v58  ;;  %v2571_v15 = vld [vmem:[#allocation3 + $0x171] sm:$0xff] }
 0x170   : > { %2822 = vst [vmem:[%s4295_s28 + $0xd0] sm:$0xff] %v2790_v30  ;;  %v2729_v28 = vmax.f32 %v2601_v39, %v2697_v26  ;;  %v2603_v52 = vmax.f32 %v4274_v2, %v2571_v15  ;;  %v2667_v21 = vld [vmem:[#allocation3 + $0x173] sm:$0xff] }
 0x171   : > { %2823 = vst [vmem:[%s4295_s28 + $0xd8] sm:$0xff] %v2791_v49  ;;  %v2792_v56 = vmax.f32 %v2728_v31, %v2760_v42  ;;  %v2730_v14 = vmax.f32 %v2602_v19, %v2698_v34  ;;  %v2699_v43 = vmax.f32 %v2635_v44, %v2667_v21  ;;  %v2762_v11 = vld [vmem:[#allocation3 + $0x16c] sm:$0xff]  ;;  %v2763_v61 = vld [vmem:[#allocation3 + $0x174] sm:$0xff] }
 0x172   : > { %v2793_v55 = vmax.f32 %v2729_v28, %v2761_v46 }
 0x173   : > { %2824 = vst [vmem:[%s4295_s28 + $0xe0] sm:$0xff] %v2792_v56  ;;  %v2794_v27 = vmax.f32 %v2730_v14, %v2762_v11  ;;  %v2731_v20 = vmax.f32 %v2603_v52, %v2699_v43 }
 0x174   : > { %2825 = vst [vmem:[%s4295_s28 + $0xe8] sm:$0xff] %v2793_v55 }
 0x175   : > { %2826 = vst [vmem:[%s4295_s28 + $0xf0] sm:$0xff] %v2794_v27  ;;  %v2795_v8 = vmax.f32 %v2731_v20, %v2763_v61 }
 0x177   : > { %2827 = vst [vmem:[%s4295_s28 + $0xf8] sm:$0xff] %v2795_v8 }
 0x178 PF: > { %s14_s14 = sadd.s32 1, %s3075_s14   ;;  %s4625_s12 = smov %s3071_s13 }
 0x179   : > { %p11_p5 = scmp.ge.s32.totalorder %s14_s14, 4   ;;  %s4626_s13 = smov %s4628_s15 }
 0x17b   :  { %13 = sbr.rel (!%p11_p5) target bundleno = 2 (0x2), region = 83 }

</bundles_post_ra>
